<compile_context>
chip_gen: v5e
topology: v5e:2x2
jax: 0.10.0
libtpu: 0.0.40
codegen_flags: <defaults>
</compile_context>

<pallas_src>
import jax
import jax.numpy as jnp
from jax.experimental import pallas as pl
from jax.experimental.pallas import tpu as pltpu

# --- model hyper-parameters (from the PyTorch spec) ---
N_EMBED = 32
BLOCK_SIZE = 256
N_HEAD = 6
HEAD_SIZE = N_EMBED // N_HEAD      # = 5
HEAD_PAD = 8                       # head_size zero-padded 5 -> 8 (lane aligned)
N_LAYER = 3
HIDDEN = 4 * N_EMBED               # = 128
VOCAB_SIZE = 65                    # vocab_size = len(set(text)); fixed here
VOCAB_PAD = 128                    # lane-dense logits / one-hot gather


def _layer_norm(x, g, b, eps=1e-5):
    """PyTorch nn.LayerNorm semantics (biased variance, eps inside sqrt)."""
    mu = jnp.mean(x, axis=-1, keepdims=True)
    xc = x - mu
    var = jnp.mean(xc * xc, axis=-1, keepdims=True)
    return xc * jax.lax.rsqrt(var + eps) * g + b


# ---------------------------------------------------------------------------
# The single fused kernel: embedding -> N_LAYER blocks -> final LN -> lm_head
# ---------------------------------------------------------------------------
def _gpt_kernel(idx_ref, tok_ref, pos_ref,
                ln1g_ref, ln1b_ref, wq_ref, wk_ref, wvo_ref, bp_ref,
                ln2g_ref, ln2b_ref, w1_ref, b1_ref, w2_ref, b2_ref,
                lnfg_ref, lnfb_ref, lmw_ref, lmb_ref,
                o_ref, sa_ref):
    f32 = jnp.float32
    ids = idx_ref[0]                                   # (T, 1) int32
    T = ids.shape[0]
    VP, C = tok_ref.shape
    L, _, QKW = wq_ref.shape
    NH = wvo_ref.shape[0] // L
    HSP = QKW // NH

    # --- token + position embedding (lane-dense one-hot gather on the MXU) ---
    onehot = (ids == jax.lax.broadcasted_iota(jnp.int32, (T, VP), 1)).astype(f32)
    x = jnp.dot(onehot, tok_ref[...], preferred_element_type=f32) + pos_ref[...]

    # --- query-row tiling for attention (bounds vreg pressure) ---
    TQ = 64 if (T > 64 and T % 64 == 0) else T
    n_qt = T // TQ
    col_ids = jax.lax.broadcasted_iota(jnp.int32, (TQ, T), 1)
    row_ids = jax.lax.broadcasted_iota(jnp.int32, (TQ, T), 0)

    for l in range(L):
        # ---- ln1 + causal multi-head self-attention (dropout = identity) ----
        xn = _layer_norm(x, ln1g_ref[l], ln1b_ref[l])                 # (T, C)
        # All-head Q / K projections in one MXU pass each.  The 1/sqrt(hs)
        # scale is folded into Wq; head_size is zero-padded 5 -> 8 so the
        # padded columns contribute exactly 0 to q.k^T and slices are aligned.
        q_all = jnp.dot(xn, wq_ref[l], preferred_element_type=f32)    # (T, NH*HSP)
        k_all = jnp.dot(xn, wk_ref[l], preferred_element_type=f32)    # (T, NH*HSP)
        # Merged value+output projection per head: v'_h = xn @ (Wv_h @ Wp_h).
        vo = [jnp.dot(xn, wvo_ref[l * NH + h], preferred_element_type=f32)
              for h in range(NH)]                                     # NH x (T, C)

        for qt in range(n_qt):
            q0 = qt * TQ
            causal = col_ids <= (row_ids + q0)                        # (TQ, T)
            acc = jnp.zeros((TQ, C), f32)
            for h in range(NH):
                qh = q_all[q0:q0 + TQ, h * HSP:(h + 1) * HSP]         # (TQ, HSP)
                kh = k_all[:, h * HSP:(h + 1) * HSP]                  # (T, HSP)
                wei = jax.lax.dot_general(qh, kh, (((1,), (1,)), ((), ())),
                                          preferred_element_type=f32)  # (TQ, T)
                wei = jnp.where(causal, wei, -1e30)
                wei = wei - jnp.max(wei, axis=-1, keepdims=True)
                p = jnp.exp(wei)
                rs = jnp.sum(p, axis=-1, keepdims=True)               # (TQ, 1)
                # Normalize AFTER P@V: a (TQ, C) divide instead of (TQ, T).
                acc = acc + jnp.dot(p, vo[h], preferred_element_type=f32) / rs
            sa_ref[q0:q0 + TQ, :] = acc

        x = x + sa_ref[...] + bp_ref[l]                               # residual 1

        # ---- ln2 + FFN (Linear -> ReLU -> Linear), dropout = identity ----
        xn2 = _layer_norm(x, ln2g_ref[l], ln2b_ref[l])
        hdn = jnp.maximum(
            jnp.dot(xn2, w1_ref[l], preferred_element_type=f32) + b1_ref[l], 0.0)
        x = x + jnp.dot(hdn, w2_ref[l], preferred_element_type=f32) + b2_ref[l]

    # ---- final LayerNorm + lm_head (vocab padded to 128 lanes: dense store) ----
    xf = _layer_norm(x, lnfg_ref[...], lnfb_ref[...])
    o_ref[0] = (jnp.dot(xf, lmw_ref[...], preferred_element_type=f32)
                + lmb_ref[...]).astype(o_ref.dtype)


# ---------------------------------------------------------------------------
# Wrapper: full GptModel forward (eval mode; targets=None path -> logits only)
# ---------------------------------------------------------------------------
@jax.jit
def gpt_forward(idx, packed):
    B, T = idx.shape
    C, H, L, NH = N_EMBED, HIDDEN, N_LAYER, N_HEAD
    QKW = NH * HEAD_PAD
    f32 = jnp.float32

    idx3 = idx.astype(jnp.int32).reshape(B, T, 1)
    pos = packed['pos_emb'][:T]
    const2 = lambda b: (0, 0)
    const3 = lambda b: (0, 0, 0)

    logits_pad = pl.pallas_call(
        _gpt_kernel,
        out_shape=jax.ShapeDtypeStruct((B, T, VOCAB_PAD), f32),
        grid_spec=pltpu.PrefetchScalarGridSpec(
            num_scalar_prefetch=0,
            grid=(B,),
            in_specs=[
                pl.BlockSpec((1, T, 1), lambda b: (b, 0, 0)),        # idx
                pl.BlockSpec((VOCAB_PAD, C), const2),                # tok_emb (padded)
                pl.BlockSpec((T, C), const2),                        # pos_emb[:T]
                pl.BlockSpec((L, 1, C), const3),                     # ln1 gamma
                pl.BlockSpec((L, 1, C), const3),                     # ln1 beta
                pl.BlockSpec((L, C, QKW), const3),                   # Wq (scaled+padded)
                pl.BlockSpec((L, C, QKW), const3),                   # Wk (padded)
                pl.BlockSpec((L * NH, C, C), const3),                # Wv@Wp merged
                pl.BlockSpec((L, 1, C), const3),                     # proj bias
                pl.BlockSpec((L, 1, C), const3),                     # ln2 gamma
                pl.BlockSpec((L, 1, C), const3),                     # ln2 beta
                pl.BlockSpec((L, C, H), const3),                     # ffn W1
                pl.BlockSpec((L, 1, H), const3),                     # ffn b1
                pl.BlockSpec((L, H, C), const3),                     # ffn W2
                pl.BlockSpec((L, 1, C), const3),                     # ffn b2
                pl.BlockSpec((1, C), const2),                        # ln_f gamma
                pl.BlockSpec((1, C), const2),                        # ln_f beta
                pl.BlockSpec((C, VOCAB_PAD), const2),                # lm_head W (padded)
                pl.BlockSpec((1, VOCAB_PAD), const2),                # lm_head b (padded)
            ],
            out_specs=pl.BlockSpec((1, T, VOCAB_PAD), lambda b: (b, 0, 0)),
            scratch_shapes=[pltpu.VMEM((T, C), f32)],                # attention out
        ),
        compiler_params=pltpu.CompilerParams(dimension_semantics=("parallel",)),
    )(idx3, packed['tok_emb_pad'], pos,
      packed['ln1_g'], packed['ln1_b'], packed['wq_pad'], packed['wk_pad'],
      packed['wvo'], packed['bp'], packed['ln2_g'], packed['ln2_b'],
      packed['w1'], packed['b1'], packed['w2'], packed['b2'],
      packed['ln_f_g'], packed['ln_f_b'], packed['lm_w_pad'], packed['lm_b_pad'])
    return logits_pad[:, :, :VOCAB_SIZE]


# ---------------------------------------------------------------------------
# Deterministic parameter init (mirrors GptModel._init_weights: normal(0, .02)
# for Linear/Embedding weights, zero biases; LayerNorm gamma=1, beta=0).
# ---------------------------------------------------------------------------
def init_params(key):
    def nrm(k, shape):
        return 0.02 * jax.random.normal(k, shape, jnp.float32)

    keys = jax.random.split(key, 3)
    params = {
        'tok_emb': nrm(keys[0], (VOCAB_SIZE, N_EMBED)),
        'pos_emb': nrm(keys[1], (BLOCK_SIZE, N_EMBED)),
        'lm_w': nrm(keys[2], (N_EMBED, VOCAB_SIZE)),
        'lm_b': jnp.zeros((1, VOCAB_SIZE), jnp.float32),
        'ln_f_g': jnp.ones((1, N_EMBED), jnp.float32),
        'ln_f_b': jnp.zeros((1, N_EMBED), jnp.float32),
        'blocks': [],
    }
    for l in range(N_LAYER):
        ks = jax.random.split(jax.random.fold_in(key, 100 + l), 6)
        params['blocks'].append({
            'ln1_g': jnp.ones((1, N_EMBED), jnp.float32),
            'ln1_b': jnp.zeros((1, N_EMBED), jnp.float32),
            'wq': nrm(ks[0], (N_HEAD, N_EMBED, HEAD_SIZE)),
            'wk': nrm(ks[1], (N_HEAD, N_EMBED, HEAD_SIZE)),
            'wv': nrm(ks[2], (N_HEAD, N_EMBED, HEAD_SIZE)),
            'wp': nrm(ks[3], (N_HEAD, HEAD_SIZE, N_EMBED)),
            'bp': jnp.zeros((1, N_EMBED), jnp.float32),
            'ln2_g': jnp.ones((1, N_EMBED), jnp.float32),
            'ln2_b': jnp.zeros((1, N_EMBED), jnp.float32),
            'w1': nrm(ks[4], (N_EMBED, HIDDEN)),
            'b1': jnp.zeros((1, HIDDEN), jnp.float32),
            'w2': nrm(ks[5], (HIDDEN, N_EMBED)),
            'b2': jnp.zeros((1, N_EMBED), jnp.float32),
        })
    return params


def pack_params(params):
    """One-time parameter prep for the fused kernel:
         * fold 1/sqrt(head_size) into Wq,
         * zero-pad head_size 5 -> 8 and stack heads (single (C,48) Q/K matmul),
         * merge value & output projections per head (W_vo = Wv @ Wp, C x C),
         * zero-pad vocab to 128 lanes (one-hot gather + lane-dense logit store),
         * stack per-layer params on a leading (N_LAYER, ...) axis.
    """
    HIGH = jax.lax.Precision.HIGHEST
    scale = float(HEAD_SIZE) ** -0.5
    C, HS, HSP, NH = N_EMBED, HEAD_SIZE, HEAD_PAD, N_HEAD

    def pad_heads(w, s=1.0):
        # (NH, C, HS) -> (C, NH*HSP) with zero columns HS..HSP per head.
        wpad = jnp.pad(w * s, ((0, 0), (0, 0), (0, HSP - HS)))
        return jnp.transpose(wpad, (1, 0, 2)).reshape(C, NH * HSP)

    blocks = params['blocks']
    stack = lambda name: jnp.stack([blk[name] for blk in blocks])
    packed = {
        'tok_emb_pad': jnp.pad(params['tok_emb'],
                               ((0, VOCAB_PAD - VOCAB_SIZE), (0, 0))),
        'pos_emb': params['pos_emb'],
        'ln_f_g': params['ln_f_g'], 'ln_f_b': params['ln_f_b'],
        'lm_w_pad': jnp.pad(params['lm_w'], ((0, 0), (0, VOCAB_PAD - VOCAB_SIZE))),
        'lm_b_pad': jnp.pad(params['lm_b'], ((0, 0), (0, VOCAB_PAD - VOCAB_SIZE))),
        'ln1_g': stack('ln1_g'), 'ln1_b': stack('ln1_b'),
        'ln2_g': stack('ln2_g'), 'ln2_b': stack('ln2_b'),
        'bp': stack('bp'),
        'w1': stack('w1'), 'b1': stack('b1'),
        'w2': stack('w2'), 'b2': stack('b2'),
        'wq_pad': jnp.stack([pad_heads(blk['wq'], scale) for blk in blocks]),
        'wk_pad': jnp.stack([pad_heads(blk['wk']) for blk in blocks]),
        # (N_LAYER*N_HEAD, C, C): W_vo[l*NH+h] = Wv[l,h] @ Wp[l,h]
        'wvo': jnp.concatenate(
            [jnp.einsum('hck,hkd->hcd', blk['wv'], blk['wp'], precision=HIGH)
             for blk in blocks], axis=0),
    }
    return packed


# ---------------------------------------------------------------------------
# Pure-JAX reference (eval mode) for verification.
# ---------------------------------------------------------------------------
def ref_forward(idx, params):
    HIGH = jax.lax.Precision.HIGHEST
    B, T = idx.shape
    x = params['tok_emb'][idx] + params['pos_emb'][:T][None]
    causal = jnp.tril(jnp.ones((T, T), dtype=bool))
    for blk in params['blocks']:
        xn = _layer_norm(x, blk['ln1_g'], blk['ln1_b'])
        heads = []
        for h in range(N_HEAD):
            q = jnp.einsum('btc,ch->bth', xn, blk['wq'][h], precision=HIGH)
            k = jnp.einsum('btc,ch->bth', xn, blk['wk'][h], precision=HIGH)
            v = jnp.einsum('btc,ch->bth', xn, blk['wv'][h], precision=HIGH)
            wei = jnp.einsum('bth,bsh->bts', q, k, precision=HIGH) * (HEAD_SIZE ** -0.5)
            wei = jnp.where(causal[None], wei, -jnp.inf)
            wei = jax.nn.softmax(wei, axis=-1)
            heads.append(jnp.einsum('bts,bsh->bth', wei, v, precision=HIGH))
        cat = jnp.concatenate(heads, axis=-1)
        wp_full = blk['wp'].reshape(N_HEAD * HEAD_SIZE, N_EMBED)
        x = x + jnp.einsum('btk,kc->btc', cat, wp_full, precision=HIGH) + blk['bp']
        xn2 = _layer_norm(x, blk['ln2_g'], blk['ln2_b'])
        hdn = jnp.maximum(
            jnp.einsum('btc,cf->btf', xn2, blk['w1'], precision=HIGH) + blk['b1'], 0.0)
        x = x + jnp.einsum('btf,fc->btc', hdn, blk['w2'], precision=HIGH) + blk['b2']
    xf = _layer_norm(x, params['ln_f_g'], params['ln_f_b'])
    return jnp.einsum('btc,cv->btv', xf, params['lm_w'], precision=HIGH) + params['lm_b']


if __name__ == "__main__":
    key = jax.random.PRNGKey(0)
    kp, ki = jax.random.split(key)

    params = init_params(kp)
    packed = pack_params(params)

    # Small primary test (B=2, T=8).
    B, T = 2, 8
    idx = jax.random.randint(ki, (B, T), 0, VOCAB_SIZE, dtype=jnp.int32)
    logits = gpt_forward(idx, packed)
    jax.block_until_ready(logits)

    logits_ref = ref_forward(idx, params)
    assert logits.shape == (B, T, VOCAB_SIZE)
    assert bool(jnp.all(jnp.isfinite(logits))), "non-finite logits"
    assert jnp.allclose(logits, logits_ref, atol=1e-3, rtol=1e-2), "mismatch vs reference"

    # Secondary check exercising the multi-query-tile attention path (T=128 -> 2 tiles).
    idx2 = jax.random.randint(jax.random.fold_in(ki, 1), (B, 128), 0, VOCAB_SIZE,
                              dtype=jnp.int32)
    logits2 = gpt_forward(idx2, packed)
    jax.block_until_ready(logits2)
    logits2_ref = ref_forward(idx2, params)
    assert bool(jnp.all(jnp.isfinite(logits2))), "non-finite logits (T=128)"
    assert jnp.allclose(logits2, logits2_ref, atol=1e-3, rtol=1e-2), "mismatch (T=128)"

    print("KERNEL_OK")
</pallas_src>

<mosaic_0001>
module attributes {stable_mosaic.version = 11 : i64} {
  func.func @_gpt_kernel(%arg0: i32, %arg1: memref<1x8x1xi32, #tpu.memory_space<vmem>>, %arg2: memref<128x32xf32, #tpu.memory_space<vmem>>, %arg3: memref<8x32xf32, #tpu.memory_space<vmem>>, %arg4: memref<3x1x32xf32, #tpu.memory_space<vmem>>, %arg5: memref<3x1x32xf32, #tpu.memory_space<vmem>>, %arg6: memref<3x32x48xf32, #tpu.memory_space<vmem>>, %arg7: memref<3x32x48xf32, #tpu.memory_space<vmem>>, %arg8: memref<18x32x32xf32, #tpu.memory_space<vmem>>, %arg9: memref<3x1x32xf32, #tpu.memory_space<vmem>>, %arg10: memref<3x1x32xf32, #tpu.memory_space<vmem>>, %arg11: memref<3x1x32xf32, #tpu.memory_space<vmem>>, %arg12: memref<3x32x128xf32, #tpu.memory_space<vmem>>, %arg13: memref<3x1x128xf32, #tpu.memory_space<vmem>>, %arg14: memref<3x128x32xf32, #tpu.memory_space<vmem>>, %arg15: memref<3x1x32xf32, #tpu.memory_space<vmem>>, %arg16: memref<1x32xf32, #tpu.memory_space<vmem>>, %arg17: memref<1x32xf32, #tpu.memory_space<vmem>>, %arg18: memref<32x128xf32, #tpu.memory_space<vmem>>, %arg19: memref<1x128xf32, #tpu.memory_space<vmem>>, %arg20: memref<1x8x128xf32, #tpu.memory_space<vmem>>, %arg21: memref<8x32xf32, #tpu.memory_space<vmem>>) attributes {dimension_semantics = [#tpu.dimension_semantics<parallel>], iteration_bounds = array<i64: 2>, scalar_prefetch = 0 : i64, scratch_operands = 1 : i64, tpu.core_type = #tpu.core_type<tc>, window_params = [{transform_indices = @transform_0, window_bounds = array<i64: 1, 8, 1>}, {pipeline_mode = #tpu.pipeline_mode<synchronous>, transform_indices = @transform_1, window_bounds = array<i64: 128, 32>}, {pipeline_mode = #tpu.pipeline_mode<synchronous>, transform_indices = @transform_2, window_bounds = array<i64: 8, 32>}, {pipeline_mode = #tpu.pipeline_mode<synchronous>, transform_indices = @transform_3, window_bounds = array<i64: 3, 1, 32>}, {pipeline_mode = #tpu.pipeline_mode<synchronous>, transform_indices = @transform_4, window_bounds = array<i64: 3, 1, 32>}, {pipeline_mode = #tpu.pipeline_mode<synchronous>, transform_indices = @transform_5, window_bounds = array<i64: 3, 32, 48>}, {pipeline_mode = #tpu.pipeline_mode<synchronous>, transform_indices = @transform_6, window_bounds = array<i64: 3, 32, 48>}, {pipeline_mode = #tpu.pipeline_mode<synchronous>, transform_indices = @transform_7, window_bounds = array<i64: 18, 32, 32>}, {pipeline_mode = #tpu.pipeline_mode<synchronous>, transform_indices = @transform_8, window_bounds = array<i64: 3, 1, 32>}, {pipeline_mode = #tpu.pipeline_mode<synchronous>, transform_indices = @transform_9, window_bounds = array<i64: 3, 1, 32>}, {pipeline_mode = #tpu.pipeline_mode<synchronous>, transform_indices = @transform_10, window_bounds = array<i64: 3, 1, 32>}, {pipeline_mode = #tpu.pipeline_mode<synchronous>, transform_indices = @transform_11, window_bounds = array<i64: 3, 32, 128>}, {pipeline_mode = #tpu.pipeline_mode<synchronous>, transform_indices = @transform_12, window_bounds = array<i64: 3, 1, 128>}, {pipeline_mode = #tpu.pipeline_mode<synchronous>, transform_indices = @transform_13, window_bounds = array<i64: 3, 128, 32>}, {pipeline_mode = #tpu.pipeline_mode<synchronous>, transform_indices = @transform_14, window_bounds = array<i64: 3, 1, 32>}, {pipeline_mode = #tpu.pipeline_mode<synchronous>, transform_indices = @transform_15, window_bounds = array<i64: 1, 32>}, {pipeline_mode = #tpu.pipeline_mode<synchronous>, transform_indices = @transform_16, window_bounds = array<i64: 1, 32>}, {pipeline_mode = #tpu.pipeline_mode<synchronous>, transform_indices = @transform_17, window_bounds = array<i64: 32, 128>}, {pipeline_mode = #tpu.pipeline_mode<synchronous>, transform_indices = @transform_18, window_bounds = array<i64: 1, 128>}, {transform_indices = @transform_19, window_bounds = array<i64: 1, 8, 128>}]} {
    %c0 = arith.constant 0 : index
    %c0_0 = arith.constant 0 : index
    %c0_1 = arith.constant 0 : index
    %0 = vector.load %arg1[%c0, %c0_0, %c0_1] : memref<1x8x1xi32, #tpu.memory_space<vmem>>, vector<1x8x1xi32>
    %1 = vector.shape_cast %0 : vector<1x8x1xi32> to vector<8x1xi32>
    %2 = tpu.iota {dimensions = array<i32: 1>} : vector<8x128xi32>
    %3 = vector.broadcast %1 : vector<8x1xi32> to vector<8x128xi32>
    %4 = arith.cmpi eq, %3, %2 : vector<8x128xi32>
    %5 = arith.extui %4 : vector<8x128xi1> to vector<8x128xi32>
    %6 = arith.sitofp %5 : vector<8x128xi32> to vector<8x128xf32>
    %c0_2 = arith.constant 0 : index
    %c0_3 = arith.constant 0 : index
    %7 = vector.load %arg2[%c0_2, %c0_3] : memref<128x32xf32, #tpu.memory_space<vmem>>, vector<128x32xf32>
    %cst = arith.constant dense<0.000000e+00> : vector<8x32xf32>
    %8 = tpu.matmul %6, %7, %cst {dimension_numbers = #tpu.dot_dimension_numbers<[1], [0], [0], [1], [0, 0, 1, 1], [], []>} : vector<8x128xf32>, vector<128x32xf32>, vector<8x32xf32> -> vector<8x32xf32>
    %c0_4 = arith.constant 0 : index
    %c0_5 = arith.constant 0 : index
    %9 = vector.load %arg3[%c0_4, %c0_5] : memref<8x32xf32, #tpu.memory_space<vmem>>, vector<8x32xf32>
    %10 = arith.addf %8, %9 : vector<8x32xf32>
    %11 = tpu.iota {dimensions = array<i32: 1>} : vector<8x8xi32>
    %12 = tpu.iota {dimensions = array<i32: 0>} : vector<8x8xi32>
    %c0_6 = arith.constant 0 : index
    %c0_7 = arith.constant 0 : index
    %c0_8 = arith.constant 0 : index
    %13 = vector.load %arg4[%c0_6, %c0_7, %c0_8] : memref<3x1x32xf32, #tpu.memory_space<vmem>>, vector<1x1x32xf32>
    %14 = vector.shape_cast %13 : vector<1x1x32xf32> to vector<1x32xf32>
    %c0_9 = arith.constant 0 : index
    %c0_10 = arith.constant 0 : index
    %c0_11 = arith.constant 0 : index
    %15 = vector.load %arg5[%c0_9, %c0_10, %c0_11] : memref<3x1x32xf32, #tpu.memory_space<vmem>>, vector<1x1x32xf32>
    %16 = vector.shape_cast %15 : vector<1x1x32xf32> to vector<1x32xf32>
    %cst_12 = arith.constant dense<0.000000e+00> : vector<8xf32>
    %17 = vector.multi_reduction <add>, %10, %cst_12 [1] : vector<8x32xf32> to vector<8xf32>
    %18 = vector.shape_cast %17 : vector<8xf32> to vector<8x1xf32>
    %cst_13 = arith.constant 3.200000e+01 : f32
    %19 = vector.broadcast %cst_13 : f32 to vector<8x1xf32>
    %20 = arith.divf %18, %19 : vector<8x1xf32>
    %21 = vector.broadcast %20 : vector<8x1xf32> to vector<8x32xf32>
    %22 = arith.subf %10, %21 : vector<8x32xf32>
    %23 = arith.mulf %22, %22 : vector<8x32xf32>
    %cst_14 = arith.constant dense<0.000000e+00> : vector<8xf32>
    %24 = vector.multi_reduction <add>, %23, %cst_14 [1] : vector<8x32xf32> to vector<8xf32>
    %25 = vector.shape_cast %24 : vector<8xf32> to vector<8x1xf32>
    %cst_15 = arith.constant 3.200000e+01 : f32
    %26 = vector.broadcast %cst_15 : f32 to vector<8x1xf32>
    %27 = arith.divf %25, %26 : vector<8x1xf32>
    %cst_16 = arith.constant 9.99999974E-6 : f32
    %28 = vector.broadcast %cst_16 : f32 to vector<8x1xf32>
    %29 = arith.addf %27, %28 : vector<8x1xf32>
    %30 = math.rsqrt %29 : vector<8x1xf32>
    %31 = vector.broadcast %30 : vector<8x1xf32> to vector<8x32xf32>
    %32 = arith.mulf %22, %31 : vector<8x32xf32>
    %33 = vector.broadcast %14 : vector<1x32xf32> to vector<8x32xf32>
    %34 = arith.mulf %32, %33 : vector<8x32xf32>
    %35 = vector.broadcast %16 : vector<1x32xf32> to vector<8x32xf32>
    %36 = arith.addf %34, %35 : vector<8x32xf32>
    %c0_17 = arith.constant 0 : index
    %c0_18 = arith.constant 0 : index
    %c0_19 = arith.constant 0 : index
    %37 = vector.load %arg6[%c0_17, %c0_18, %c0_19] : memref<3x32x48xf32, #tpu.memory_space<vmem>>, vector<1x32x48xf32>
    %38 = vector.shape_cast %37 : vector<1x32x48xf32> to vector<32x48xf32>
    %cst_20 = arith.constant dense<0.000000e+00> : vector<8x48xf32>
    %39 = tpu.matmul %36, %38, %cst_20 {dimension_numbers = #tpu.dot_dimension_numbers<[1], [0], [0], [1], [0, 0, 1, 1], [], []>} : vector<8x32xf32>, vector<32x48xf32>, vector<8x48xf32> -> vector<8x48xf32>
    %c0_21 = arith.constant 0 : index
    %c0_22 = arith.constant 0 : index
    %c0_23 = arith.constant 0 : index
    %40 = vector.load %arg7[%c0_21, %c0_22, %c0_23] : memref<3x32x48xf32, #tpu.memory_space<vmem>>, vector<1x32x48xf32>
    %41 = vector.shape_cast %40 : vector<1x32x48xf32> to vector<32x48xf32>
    %cst_24 = arith.constant dense<0.000000e+00> : vector<8x48xf32>
    %42 = tpu.matmul %36, %41, %cst_24 {dimension_numbers = #tpu.dot_dimension_numbers<[1], [0], [0], [1], [0, 0, 1, 1], [], []>} : vector<8x32xf32>, vector<32x48xf32>, vector<8x48xf32> -> vector<8x48xf32>
    %c0_25 = arith.constant 0 : index
    %c0_26 = arith.constant 0 : index
    %c0_27 = arith.constant 0 : index
    %43 = vector.load %arg8[%c0_25, %c0_26, %c0_27] : memref<18x32x32xf32, #tpu.memory_space<vmem>>, vector<1x32x32xf32>
    %44 = vector.shape_cast %43 : vector<1x32x32xf32> to vector<32x32xf32>
    %cst_28 = arith.constant dense<0.000000e+00> : vector<8x32xf32>
    %45 = tpu.matmul %36, %44, %cst_28 {dimension_numbers = #tpu.dot_dimension_numbers<[1], [0], [0], [1], [0, 0, 1, 1], [], []>} : vector<8x32xf32>, vector<32x32xf32>, vector<8x32xf32> -> vector<8x32xf32>
    %c1 = arith.constant 1 : index
    %c0_29 = arith.constant 0 : index
    %c0_30 = arith.constant 0 : index
    %46 = vector.load %arg8[%c1, %c0_29, %c0_30] : memref<18x32x32xf32, #tpu.memory_space<vmem>>, vector<1x32x32xf32>
    %47 = vector.shape_cast %46 : vector<1x32x32xf32> to vector<32x32xf32>
    %cst_31 = arith.constant dense<0.000000e+00> : vector<8x32xf32>
    %48 = tpu.matmul %36, %47, %cst_31 {dimension_numbers = #tpu.dot_dimension_numbers<[1], [0], [0], [1], [0, 0, 1, 1], [], []>} : vector<8x32xf32>, vector<32x32xf32>, vector<8x32xf32> -> vector<8x32xf32>
    %c2 = arith.constant 2 : index
    %c0_32 = arith.constant 0 : index
    %c0_33 = arith.constant 0 : index
    %49 = vector.load %arg8[%c2, %c0_32, %c0_33] : memref<18x32x32xf32, #tpu.memory_space<vmem>>, vector<1x32x32xf32>
    %50 = vector.shape_cast %49 : vector<1x32x32xf32> to vector<32x32xf32>
    %cst_34 = arith.constant dense<0.000000e+00> : vector<8x32xf32>
    %51 = tpu.matmul %36, %50, %cst_34 {dimension_numbers = #tpu.dot_dimension_numbers<[1], [0], [0], [1], [0, 0, 1, 1], [], []>} : vector<8x32xf32>, vector<32x32xf32>, vector<8x32xf32> -> vector<8x32xf32>
    %c3 = arith.constant 3 : index
    %c0_35 = arith.constant 0 : index
    %c0_36 = arith.constant 0 : index
    %52 = vector.load %arg8[%c3, %c0_35, %c0_36] : memref<18x32x32xf32, #tpu.memory_space<vmem>>, vector<1x32x32xf32>
    %53 = vector.shape_cast %52 : vector<1x32x32xf32> to vector<32x32xf32>
    %cst_37 = arith.constant dense<0.000000e+00> : vector<8x32xf32>
    %54 = tpu.matmul %36, %53, %cst_37 {dimension_numbers = #tpu.dot_dimension_numbers<[1], [0], [0], [1], [0, 0, 1, 1], [], []>} : vector<8x32xf32>, vector<32x32xf32>, vector<8x32xf32> -> vector<8x32xf32>
    %c4 = arith.constant 4 : index
    %c0_38 = arith.constant 0 : index
    %c0_39 = arith.constant 0 : index
    %55 = vector.load %arg8[%c4, %c0_38, %c0_39] : memref<18x32x32xf32, #tpu.memory_space<vmem>>, vector<1x32x32xf32>
    %56 = vector.shape_cast %55 : vector<1x32x32xf32> to vector<32x32xf32>
    %cst_40 = arith.constant dense<0.000000e+00> : vector<8x32xf32>
    %57 = tpu.matmul %36, %56, %cst_40 {dimension_numbers = #tpu.dot_dimension_numbers<[1], [0], [0], [1], [0, 0, 1, 1], [], []>} : vector<8x32xf32>, vector<32x32xf32>, vector<8x32xf32> -> vector<8x32xf32>
    %c5 = arith.constant 5 : index
    %c0_41 = arith.constant 0 : index
    %c0_42 = arith.constant 0 : index
    %58 = vector.load %arg8[%c5, %c0_41, %c0_42] : memref<18x32x32xf32, #tpu.memory_space<vmem>>, vector<1x32x32xf32>
    %59 = vector.shape_cast %58 : vector<1x32x32xf32> to vector<32x32xf32>
    %cst_43 = arith.constant dense<0.000000e+00> : vector<8x32xf32>
    %60 = tpu.matmul %36, %59, %cst_43 {dimension_numbers = #tpu.dot_dimension_numbers<[1], [0], [0], [1], [0, 0, 1, 1], [], []>} : vector<8x32xf32>, vector<32x32xf32>, vector<8x32xf32> -> vector<8x32xf32>
    %c0_i32 = arith.constant 0 : i32
    %61 = vector.broadcast %c0_i32 : i32 to vector<8x8xi32>
    %62 = arith.addi %12, %61 : vector<8x8xi32>
    %63 = arith.cmpi sle, %11, %62 : vector<8x8xi32>
    %cst_44 = arith.constant 0.000000e+00 : f32
    %64 = vector.broadcast %cst_44 : f32 to vector<8x32xf32>
    %65 = vector.extract_strided_slice %39 {offsets = [0, 0], sizes = [8, 8], strides = [1, 1]} : vector<8x48xf32> to vector<8x8xf32>
    %66 = vector.extract_strided_slice %42 {offsets = [0, 0], sizes = [8, 8], strides = [1, 1]} : vector<8x48xf32> to vector<8x8xf32>
    %cst_45 = arith.constant dense<0.000000e+00> : vector<8x8xf32>
    %67 = tpu.matmul %65, %66, %cst_45 {dimension_numbers = #tpu.dot_dimension_numbers<[1], [1], [0], [0], [0, 0, 1, 0], [], []>} : vector<8x8xf32>, vector<8x8xf32>, vector<8x8xf32> -> vector<8x8xf32>
    %cst_46 = arith.constant -1.000000e+30 : f32
    %68 = vector.broadcast %cst_46 : f32 to vector<8x8xf32>
    %69 = arith.select %63, %67, %68 : vector<8x8xi1>, vector<8x8xf32>
    %cst_47 = arith.constant dense<0xFF800000> : vector<8xf32>
    %70 = vector.multi_reduction <maximumf>, %69, %cst_47 [1] : vector<8x8xf32> to vector<8xf32>
    %71 = vector.shape_cast %70 : vector<8xf32> to vector<8x1xf32>
    %72 = vector.broadcast %71 : vector<8x1xf32> to vector<8x8xf32>
    %73 = arith.subf %69, %72 : vector<8x8xf32>
    %74 = math.exp %73 : vector<8x8xf32>
    %cst_48 = arith.constant dense<0.000000e+00> : vector<8xf32>
    %75 = vector.multi_reduction <add>, %74, %cst_48 [1] : vector<8x8xf32> to vector<8xf32>
    %76 = vector.shape_cast %75 : vector<8xf32> to vector<8x1xf32>
    %cst_49 = arith.constant dense<0.000000e+00> : vector<8x32xf32>
    %77 = tpu.matmul %74, %45, %cst_49 {dimension_numbers = #tpu.dot_dimension_numbers<[1], [0], [0], [1], [0, 0, 1, 1], [], []>} : vector<8x8xf32>, vector<8x32xf32>, vector<8x32xf32> -> vector<8x32xf32>
    %78 = vector.broadcast %76 : vector<8x1xf32> to vector<8x32xf32>
    %79 = arith.divf %77, %78 : vector<8x32xf32>
    %80 = arith.addf %64, %79 : vector<8x32xf32>
    %81 = vector.extract_strided_slice %39 {offsets = [0, 8], sizes = [8, 8], strides = [1, 1]} : vector<8x48xf32> to vector<8x8xf32>
    %82 = vector.extract_strided_slice %42 {offsets = [0, 8], sizes = [8, 8], strides = [1, 1]} : vector<8x48xf32> to vector<8x8xf32>
    %cst_50 = arith.constant dense<0.000000e+00> : vector<8x8xf32>
    %83 = tpu.matmul %81, %82, %cst_50 {dimension_numbers = #tpu.dot_dimension_numbers<[1], [1], [0], [0], [0, 0, 1, 0], [], []>} : vector<8x8xf32>, vector<8x8xf32>, vector<8x8xf32> -> vector<8x8xf32>
    %cst_51 = arith.constant -1.000000e+30 : f32
    %84 = vector.broadcast %cst_51 : f32 to vector<8x8xf32>
    %85 = arith.select %63, %83, %84 : vector<8x8xi1>, vector<8x8xf32>
    %cst_52 = arith.constant dense<0xFF800000> : vector<8xf32>
    %86 = vector.multi_reduction <maximumf>, %85, %cst_52 [1] : vector<8x8xf32> to vector<8xf32>
    %87 = vector.shape_cast %86 : vector<8xf32> to vector<8x1xf32>
    %88 = vector.broadcast %87 : vector<8x1xf32> to vector<8x8xf32>
    %89 = arith.subf %85, %88 : vector<8x8xf32>
    %90 = math.exp %89 : vector<8x8xf32>
    %cst_53 = arith.constant dense<0.000000e+00> : vector<8xf32>
    %91 = vector.multi_reduction <add>, %90, %cst_53 [1] : vector<8x8xf32> to vector<8xf32>
    %92 = vector.shape_cast %91 : vector<8xf32> to vector<8x1xf32>
    %cst_54 = arith.constant dense<0.000000e+00> : vector<8x32xf32>
    %93 = tpu.matmul %90, %48, %cst_54 {dimension_numbers = #tpu.dot_dimension_numbers<[1], [0], [0], [1], [0, 0, 1, 1], [], []>} : vector<8x8xf32>, vector<8x32xf32>, vector<8x32xf32> -> vector<8x32xf32>
    %94 = vector.broadcast %92 : vector<8x1xf32> to vector<8x32xf32>
    %95 = arith.divf %93, %94 : vector<8x32xf32>
    %96 = arith.addf %80, %95 : vector<8x32xf32>
    %97 = vector.extract_strided_slice %39 {offsets = [0, 16], sizes = [8, 8], strides = [1, 1]} : vector<8x48xf32> to vector<8x8xf32>
    %98 = vector.extract_strided_slice %42 {offsets = [0, 16], sizes = [8, 8], strides = [1, 1]} : vector<8x48xf32> to vector<8x8xf32>
    %cst_55 = arith.constant dense<0.000000e+00> : vector<8x8xf32>
    %99 = tpu.matmul %97, %98, %cst_55 {dimension_numbers = #tpu.dot_dimension_numbers<[1], [1], [0], [0], [0, 0, 1, 0], [], []>} : vector<8x8xf32>, vector<8x8xf32>, vector<8x8xf32> -> vector<8x8xf32>
    %cst_56 = arith.constant -1.000000e+30 : f32
    %100 = vector.broadcast %cst_56 : f32 to vector<8x8xf32>
    %101 = arith.select %63, %99, %100 : vector<8x8xi1>, vector<8x8xf32>
    %cst_57 = arith.constant dense<0xFF800000> : vector<8xf32>
    %102 = vector.multi_reduction <maximumf>, %101, %cst_57 [1] : vector<8x8xf32> to vector<8xf32>
    %103 = vector.shape_cast %102 : vector<8xf32> to vector<8x1xf32>
    %104 = vector.broadcast %103 : vector<8x1xf32> to vector<8x8xf32>
    %105 = arith.subf %101, %104 : vector<8x8xf32>
    %106 = math.exp %105 : vector<8x8xf32>
    %cst_58 = arith.constant dense<0.000000e+00> : vector<8xf32>
    %107 = vector.multi_reduction <add>, %106, %cst_58 [1] : vector<8x8xf32> to vector<8xf32>
    %108 = vector.shape_cast %107 : vector<8xf32> to vector<8x1xf32>
    %cst_59 = arith.constant dense<0.000000e+00> : vector<8x32xf32>
    %109 = tpu.matmul %106, %51, %cst_59 {dimension_numbers = #tpu.dot_dimension_numbers<[1], [0], [0], [1], [0, 0, 1, 1], [], []>} : vector<8x8xf32>, vector<8x32xf32>, vector<8x32xf32> -> vector<8x32xf32>
    %110 = vector.broadcast %108 : vector<8x1xf32> to vector<8x32xf32>
    %111 = arith.divf %109, %110 : vector<8x32xf32>
    %112 = arith.addf %96, %111 : vector<8x32xf32>
    %113 = vector.extract_strided_slice %39 {offsets = [0, 24], sizes = [8, 8], strides = [1, 1]} : vector<8x48xf32> to vector<8x8xf32>
    %114 = vector.extract_strided_slice %42 {offsets = [0, 24], sizes = [8, 8], strides = [1, 1]} : vector<8x48xf32> to vector<8x8xf32>
    %cst_60 = arith.constant dense<0.000000e+00> : vector<8x8xf32>
    %115 = tpu.matmul %113, %114, %cst_60 {dimension_numbers = #tpu.dot_dimension_numbers<[1], [1], [0], [0], [0, 0, 1, 0], [], []>} : vector<8x8xf32>, vector<8x8xf32>, vector<8x8xf32> -> vector<8x8xf32>
    %cst_61 = arith.constant -1.000000e+30 : f32
    %116 = vector.broadcast %cst_61 : f32 to vector<8x8xf32>
    %117 = arith.select %63, %115, %116 : vector<8x8xi1>, vector<8x8xf32>
    %cst_62 = arith.constant dense<0xFF800000> : vector<8xf32>
    %118 = vector.multi_reduction <maximumf>, %117, %cst_62 [1] : vector<8x8xf32> to vector<8xf32>
    %119 = vector.shape_cast %118 : vector<8xf32> to vector<8x1xf32>
    %120 = vector.broadcast %119 : vector<8x1xf32> to vector<8x8xf32>
    %121 = arith.subf %117, %120 : vector<8x8xf32>
    %122 = math.exp %121 : vector<8x8xf32>
    %cst_63 = arith.constant dense<0.000000e+00> : vector<8xf32>
    %123 = vector.multi_reduction <add>, %122, %cst_63 [1] : vector<8x8xf32> to vector<8xf32>
    %124 = vector.shape_cast %123 : vector<8xf32> to vector<8x1xf32>
    %cst_64 = arith.constant dense<0.000000e+00> : vector<8x32xf32>
    %125 = tpu.matmul %122, %54, %cst_64 {dimension_numbers = #tpu.dot_dimension_numbers<[1], [0], [0], [1], [0, 0, 1, 1], [], []>} : vector<8x8xf32>, vector<8x32xf32>, vector<8x32xf32> -> vector<8x32xf32>
    %126 = vector.broadcast %124 : vector<8x1xf32> to vector<8x32xf32>
    %127 = arith.divf %125, %126 : vector<8x32xf32>
    %128 = arith.addf %112, %127 : vector<8x32xf32>
    %129 = vector.extract_strided_slice %39 {offsets = [0, 32], sizes = [8, 8], strides = [1, 1]} : vector<8x48xf32> to vector<8x8xf32>
    %130 = vector.extract_strided_slice %42 {offsets = [0, 32], sizes = [8, 8], strides = [1, 1]} : vector<8x48xf32> to vector<8x8xf32>
    %cst_65 = arith.constant dense<0.000000e+00> : vector<8x8xf32>
    %131 = tpu.matmul %129, %130, %cst_65 {dimension_numbers = #tpu.dot_dimension_numbers<[1], [1], [0], [0], [0, 0, 1, 0], [], []>} : vector<8x8xf32>, vector<8x8xf32>, vector<8x8xf32> -> vector<8x8xf32>
    %cst_66 = arith.constant -1.000000e+30 : f32
    %132 = vector.broadcast %cst_66 : f32 to vector<8x8xf32>
    %133 = arith.select %63, %131, %132 : vector<8x8xi1>, vector<8x8xf32>
    %cst_67 = arith.constant dense<0xFF800000> : vector<8xf32>
    %134 = vector.multi_reduction <maximumf>, %133, %cst_67 [1] : vector<8x8xf32> to vector<8xf32>
    %135 = vector.shape_cast %134 : vector<8xf32> to vector<8x1xf32>
    %136 = vector.broadcast %135 : vector<8x1xf32> to vector<8x8xf32>
    %137 = arith.subf %133, %136 : vector<8x8xf32>
    %138 = math.exp %137 : vector<8x8xf32>
    %cst_68 = arith.constant dense<0.000000e+00> : vector<8xf32>
    %139 = vector.multi_reduction <add>, %138, %cst_68 [1] : vector<8x8xf32> to vector<8xf32>
    %140 = vector.shape_cast %139 : vector<8xf32> to vector<8x1xf32>
    %cst_69 = arith.constant dense<0.000000e+00> : vector<8x32xf32>
    %141 = tpu.matmul %138, %57, %cst_69 {dimension_numbers = #tpu.dot_dimension_numbers<[1], [0], [0], [1], [0, 0, 1, 1], [], []>} : vector<8x8xf32>, vector<8x32xf32>, vector<8x32xf32> -> vector<8x32xf32>
    %142 = vector.broadcast %140 : vector<8x1xf32> to vector<8x32xf32>
    %143 = arith.divf %141, %142 : vector<8x32xf32>
    %144 = arith.addf %128, %143 : vector<8x32xf32>
    %145 = vector.extract_strided_slice %39 {offsets = [0, 40], sizes = [8, 8], strides = [1, 1]} : vector<8x48xf32> to vector<8x8xf32>
    %146 = vector.extract_strided_slice %42 {offsets = [0, 40], sizes = [8, 8], strides = [1, 1]} : vector<8x48xf32> to vector<8x8xf32>
    %cst_70 = arith.constant dense<0.000000e+00> : vector<8x8xf32>
    %147 = tpu.matmul %145, %146, %cst_70 {dimension_numbers = #tpu.dot_dimension_numbers<[1], [1], [0], [0], [0, 0, 1, 0], [], []>} : vector<8x8xf32>, vector<8x8xf32>, vector<8x8xf32> -> vector<8x8xf32>
    %cst_71 = arith.constant -1.000000e+30 : f32
    %148 = vector.broadcast %cst_71 : f32 to vector<8x8xf32>
    %149 = arith.select %63, %147, %148 : vector<8x8xi1>, vector<8x8xf32>
    %cst_72 = arith.constant dense<0xFF800000> : vector<8xf32>
    %150 = vector.multi_reduction <maximumf>, %149, %cst_72 [1] : vector<8x8xf32> to vector<8xf32>
    %151 = vector.shape_cast %150 : vector<8xf32> to vector<8x1xf32>
    %152 = vector.broadcast %151 : vector<8x1xf32> to vector<8x8xf32>
    %153 = arith.subf %149, %152 : vector<8x8xf32>
    %154 = math.exp %153 : vector<8x8xf32>
    %cst_73 = arith.constant dense<0.000000e+00> : vector<8xf32>
    %155 = vector.multi_reduction <add>, %154, %cst_73 [1] : vector<8x8xf32> to vector<8xf32>
    %156 = vector.shape_cast %155 : vector<8xf32> to vector<8x1xf32>
    %cst_74 = arith.constant dense<0.000000e+00> : vector<8x32xf32>
    %157 = tpu.matmul %154, %60, %cst_74 {dimension_numbers = #tpu.dot_dimension_numbers<[1], [0], [0], [1], [0, 0, 1, 1], [], []>} : vector<8x8xf32>, vector<8x32xf32>, vector<8x32xf32> -> vector<8x32xf32>
    %158 = vector.broadcast %156 : vector<8x1xf32> to vector<8x32xf32>
    %159 = arith.divf %157, %158 : vector<8x32xf32>
    %160 = arith.addf %144, %159 : vector<8x32xf32>
    %c0_75 = arith.constant 0 : index
    %c0_76 = arith.constant 0 : index
    %161 = vector.load %arg21[%c0_75, %c0_76] : memref<8x32xf32, #tpu.memory_space<vmem>>, vector<8x32xf32>
    tpu.vector_store %arg21[%c0_75, %c0_76], %160 {strides = array<i32>} : memref<8x32xf32, #tpu.memory_space<vmem>>, vector<8x32xf32>,
    %c0_77 = arith.constant 0 : index
    %c0_78 = arith.constant 0 : index
    %162 = vector.load %arg21[%c0_77, %c0_78] : memref<8x32xf32, #tpu.memory_space<vmem>>, vector<8x32xf32>
    %163 = arith.addf %10, %162 : vector<8x32xf32>
    %c0_79 = arith.constant 0 : index
    %c0_80 = arith.constant 0 : index
    %c0_81 = arith.constant 0 : index
    %164 = vector.load %arg9[%c0_79, %c0_80, %c0_81] : memref<3x1x32xf32, #tpu.memory_space<vmem>>, vector<1x1x32xf32>
    %165 = vector.shape_cast %164 : vector<1x1x32xf32> to vector<1x32xf32>
    %166 = vector.broadcast %165 : vector<1x32xf32> to vector<8x32xf32>
    %167 = arith.addf %163, %166 : vector<8x32xf32>
    %c0_82 = arith.constant 0 : index
    %c0_83 = arith.constant 0 : index
    %c0_84 = arith.constant 0 : index
    %168 = vector.load %arg10[%c0_82, %c0_83, %c0_84] : memref<3x1x32xf32, #tpu.memory_space<vmem>>, vector<1x1x32xf32>
    %169 = vector.shape_cast %168 : vector<1x1x32xf32> to vector<1x32xf32>
    %c0_85 = arith.constant 0 : index
    %c0_86 = arith.constant 0 : index
    %c0_87 = arith.constant 0 : index
    %170 = vector.load %arg11[%c0_85, %c0_86, %c0_87] : memref<3x1x32xf32, #tpu.memory_space<vmem>>, vector<1x1x32xf32>
    %171 = vector.shape_cast %170 : vector<1x1x32xf32> to vector<1x32xf32>
    %cst_88 = arith.constant dense<0.000000e+00> : vector<8xf32>
    %172 = vector.multi_reduction <add>, %167, %cst_88 [1] : vector<8x32xf32> to vector<8xf32>
    %173 = vector.shape_cast %172 : vector<8xf32> to vector<8x1xf32>
    %cst_89 = arith.constant 3.200000e+01 : f32
    %174 = vector.broadcast %cst_89 : f32 to vector<8x1xf32>
    %175 = arith.divf %173, %174 : vector<8x1xf32>
    %176 = vector.broadcast %175 : vector<8x1xf32> to vector<8x32xf32>
    %177 = arith.subf %167, %176 : vector<8x32xf32>
    %178 = arith.mulf %177, %177 : vector<8x32xf32>
    %cst_90 = arith.constant dense<0.000000e+00> : vector<8xf32>
    %179 = vector.multi_reduction <add>, %178, %cst_90 [1] : vector<8x32xf32> to vector<8xf32>
    %180 = vector.shape_cast %179 : vector<8xf32> to vector<8x1xf32>
    %cst_91 = arith.constant 3.200000e+01 : f32
    %181 = vector.broadcast %cst_91 : f32 to vector<8x1xf32>
    %182 = arith.divf %180, %181 : vector<8x1xf32>
    %cst_92 = arith.constant 9.99999974E-6 : f32
    %183 = vector.broadcast %cst_92 : f32 to vector<8x1xf32>
    %184 = arith.addf %182, %183 : vector<8x1xf32>
    %185 = math.rsqrt %184 : vector<8x1xf32>
    %186 = vector.broadcast %185 : vector<8x1xf32> to vector<8x32xf32>
    %187 = arith.mulf %177, %186 : vector<8x32xf32>
    %188 = vector.broadcast %169 : vector<1x32xf32> to vector<8x32xf32>
    %189 = arith.mulf %187, %188 : vector<8x32xf32>
    %190 = vector.broadcast %171 : vector<1x32xf32> to vector<8x32xf32>
    %191 = arith.addf %189, %190 : vector<8x32xf32>
    %c0_93 = arith.constant 0 : index
    %c0_94 = arith.constant 0 : index
    %c0_95 = arith.constant 0 : index
    %192 = vector.load %arg12[%c0_93, %c0_94, %c0_95] : memref<3x32x128xf32, #tpu.memory_space<vmem>>, vector<1x32x128xf32>
    %193 = vector.shape_cast %192 : vector<1x32x128xf32> to vector<32x128xf32>
    %cst_96 = arith.constant dense<0.000000e+00> : vector<8x128xf32>
    %194 = tpu.matmul %191, %193, %cst_96 {dimension_numbers = #tpu.dot_dimension_numbers<[1], [0], [0], [1], [0, 0, 1, 1], [], []>} : vector<8x32xf32>, vector<32x128xf32>, vector<8x128xf32> -> vector<8x128xf32>
    %c0_97 = arith.constant 0 : index
    %c0_98 = arith.constant 0 : index
    %c0_99 = arith.constant 0 : index
    %195 = vector.load %arg13[%c0_97, %c0_98, %c0_99] : memref<3x1x128xf32, #tpu.memory_space<vmem>>, vector<1x1x128xf32>
    %196 = vector.shape_cast %195 : vector<1x1x128xf32> to vector<1x128xf32>
    %197 = vector.broadcast %196 : vector<1x128xf32> to vector<8x128xf32>
    %198 = arith.addf %194, %197 : vector<8x128xf32>
    %cst_100 = arith.constant 0.000000e+00 : f32
    %199 = vector.broadcast %cst_100 : f32 to vector<8x128xf32>
    %200 = arith.maximumf %198, %199 : vector<8x128xf32>
    %c0_101 = arith.constant 0 : index
    %c0_102 = arith.constant 0 : index
    %c0_103 = arith.constant 0 : index
    %201 = vector.load %arg14[%c0_101, %c0_102, %c0_103] : memref<3x128x32xf32, #tpu.memory_space<vmem>>, vector<1x128x32xf32>
    %202 = vector.shape_cast %201 : vector<1x128x32xf32> to vector<128x32xf32>
    %cst_104 = arith.constant dense<0.000000e+00> : vector<8x32xf32>
    %203 = tpu.matmul %200, %202, %cst_104 {dimension_numbers = #tpu.dot_dimension_numbers<[1], [0], [0], [1], [0, 0, 1, 1], [], []>} : vector<8x128xf32>, vector<128x32xf32>, vector<8x32xf32> -> vector<8x32xf32>
    %204 = arith.addf %167, %203 : vector<8x32xf32>
    %c0_105 = arith.constant 0 : index
    %c0_106 = arith.constant 0 : index
    %c0_107 = arith.constant 0 : index
    %205 = vector.load %arg15[%c0_105, %c0_106, %c0_107] : memref<3x1x32xf32, #tpu.memory_space<vmem>>, vector<1x1x32xf32>
    %206 = vector.shape_cast %205 : vector<1x1x32xf32> to vector<1x32xf32>
    %207 = vector.broadcast %206 : vector<1x32xf32> to vector<8x32xf32>
    %208 = arith.addf %204, %207 : vector<8x32xf32>
    %c1_108 = arith.constant 1 : index
    %c0_109 = arith.constant 0 : index
    %c0_110 = arith.constant 0 : index
    %209 = vector.load %arg4[%c1_108, %c0_109, %c0_110] : memref<3x1x32xf32, #tpu.memory_space<vmem>>, vector<1x1x32xf32>
    %210 = vector.shape_cast %209 : vector<1x1x32xf32> to vector<1x32xf32>
    %c1_111 = arith.constant 1 : index
    %c0_112 = arith.constant 0 : index
    %c0_113 = arith.constant 0 : index
    %211 = vector.load %arg5[%c1_111, %c0_112, %c0_113] : memref<3x1x32xf32, #tpu.memory_space<vmem>>, vector<1x1x32xf32>
    %212 = vector.shape_cast %211 : vector<1x1x32xf32> to vector<1x32xf32>
    %cst_114 = arith.constant dense<0.000000e+00> : vector<8xf32>
    %213 = vector.multi_reduction <add>, %208, %cst_114 [1] : vector<8x32xf32> to vector<8xf32>
    %214 = vector.shape_cast %213 : vector<8xf32> to vector<8x1xf32>
    %cst_115 = arith.constant 3.200000e+01 : f32
    %215 = vector.broadcast %cst_115 : f32 to vector<8x1xf32>
    %216 = arith.divf %214, %215 : vector<8x1xf32>
    %217 = vector.broadcast %216 : vector<8x1xf32> to vector<8x32xf32>
    %218 = arith.subf %208, %217 : vector<8x32xf32>
    %219 = arith.mulf %218, %218 : vector<8x32xf32>
    %cst_116 = arith.constant dense<0.000000e+00> : vector<8xf32>
    %220 = vector.multi_reduction <add>, %219, %cst_116 [1] : vector<8x32xf32> to vector<8xf32>
    %221 = vector.shape_cast %220 : vector<8xf32> to vector<8x1xf32>
    %cst_117 = arith.constant 3.200000e+01 : f32
    %222 = vector.broadcast %cst_117 : f32 to vector<8x1xf32>
    %223 = arith.divf %221, %222 : vector<8x1xf32>
    %cst_118 = arith.constant 9.99999974E-6 : f32
    %224 = vector.broadcast %cst_118 : f32 to vector<8x1xf32>
    %225 = arith.addf %223, %224 : vector<8x1xf32>
    %226 = math.rsqrt %225 : vector<8x1xf32>
    %227 = vector.broadcast %226 : vector<8x1xf32> to vector<8x32xf32>
    %228 = arith.mulf %218, %227 : vector<8x32xf32>
    %229 = vector.broadcast %210 : vector<1x32xf32> to vector<8x32xf32>
    %230 = arith.mulf %228, %229 : vector<8x32xf32>
    %231 = vector.broadcast %212 : vector<1x32xf32> to vector<8x32xf32>
    %232 = arith.addf %230, %231 : vector<8x32xf32>
    %c1_119 = arith.constant 1 : index
    %c0_120 = arith.constant 0 : index
    %c0_121 = arith.constant 0 : index
    %233 = vector.load %arg6[%c1_119, %c0_120, %c0_121] : memref<3x32x48xf32, #tpu.memory_space<vmem>>, vector<1x32x48xf32>
    %234 = vector.shape_cast %233 : vector<1x32x48xf32> to vector<32x48xf32>
    %cst_122 = arith.constant dense<0.000000e+00> : vector<8x48xf32>
    %235 = tpu.matmul %232, %234, %cst_122 {dimension_numbers = #tpu.dot_dimension_numbers<[1], [0], [0], [1], [0, 0, 1, 1], [], []>} : vector<8x32xf32>, vector<32x48xf32>, vector<8x48xf32> -> vector<8x48xf32>
    %c1_123 = arith.constant 1 : index
    %c0_124 = arith.constant 0 : index
    %c0_125 = arith.constant 0 : index
    %236 = vector.load %arg7[%c1_123, %c0_124, %c0_125] : memref<3x32x48xf32, #tpu.memory_space<vmem>>, vector<1x32x48xf32>
    %237 = vector.shape_cast %236 : vector<1x32x48xf32> to vector<32x48xf32>
    %cst_126 = arith.constant dense<0.000000e+00> : vector<8x48xf32>
    %238 = tpu.matmul %232, %237, %cst_126 {dimension_numbers = #tpu.dot_dimension_numbers<[1], [0], [0], [1], [0, 0, 1, 1], [], []>} : vector<8x32xf32>, vector<32x48xf32>, vector<8x48xf32> -> vector<8x48xf32>
    %c6 = arith.constant 6 : index
    %c0_127 = arith.constant 0 : index
    %c0_128 = arith.constant 0 : index
    %239 = vector.load %arg8[%c6, %c0_127, %c0_128] : memref<18x32x32xf32, #tpu.memory_space<vmem>>, vector<1x32x32xf32>
    %240 = vector.shape_cast %239 : vector<1x32x32xf32> to vector<32x32xf32>
    %cst_129 = arith.constant dense<0.000000e+00> : vector<8x32xf32>
    %241 = tpu.matmul %232, %240, %cst_129 {dimension_numbers = #tpu.dot_dimension_numbers<[1], [0], [0], [1], [0, 0, 1, 1], [], []>} : vector<8x32xf32>, vector<32x32xf32>, vector<8x32xf32> -> vector<8x32xf32>
    %c7 = arith.constant 7 : index
    %c0_130 = arith.constant 0 : index
    %c0_131 = arith.constant 0 : index
    %242 = vector.load %arg8[%c7, %c0_130, %c0_131] : memref<18x32x32xf32, #tpu.memory_space<vmem>>, vector<1x32x32xf32>
    %243 = vector.shape_cast %242 : vector<1x32x32xf32> to vector<32x32xf32>
    %cst_132 = arith.constant dense<0.000000e+00> : vector<8x32xf32>
    %244 = tpu.matmul %232, %243, %cst_132 {dimension_numbers = #tpu.dot_dimension_numbers<[1], [0], [0], [1], [0, 0, 1, 1], [], []>} : vector<8x32xf32>, vector<32x32xf32>, vector<8x32xf32> -> vector<8x32xf32>
    %c8 = arith.constant 8 : index
    %c0_133 = arith.constant 0 : index
    %c0_134 = arith.constant 0 : index
    %245 = vector.load %arg8[%c8, %c0_133, %c0_134] : memref<18x32x32xf32, #tpu.memory_space<vmem>>, vector<1x32x32xf32>
    %246 = vector.shape_cast %245 : vector<1x32x32xf32> to vector<32x32xf32>
    %cst_135 = arith.constant dense<0.000000e+00> : vector<8x32xf32>
    %247 = tpu.matmul %232, %246, %cst_135 {dimension_numbers = #tpu.dot_dimension_numbers<[1], [0], [0], [1], [0, 0, 1, 1], [], []>} : vector<8x32xf32>, vector<32x32xf32>, vector<8x32xf32> -> vector<8x32xf32>
    %c9 = arith.constant 9 : index
    %c0_136 = arith.constant 0 : index
    %c0_137 = arith.constant 0 : index
    %248 = vector.load %arg8[%c9, %c0_136, %c0_137] : memref<18x32x32xf32, #tpu.memory_space<vmem>>, vector<1x32x32xf32>
    %249 = vector.shape_cast %248 : vector<1x32x32xf32> to vector<32x32xf32>
    %cst_138 = arith.constant dense<0.000000e+00> : vector<8x32xf32>
    %250 = tpu.matmul %232, %249, %cst_138 {dimension_numbers = #tpu.dot_dimension_numbers<[1], [0], [0], [1], [0, 0, 1, 1], [], []>} : vector<8x32xf32>, vector<32x32xf32>, vector<8x32xf32> -> vector<8x32xf32>
    %c10 = arith.constant 10 : index
    %c0_139 = arith.constant 0 : index
    %c0_140 = arith.constant 0 : index
    %251 = vector.load %arg8[%c10, %c0_139, %c0_140] : memref<18x32x32xf32, #tpu.memory_space<vmem>>, vector<1x32x32xf32>
    %252 = vector.shape_cast %251 : vector<1x32x32xf32> to vector<32x32xf32>
    %cst_141 = arith.constant dense<0.000000e+00> : vector<8x32xf32>
    %253 = tpu.matmul %232, %252, %cst_141 {dimension_numbers = #tpu.dot_dimension_numbers<[1], [0], [0], [1], [0, 0, 1, 1], [], []>} : vector<8x32xf32>, vector<32x32xf32>, vector<8x32xf32> -> vector<8x32xf32>
    %c11 = arith.constant 11 : index
    %c0_142 = arith.constant 0 : index
    %c0_143 = arith.constant 0 : index
    %254 = vector.load %arg8[%c11, %c0_142, %c0_143] : memref<18x32x32xf32, #tpu.memory_space<vmem>>, vector<1x32x32xf32>
    %255 = vector.shape_cast %254 : vector<1x32x32xf32> to vector<32x32xf32>
    %cst_144 = arith.constant dense<0.000000e+00> : vector<8x32xf32>
    %256 = tpu.matmul %232, %255, %cst_144 {dimension_numbers = #tpu.dot_dimension_numbers<[1], [0], [0], [1], [0, 0, 1, 1], [], []>} : vector<8x32xf32>, vector<32x32xf32>, vector<8x32xf32> -> vector<8x32xf32>
    %c0_i32_145 = arith.constant 0 : i32
    %257 = vector.broadcast %c0_i32_145 : i32 to vector<8x8xi32>
    %258 = arith.addi %12, %257 : vector<8x8xi32>
    %259 = arith.cmpi sle, %11, %258 : vector<8x8xi32>
    %cst_146 = arith.constant 0.000000e+00 : f32
    %260 = vector.broadcast %cst_146 : f32 to vector<8x32xf32>
    %261 = vector.extract_strided_slice %235 {offsets = [0, 0], sizes = [8, 8], strides = [1, 1]} : vector<8x48xf32> to vector<8x8xf32>
    %262 = vector.extract_strided_slice %238 {offsets = [0, 0], sizes = [8, 8], strides = [1, 1]} : vector<8x48xf32> to vector<8x8xf32>
    %cst_147 = arith.constant dense<0.000000e+00> : vector<8x8xf32>
    %263 = tpu.matmul %261, %262, %cst_147 {dimension_numbers = #tpu.dot_dimension_numbers<[1], [1], [0], [0], [0, 0, 1, 0], [], []>} : vector<8x8xf32>, vector<8x8xf32>, vector<8x8xf32> -> vector<8x8xf32>
    %cst_148 = arith.constant -1.000000e+30 : f32
    %264 = vector.broadcast %cst_148 : f32 to vector<8x8xf32>
    %265 = arith.select %259, %263, %264 : vector<8x8xi1>, vector<8x8xf32>
    %cst_149 = arith.constant dense<0xFF800000> : vector<8xf32>
    %266 = vector.multi_reduction <maximumf>, %265, %cst_149 [1] : vector<8x8xf32> to vector<8xf32>
    %267 = vector.shape_cast %266 : vector<8xf32> to vector<8x1xf32>
    %268 = vector.broadcast %267 : vector<8x1xf32> to vector<8x8xf32>
    %269 = arith.subf %265, %268 : vector<8x8xf32>
    %270 = math.exp %269 : vector<8x8xf32>
    %cst_150 = arith.constant dense<0.000000e+00> : vector<8xf32>
    %271 = vector.multi_reduction <add>, %270, %cst_150 [1] : vector<8x8xf32> to vector<8xf32>
    %272 = vector.shape_cast %271 : vector<8xf32> to vector<8x1xf32>
    %cst_151 = arith.constant dense<0.000000e+00> : vector<8x32xf32>
    %273 = tpu.matmul %270, %241, %cst_151 {dimension_numbers = #tpu.dot_dimension_numbers<[1], [0], [0], [1], [0, 0, 1, 1], [], []>} : vector<8x8xf32>, vector<8x32xf32>, vector<8x32xf32> -> vector<8x32xf32>
    %274 = vector.broadcast %272 : vector<8x1xf32> to vector<8x32xf32>
    %275 = arith.divf %273, %274 : vector<8x32xf32>
    %276 = arith.addf %260, %275 : vector<8x32xf32>
    %277 = vector.extract_strided_slice %235 {offsets = [0, 8], sizes = [8, 8], strides = [1, 1]} : vector<8x48xf32> to vector<8x8xf32>
    %278 = vector.extract_strided_slice %238 {offsets = [0, 8], sizes = [8, 8], strides = [1, 1]} : vector<8x48xf32> to vector<8x8xf32>
    %cst_152 = arith.constant dense<0.000000e+00> : vector<8x8xf32>
    %279 = tpu.matmul %277, %278, %cst_152 {dimension_numbers = #tpu.dot_dimension_numbers<[1], [1], [0], [0], [0, 0, 1, 0], [], []>} : vector<8x8xf32>, vector<8x8xf32>, vector<8x8xf32> -> vector<8x8xf32>
    %cst_153 = arith.constant -1.000000e+30 : f32
    %280 = vector.broadcast %cst_153 : f32 to vector<8x8xf32>
    %281 = arith.select %259, %279, %280 : vector<8x8xi1>, vector<8x8xf32>
    %cst_154 = arith.constant dense<0xFF800000> : vector<8xf32>
    %282 = vector.multi_reduction <maximumf>, %281, %cst_154 [1] : vector<8x8xf32> to vector<8xf32>
    %283 = vector.shape_cast %282 : vector<8xf32> to vector<8x1xf32>
    %284 = vector.broadcast %283 : vector<8x1xf32> to vector<8x8xf32>
    %285 = arith.subf %281, %284 : vector<8x8xf32>
    %286 = math.exp %285 : vector<8x8xf32>
    %cst_155 = arith.constant dense<0.000000e+00> : vector<8xf32>
    %287 = vector.multi_reduction <add>, %286, %cst_155 [1] : vector<8x8xf32> to vector<8xf32>
    %288 = vector.shape_cast %287 : vector<8xf32> to vector<8x1xf32>
    %cst_156 = arith.constant dense<0.000000e+00> : vector<8x32xf32>
    %289 = tpu.matmul %286, %244, %cst_156 {dimension_numbers = #tpu.dot_dimension_numbers<[1], [0], [0], [1], [0, 0, 1, 1], [], []>} : vector<8x8xf32>, vector<8x32xf32>, vector<8x32xf32> -> vector<8x32xf32>
    %290 = vector.broadcast %288 : vector<8x1xf32> to vector<8x32xf32>
    %291 = arith.divf %289, %290 : vector<8x32xf32>
    %292 = arith.addf %276, %291 : vector<8x32xf32>
    %293 = vector.extract_strided_slice %235 {offsets = [0, 16], sizes = [8, 8], strides = [1, 1]} : vector<8x48xf32> to vector<8x8xf32>
    %294 = vector.extract_strided_slice %238 {offsets = [0, 16], sizes = [8, 8], strides = [1, 1]} : vector<8x48xf32> to vector<8x8xf32>
    %cst_157 = arith.constant dense<0.000000e+00> : vector<8x8xf32>
    %295 = tpu.matmul %293, %294, %cst_157 {dimension_numbers = #tpu.dot_dimension_numbers<[1], [1], [0], [0], [0, 0, 1, 0], [], []>} : vector<8x8xf32>, vector<8x8xf32>, vector<8x8xf32> -> vector<8x8xf32>
    %cst_158 = arith.constant -1.000000e+30 : f32
    %296 = vector.broadcast %cst_158 : f32 to vector<8x8xf32>
    %297 = arith.select %259, %295, %296 : vector<8x8xi1>, vector<8x8xf32>
    %cst_159 = arith.constant dense<0xFF800000> : vector<8xf32>
    %298 = vector.multi_reduction <maximumf>, %297, %cst_159 [1] : vector<8x8xf32> to vector<8xf32>
    %299 = vector.shape_cast %298 : vector<8xf32> to vector<8x1xf32>
    %300 = vector.broadcast %299 : vector<8x1xf32> to vector<8x8xf32>
    %301 = arith.subf %297, %300 : vector<8x8xf32>
    %302 = math.exp %301 : vector<8x8xf32>
    %cst_160 = arith.constant dense<0.000000e+00> : vector<8xf32>
    %303 = vector.multi_reduction <add>, %302, %cst_160 [1] : vector<8x8xf32> to vector<8xf32>
    %304 = vector.shape_cast %303 : vector<8xf32> to vector<8x1xf32>
    %cst_161 = arith.constant dense<0.000000e+00> : vector<8x32xf32>
    %305 = tpu.matmul %302, %247, %cst_161 {dimension_numbers = #tpu.dot_dimension_numbers<[1], [0], [0], [1], [0, 0, 1, 1], [], []>} : vector<8x8xf32>, vector<8x32xf32>, vector<8x32xf32> -> vector<8x32xf32>
    %306 = vector.broadcast %304 : vector<8x1xf32> to vector<8x32xf32>
    %307 = arith.divf %305, %306 : vector<8x32xf32>
    %308 = arith.addf %292, %307 : vector<8x32xf32>
    %309 = vector.extract_strided_slice %235 {offsets = [0, 24], sizes = [8, 8], strides = [1, 1]} : vector<8x48xf32> to vector<8x8xf32>
    %310 = vector.extract_strided_slice %238 {offsets = [0, 24], sizes = [8, 8], strides = [1, 1]} : vector<8x48xf32> to vector<8x8xf32>
    %cst_162 = arith.constant dense<0.000000e+00> : vector<8x8xf32>
    %311 = tpu.matmul %309, %310, %cst_162 {dimension_numbers = #tpu.dot_dimension_numbers<[1], [1], [0], [0], [0, 0, 1, 0], [], []>} : vector<8x8xf32>, vector<8x8xf32>, vector<8x8xf32> -> vector<8x8xf32>
    %cst_163 = arith.constant -1.000000e+30 : f32
    %312 = vector.broadcast %cst_163 : f32 to vector<8x8xf32>
    %313 = arith.select %259, %311, %312 : vector<8x8xi1>, vector<8x8xf32>
    %cst_164 = arith.constant dense<0xFF800000> : vector<8xf32>
    %314 = vector.multi_reduction <maximumf>, %313, %cst_164 [1] : vector<8x8xf32> to vector<8xf32>
    %315 = vector.shape_cast %314 : vector<8xf32> to vector<8x1xf32>
    %316 = vector.broadcast %315 : vector<8x1xf32> to vector<8x8xf32>
    %317 = arith.subf %313, %316 : vector<8x8xf32>
    %318 = math.exp %317 : vector<8x8xf32>
    %cst_165 = arith.constant dense<0.000000e+00> : vector<8xf32>
    %319 = vector.multi_reduction <add>, %318, %cst_165 [1] : vector<8x8xf32> to vector<8xf32>
    %320 = vector.shape_cast %319 : vector<8xf32> to vector<8x1xf32>
    %cst_166 = arith.constant dense<0.000000e+00> : vector<8x32xf32>
    %321 = tpu.matmul %318, %250, %cst_166 {dimension_numbers = #tpu.dot_dimension_numbers<[1], [0], [0], [1], [0, 0, 1, 1], [], []>} : vector<8x8xf32>, vector<8x32xf32>, vector<8x32xf32> -> vector<8x32xf32>
    %322 = vector.broadcast %320 : vector<8x1xf32> to vector<8x32xf32>
    %323 = arith.divf %321, %322 : vector<8x32xf32>
    %324 = arith.addf %308, %323 : vector<8x32xf32>
    %325 = vector.extract_strided_slice %235 {offsets = [0, 32], sizes = [8, 8], strides = [1, 1]} : vector<8x48xf32> to vector<8x8xf32>
    %326 = vector.extract_strided_slice %238 {offsets = [0, 32], sizes = [8, 8], strides = [1, 1]} : vector<8x48xf32> to vector<8x8xf32>
    %cst_167 = arith.constant dense<0.000000e+00> : vector<8x8xf32>
    %327 = tpu.matmul %325, %326, %cst_167 {dimension_numbers = #tpu.dot_dimension_numbers<[1], [1], [0], [0], [0, 0, 1, 0], [], []>} : vector<8x8xf32>, vector<8x8xf32>, vector<8x8xf32> -> vector<8x8xf32>
    %cst_168 = arith.constant -1.000000e+30 : f32
    %328 = vector.broadcast %cst_168 : f32 to vector<8x8xf32>
    %329 = arith.select %259, %327, %328 : vector<8x8xi1>, vector<8x8xf32>
    %cst_169 = arith.constant dense<0xFF800000> : vector<8xf32>
    %330 = vector.multi_reduction <maximumf>, %329, %cst_169 [1] : vector<8x8xf32> to vector<8xf32>
    %331 = vector.shape_cast %330 : vector<8xf32> to vector<8x1xf32>
    %332 = vector.broadcast %331 : vector<8x1xf32> to vector<8x8xf32>
    %333 = arith.subf %329, %332 : vector<8x8xf32>
    %334 = math.exp %333 : vector<8x8xf32>
    %cst_170 = arith.constant dense<0.000000e+00> : vector<8xf32>
    %335 = vector.multi_reduction <add>, %334, %cst_170 [1] : vector<8x8xf32> to vector<8xf32>
    %336 = vector.shape_cast %335 : vector<8xf32> to vector<8x1xf32>
    %cst_171 = arith.constant dense<0.000000e+00> : vector<8x32xf32>
    %337 = tpu.matmul %334, %253, %cst_171 {dimension_numbers = #tpu.dot_dimension_numbers<[1], [0], [0], [1], [0, 0, 1, 1], [], []>} : vector<8x8xf32>, vector<8x32xf32>, vector<8x32xf32> -> vector<8x32xf32>
    %338 = vector.broadcast %336 : vector<8x1xf32> to vector<8x32xf32>
    %339 = arith.divf %337, %338 : vector<8x32xf32>
    %340 = arith.addf %324, %339 : vector<8x32xf32>
    %341 = vector.extract_strided_slice %235 {offsets = [0, 40], sizes = [8, 8], strides = [1, 1]} : vector<8x48xf32> to vector<8x8xf32>
    %342 = vector.extract_strided_slice %238 {offsets = [0, 40], sizes = [8, 8], strides = [1, 1]} : vector<8x48xf32> to vector<8x8xf32>
    %cst_172 = arith.constant dense<0.000000e+00> : vector<8x8xf32>
    %343 = tpu.matmul %341, %342, %cst_172 {dimension_numbers = #tpu.dot_dimension_numbers<[1], [1], [0], [0], [0, 0, 1, 0], [], []>} : vector<8x8xf32>, vector<8x8xf32>, vector<8x8xf32> -> vector<8x8xf32>
    %cst_173 = arith.constant -1.000000e+30 : f32
    %344 = vector.broadcast %cst_173 : f32 to vector<8x8xf32>
    %345 = arith.select %259, %343, %344 : vector<8x8xi1>, vector<8x8xf32>
    %cst_174 = arith.constant dense<0xFF800000> : vector<8xf32>
    %346 = vector.multi_reduction <maximumf>, %345, %cst_174 [1] : vector<8x8xf32> to vector<8xf32>
    %347 = vector.shape_cast %346 : vector<8xf32> to vector<8x1xf32>
    %348 = vector.broadcast %347 : vector<8x1xf32> to vector<8x8xf32>
    %349 = arith.subf %345, %348 : vector<8x8xf32>
    %350 = math.exp %349 : vector<8x8xf32>
    %cst_175 = arith.constant dense<0.000000e+00> : vector<8xf32>
    %351 = vector.multi_reduction <add>, %350, %cst_175 [1] : vector<8x8xf32> to vector<8xf32>
    %352 = vector.shape_cast %351 : vector<8xf32> to vector<8x1xf32>
    %cst_176 = arith.constant dense<0.000000e+00> : vector<8x32xf32>
    %353 = tpu.matmul %350, %256, %cst_176 {dimension_numbers = #tpu.dot_dimension_numbers<[1], [0], [0], [1], [0, 0, 1, 1], [], []>} : vector<8x8xf32>, vector<8x32xf32>, vector<8x32xf32> -> vector<8x32xf32>
    %354 = vector.broadcast %352 : vector<8x1xf32> to vector<8x32xf32>
    %355 = arith.divf %353, %354 : vector<8x32xf32>
    %356 = arith.addf %340, %355 : vector<8x32xf32>
    %c0_177 = arith.constant 0 : index
    %c0_178 = arith.constant 0 : index
    %357 = vector.load %arg21[%c0_177, %c0_178] : memref<8x32xf32, #tpu.memory_space<vmem>>, vector<8x32xf32>
    tpu.vector_store %arg21[%c0_177, %c0_178], %356 {strides = array<i32>} : memref<8x32xf32, #tpu.memory_space<vmem>>, vector<8x32xf32>,
    %c0_179 = arith.constant 0 : index
    %c0_180 = arith.constant 0 : index
    %358 = vector.load %arg21[%c0_179, %c0_180] : memref<8x32xf32, #tpu.memory_space<vmem>>, vector<8x32xf32>
    %359 = arith.addf %208, %358 : vector<8x32xf32>
    %c1_181 = arith.constant 1 : index
    %c0_182 = arith.constant 0 : index
    %c0_183 = arith.constant 0 : index
    %360 = vector.load %arg9[%c1_181, %c0_182, %c0_183] : memref<3x1x32xf32, #tpu.memory_space<vmem>>, vector<1x1x32xf32>
    %361 = vector.shape_cast %360 : vector<1x1x32xf32> to vector<1x32xf32>
    %362 = vector.broadcast %361 : vector<1x32xf32> to vector<8x32xf32>
    %363 = arith.addf %359, %362 : vector<8x32xf32>
    %c1_184 = arith.constant 1 : index
    %c0_185 = arith.constant 0 : index
    %c0_186 = arith.constant 0 : index
    %364 = vector.load %arg10[%c1_184, %c0_185, %c0_186] : memref<3x1x32xf32, #tpu.memory_space<vmem>>, vector<1x1x32xf32>
    %365 = vector.shape_cast %364 : vector<1x1x32xf32> to vector<1x32xf32>
    %c1_187 = arith.constant 1 : index
    %c0_188 = arith.constant 0 : index
    %c0_189 = arith.constant 0 : index
    %366 = vector.load %arg11[%c1_187, %c0_188, %c0_189] : memref<3x1x32xf32, #tpu.memory_space<vmem>>, vector<1x1x32xf32>
    %367 = vector.shape_cast %366 : vector<1x1x32xf32> to vector<1x32xf32>
    %cst_190 = arith.constant dense<0.000000e+00> : vector<8xf32>
    %368 = vector.multi_reduction <add>, %363, %cst_190 [1] : vector<8x32xf32> to vector<8xf32>
    %369 = vector.shape_cast %368 : vector<8xf32> to vector<8x1xf32>
    %cst_191 = arith.constant 3.200000e+01 : f32
    %370 = vector.broadcast %cst_191 : f32 to vector<8x1xf32>
    %371 = arith.divf %369, %370 : vector<8x1xf32>
    %372 = vector.broadcast %371 : vector<8x1xf32> to vector<8x32xf32>
    %373 = arith.subf %363, %372 : vector<8x32xf32>
    %374 = arith.mulf %373, %373 : vector<8x32xf32>
    %cst_192 = arith.constant dense<0.000000e+00> : vector<8xf32>
    %375 = vector.multi_reduction <add>, %374, %cst_192 [1] : vector<8x32xf32> to vector<8xf32>
    %376 = vector.shape_cast %375 : vector<8xf32> to vector<8x1xf32>
    %cst_193 = arith.constant 3.200000e+01 : f32
    %377 = vector.broadcast %cst_193 : f32 to vector<8x1xf32>
    %378 = arith.divf %376, %377 : vector<8x1xf32>
    %cst_194 = arith.constant 9.99999974E-6 : f32
    %379 = vector.broadcast %cst_194 : f32 to vector<8x1xf32>
    %380 = arith.addf %378, %379 : vector<8x1xf32>
    %381 = math.rsqrt %380 : vector<8x1xf32>
    %382 = vector.broadcast %381 : vector<8x1xf32> to vector<8x32xf32>
    %383 = arith.mulf %373, %382 : vector<8x32xf32>
    %384 = vector.broadcast %365 : vector<1x32xf32> to vector<8x32xf32>
    %385 = arith.mulf %383, %384 : vector<8x32xf32>
    %386 = vector.broadcast %367 : vector<1x32xf32> to vector<8x32xf32>
    %387 = arith.addf %385, %386 : vector<8x32xf32>
    %c1_195 = arith.constant 1 : index
    %c0_196 = arith.constant 0 : index
    %c0_197 = arith.constant 0 : index
    %388 = vector.load %arg12[%c1_195, %c0_196, %c0_197] : memref<3x32x128xf32, #tpu.memory_space<vmem>>, vector<1x32x128xf32>
    %389 = vector.shape_cast %388 : vector<1x32x128xf32> to vector<32x128xf32>
    %cst_198 = arith.constant dense<0.000000e+00> : vector<8x128xf32>
    %390 = tpu.matmul %387, %389, %cst_198 {dimension_numbers = #tpu.dot_dimension_numbers<[1], [0], [0], [1], [0, 0, 1, 1], [], []>} : vector<8x32xf32>, vector<32x128xf32>, vector<8x128xf32> -> vector<8x128xf32>
    %c1_199 = arith.constant 1 : index
    %c0_200 = arith.constant 0 : index
    %c0_201 = arith.constant 0 : index
    %391 = vector.load %arg13[%c1_199, %c0_200, %c0_201] : memref<3x1x128xf32, #tpu.memory_space<vmem>>, vector<1x1x128xf32>
    %392 = vector.shape_cast %391 : vector<1x1x128xf32> to vector<1x128xf32>
    %393 = vector.broadcast %392 : vector<1x128xf32> to vector<8x128xf32>
    %394 = arith.addf %390, %393 : vector<8x128xf32>
    %cst_202 = arith.constant 0.000000e+00 : f32
    %395 = vector.broadcast %cst_202 : f32 to vector<8x128xf32>
    %396 = arith.maximumf %394, %395 : vector<8x128xf32>
    %c1_203 = arith.constant 1 : index
    %c0_204 = arith.constant 0 : index
    %c0_205 = arith.constant 0 : index
    %397 = vector.load %arg14[%c1_203, %c0_204, %c0_205] : memref<3x128x32xf32, #tpu.memory_space<vmem>>, vector<1x128x32xf32>
    %398 = vector.shape_cast %397 : vector<1x128x32xf32> to vector<128x32xf32>
    %cst_206 = arith.constant dense<0.000000e+00> : vector<8x32xf32>
    %399 = tpu.matmul %396, %398, %cst_206 {dimension_numbers = #tpu.dot_dimension_numbers<[1], [0], [0], [1], [0, 0, 1, 1], [], []>} : vector<8x128xf32>, vector<128x32xf32>, vector<8x32xf32> -> vector<8x32xf32>
    %400 = arith.addf %363, %399 : vector<8x32xf32>
    %c1_207 = arith.constant 1 : index
    %c0_208 = arith.constant 0 : index
    %c0_209 = arith.constant 0 : index
    %401 = vector.load %arg15[%c1_207, %c0_208, %c0_209] : memref<3x1x32xf32, #tpu.memory_space<vmem>>, vector<1x1x32xf32>
    %402 = vector.shape_cast %401 : vector<1x1x32xf32> to vector<1x32xf32>
    %403 = vector.broadcast %402 : vector<1x32xf32> to vector<8x32xf32>
    %404 = arith.addf %400, %403 : vector<8x32xf32>
    %c2_210 = arith.constant 2 : index
    %c0_211 = arith.constant 0 : index
    %c0_212 = arith.constant 0 : index
    %405 = vector.load %arg4[%c2_210, %c0_211, %c0_212] : memref<3x1x32xf32, #tpu.memory_space<vmem>>, vector<1x1x32xf32>
    %406 = vector.shape_cast %405 : vector<1x1x32xf32> to vector<1x32xf32>
    %c2_213 = arith.constant 2 : index
    %c0_214 = arith.constant 0 : index
    %c0_215 = arith.constant 0 : index
    %407 = vector.load %arg5[%c2_213, %c0_214, %c0_215] : memref<3x1x32xf32, #tpu.memory_space<vmem>>, vector<1x1x32xf32>
    %408 = vector.shape_cast %407 : vector<1x1x32xf32> to vector<1x32xf32>
    %cst_216 = arith.constant dense<0.000000e+00> : vector<8xf32>
    %409 = vector.multi_reduction <add>, %404, %cst_216 [1] : vector<8x32xf32> to vector<8xf32>
    %410 = vector.shape_cast %409 : vector<8xf32> to vector<8x1xf32>
    %cst_217 = arith.constant 3.200000e+01 : f32
    %411 = vector.broadcast %cst_217 : f32 to vector<8x1xf32>
    %412 = arith.divf %410, %411 : vector<8x1xf32>
    %413 = vector.broadcast %412 : vector<8x1xf32> to vector<8x32xf32>
    %414 = arith.subf %404, %413 : vector<8x32xf32>
    %415 = arith.mulf %414, %414 : vector<8x32xf32>
    %cst_218 = arith.constant dense<0.000000e+00> : vector<8xf32>
    %416 = vector.multi_reduction <add>, %415, %cst_218 [1] : vector<8x32xf32> to vector<8xf32>
    %417 = vector.shape_cast %416 : vector<8xf32> to vector<8x1xf32>
    %cst_219 = arith.constant 3.200000e+01 : f32
    %418 = vector.broadcast %cst_219 : f32 to vector<8x1xf32>
    %419 = arith.divf %417, %418 : vector<8x1xf32>
    %cst_220 = arith.constant 9.99999974E-6 : f32
    %420 = vector.broadcast %cst_220 : f32 to vector<8x1xf32>
    %421 = arith.addf %419, %420 : vector<8x1xf32>
    %422 = math.rsqrt %421 : vector<8x1xf32>
    %423 = vector.broadcast %422 : vector<8x1xf32> to vector<8x32xf32>
    %424 = arith.mulf %414, %423 : vector<8x32xf32>
    %425 = vector.broadcast %406 : vector<1x32xf32> to vector<8x32xf32>
    %426 = arith.mulf %424, %425 : vector<8x32xf32>
    %427 = vector.broadcast %408 : vector<1x32xf32> to vector<8x32xf32>
    %428 = arith.addf %426, %427 : vector<8x32xf32>
    %c2_221 = arith.constant 2 : index
    %c0_222 = arith.constant 0 : index
    %c0_223 = arith.constant 0 : index
    %429 = vector.load %arg6[%c2_221, %c0_222, %c0_223] : memref<3x32x48xf32, #tpu.memory_space<vmem>>, vector<1x32x48xf32>
    %430 = vector.shape_cast %429 : vector<1x32x48xf32> to vector<32x48xf32>
    %cst_224 = arith.constant dense<0.000000e+00> : vector<8x48xf32>
    %431 = tpu.matmul %428, %430, %cst_224 {dimension_numbers = #tpu.dot_dimension_numbers<[1], [0], [0], [1], [0, 0, 1, 1], [], []>} : vector<8x32xf32>, vector<32x48xf32>, vector<8x48xf32> -> vector<8x48xf32>
    %c2_225 = arith.constant 2 : index
    %c0_226 = arith.constant 0 : index
    %c0_227 = arith.constant 0 : index
    %432 = vector.load %arg7[%c2_225, %c0_226, %c0_227] : memref<3x32x48xf32, #tpu.memory_space<vmem>>, vector<1x32x48xf32>
    %433 = vector.shape_cast %432 : vector<1x32x48xf32> to vector<32x48xf32>
    %cst_228 = arith.constant dense<0.000000e+00> : vector<8x48xf32>
    %434 = tpu.matmul %428, %433, %cst_228 {dimension_numbers = #tpu.dot_dimension_numbers<[1], [0], [0], [1], [0, 0, 1, 1], [], []>} : vector<8x32xf32>, vector<32x48xf32>, vector<8x48xf32> -> vector<8x48xf32>
    %c12 = arith.constant 12 : index
    %c0_229 = arith.constant 0 : index
    %c0_230 = arith.constant 0 : index
    %435 = vector.load %arg8[%c12, %c0_229, %c0_230] : memref<18x32x32xf32, #tpu.memory_space<vmem>>, vector<1x32x32xf32>
    %436 = vector.shape_cast %435 : vector<1x32x32xf32> to vector<32x32xf32>
    %cst_231 = arith.constant dense<0.000000e+00> : vector<8x32xf32>
    %437 = tpu.matmul %428, %436, %cst_231 {dimension_numbers = #tpu.dot_dimension_numbers<[1], [0], [0], [1], [0, 0, 1, 1], [], []>} : vector<8x32xf32>, vector<32x32xf32>, vector<8x32xf32> -> vector<8x32xf32>
    %c13 = arith.constant 13 : index
    %c0_232 = arith.constant 0 : index
    %c0_233 = arith.constant 0 : index
    %438 = vector.load %arg8[%c13, %c0_232, %c0_233] : memref<18x32x32xf32, #tpu.memory_space<vmem>>, vector<1x32x32xf32>
    %439 = vector.shape_cast %438 : vector<1x32x32xf32> to vector<32x32xf32>
    %cst_234 = arith.constant dense<0.000000e+00> : vector<8x32xf32>
    %440 = tpu.matmul %428, %439, %cst_234 {dimension_numbers = #tpu.dot_dimension_numbers<[1], [0], [0], [1], [0, 0, 1, 1], [], []>} : vector<8x32xf32>, vector<32x32xf32>, vector<8x32xf32> -> vector<8x32xf32>
    %c14 = arith.constant 14 : index
    %c0_235 = arith.constant 0 : index
    %c0_236 = arith.constant 0 : index
    %441 = vector.load %arg8[%c14, %c0_235, %c0_236] : memref<18x32x32xf32, #tpu.memory_space<vmem>>, vector<1x32x32xf32>
    %442 = vector.shape_cast %441 : vector<1x32x32xf32> to vector<32x32xf32>
    %cst_237 = arith.constant dense<0.000000e+00> : vector<8x32xf32>
    %443 = tpu.matmul %428, %442, %cst_237 {dimension_numbers = #tpu.dot_dimension_numbers<[1], [0], [0], [1], [0, 0, 1, 1], [], []>} : vector<8x32xf32>, vector<32x32xf32>, vector<8x32xf32> -> vector<8x32xf32>
    %c15 = arith.constant 15 : index
    %c0_238 = arith.constant 0 : index
    %c0_239 = arith.constant 0 : index
    %444 = vector.load %arg8[%c15, %c0_238, %c0_239] : memref<18x32x32xf32, #tpu.memory_space<vmem>>, vector<1x32x32xf32>
    %445 = vector.shape_cast %444 : vector<1x32x32xf32> to vector<32x32xf32>
    %cst_240 = arith.constant dense<0.000000e+00> : vector<8x32xf32>
    %446 = tpu.matmul %428, %445, %cst_240 {dimension_numbers = #tpu.dot_dimension_numbers<[1], [0], [0], [1], [0, 0, 1, 1], [], []>} : vector<8x32xf32>, vector<32x32xf32>, vector<8x32xf32> -> vector<8x32xf32>
    %c16 = arith.constant 16 : index
    %c0_241 = arith.constant 0 : index
    %c0_242 = arith.constant 0 : index
    %447 = vector.load %arg8[%c16, %c0_241, %c0_242] : memref<18x32x32xf32, #tpu.memory_space<vmem>>, vector<1x32x32xf32>
    %448 = vector.shape_cast %447 : vector<1x32x32xf32> to vector<32x32xf32>
    %cst_243 = arith.constant dense<0.000000e+00> : vector<8x32xf32>
    %449 = tpu.matmul %428, %448, %cst_243 {dimension_numbers = #tpu.dot_dimension_numbers<[1], [0], [0], [1], [0, 0, 1, 1], [], []>} : vector<8x32xf32>, vector<32x32xf32>, vector<8x32xf32> -> vector<8x32xf32>
    %c17 = arith.constant 17 : index
    %c0_244 = arith.constant 0 : index
    %c0_245 = arith.constant 0 : index
    %450 = vector.load %arg8[%c17, %c0_244, %c0_245] : memref<18x32x32xf32, #tpu.memory_space<vmem>>, vector<1x32x32xf32>
    %451 = vector.shape_cast %450 : vector<1x32x32xf32> to vector<32x32xf32>
    %cst_246 = arith.constant dense<0.000000e+00> : vector<8x32xf32>
    %452 = tpu.matmul %428, %451, %cst_246 {dimension_numbers = #tpu.dot_dimension_numbers<[1], [0], [0], [1], [0, 0, 1, 1], [], []>} : vector<8x32xf32>, vector<32x32xf32>, vector<8x32xf32> -> vector<8x32xf32>
    %c0_i32_247 = arith.constant 0 : i32
    %453 = vector.broadcast %c0_i32_247 : i32 to vector<8x8xi32>
    %454 = arith.addi %12, %453 : vector<8x8xi32>
    %455 = arith.cmpi sle, %11, %454 : vector<8x8xi32>
    %cst_248 = arith.constant 0.000000e+00 : f32
    %456 = vector.broadcast %cst_248 : f32 to vector<8x32xf32>
    %457 = vector.extract_strided_slice %431 {offsets = [0, 0], sizes = [8, 8], strides = [1, 1]} : vector<8x48xf32> to vector<8x8xf32>
    %458 = vector.extract_strided_slice %434 {offsets = [0, 0], sizes = [8, 8], strides = [1, 1]} : vector<8x48xf32> to vector<8x8xf32>
    %cst_249 = arith.constant dense<0.000000e+00> : vector<8x8xf32>
    %459 = tpu.matmul %457, %458, %cst_249 {dimension_numbers = #tpu.dot_dimension_numbers<[1], [1], [0], [0], [0, 0, 1, 0], [], []>} : vector<8x8xf32>, vector<8x8xf32>, vector<8x8xf32> -> vector<8x8xf32>
    %cst_250 = arith.constant -1.000000e+30 : f32
    %460 = vector.broadcast %cst_250 : f32 to vector<8x8xf32>
    %461 = arith.select %455, %459, %460 : vector<8x8xi1>, vector<8x8xf32>
    %cst_251 = arith.constant dense<0xFF800000> : vector<8xf32>
    %462 = vector.multi_reduction <maximumf>, %461, %cst_251 [1] : vector<8x8xf32> to vector<8xf32>
    %463 = vector.shape_cast %462 : vector<8xf32> to vector<8x1xf32>
    %464 = vector.broadcast %463 : vector<8x1xf32> to vector<8x8xf32>
    %465 = arith.subf %461, %464 : vector<8x8xf32>
    %466 = math.exp %465 : vector<8x8xf32>
    %cst_252 = arith.constant dense<0.000000e+00> : vector<8xf32>
    %467 = vector.multi_reduction <add>, %466, %cst_252 [1] : vector<8x8xf32> to vector<8xf32>
    %468 = vector.shape_cast %467 : vector<8xf32> to vector<8x1xf32>
    %cst_253 = arith.constant dense<0.000000e+00> : vector<8x32xf32>
    %469 = tpu.matmul %466, %437, %cst_253 {dimension_numbers = #tpu.dot_dimension_numbers<[1], [0], [0], [1], [0, 0, 1, 1], [], []>} : vector<8x8xf32>, vector<8x32xf32>, vector<8x32xf32> -> vector<8x32xf32>
    %470 = vector.broadcast %468 : vector<8x1xf32> to vector<8x32xf32>
    %471 = arith.divf %469, %470 : vector<8x32xf32>
    %472 = arith.addf %456, %471 : vector<8x32xf32>
    %473 = vector.extract_strided_slice %431 {offsets = [0, 8], sizes = [8, 8], strides = [1, 1]} : vector<8x48xf32> to vector<8x8xf32>
    %474 = vector.extract_strided_slice %434 {offsets = [0, 8], sizes = [8, 8], strides = [1, 1]} : vector<8x48xf32> to vector<8x8xf32>
    %cst_254 = arith.constant dense<0.000000e+00> : vector<8x8xf32>
    %475 = tpu.matmul %473, %474, %cst_254 {dimension_numbers = #tpu.dot_dimension_numbers<[1], [1], [0], [0], [0, 0, 1, 0], [], []>} : vector<8x8xf32>, vector<8x8xf32>, vector<8x8xf32> -> vector<8x8xf32>
    %cst_255 = arith.constant -1.000000e+30 : f32
    %476 = vector.broadcast %cst_255 : f32 to vector<8x8xf32>
    %477 = arith.select %455, %475, %476 : vector<8x8xi1>, vector<8x8xf32>
    %cst_256 = arith.constant dense<0xFF800000> : vector<8xf32>
    %478 = vector.multi_reduction <maximumf>, %477, %cst_256 [1] : vector<8x8xf32> to vector<8xf32>
    %479 = vector.shape_cast %478 : vector<8xf32> to vector<8x1xf32>
    %480 = vector.broadcast %479 : vector<8x1xf32> to vector<8x8xf32>
    %481 = arith.subf %477, %480 : vector<8x8xf32>
    %482 = math.exp %481 : vector<8x8xf32>
    %cst_257 = arith.constant dense<0.000000e+00> : vector<8xf32>
    %483 = vector.multi_reduction <add>, %482, %cst_257 [1] : vector<8x8xf32> to vector<8xf32>
    %484 = vector.shape_cast %483 : vector<8xf32> to vector<8x1xf32>
    %cst_258 = arith.constant dense<0.000000e+00> : vector<8x32xf32>
    %485 = tpu.matmul %482, %440, %cst_258 {dimension_numbers = #tpu.dot_dimension_numbers<[1], [0], [0], [1], [0, 0, 1, 1], [], []>} : vector<8x8xf32>, vector<8x32xf32>, vector<8x32xf32> -> vector<8x32xf32>
    %486 = vector.broadcast %484 : vector<8x1xf32> to vector<8x32xf32>
    %487 = arith.divf %485, %486 : vector<8x32xf32>
    %488 = arith.addf %472, %487 : vector<8x32xf32>
    %489 = vector.extract_strided_slice %431 {offsets = [0, 16], sizes = [8, 8], strides = [1, 1]} : vector<8x48xf32> to vector<8x8xf32>
    %490 = vector.extract_strided_slice %434 {offsets = [0, 16], sizes = [8, 8], strides = [1, 1]} : vector<8x48xf32> to vector<8x8xf32>
    %cst_259 = arith.constant dense<0.000000e+00> : vector<8x8xf32>
    %491 = tpu.matmul %489, %490, %cst_259 {dimension_numbers = #tpu.dot_dimension_numbers<[1], [1], [0], [0], [0, 0, 1, 0], [], []>} : vector<8x8xf32>, vector<8x8xf32>, vector<8x8xf32> -> vector<8x8xf32>
    %cst_260 = arith.constant -1.000000e+30 : f32
    %492 = vector.broadcast %cst_260 : f32 to vector<8x8xf32>
    %493 = arith.select %455, %491, %492 : vector<8x8xi1>, vector<8x8xf32>
    %cst_261 = arith.constant dense<0xFF800000> : vector<8xf32>
    %494 = vector.multi_reduction <maximumf>, %493, %cst_261 [1] : vector<8x8xf32> to vector<8xf32>
    %495 = vector.shape_cast %494 : vector<8xf32> to vector<8x1xf32>
    %496 = vector.broadcast %495 : vector<8x1xf32> to vector<8x8xf32>
    %497 = arith.subf %493, %496 : vector<8x8xf32>
    %498 = math.exp %497 : vector<8x8xf32>
    %cst_262 = arith.constant dense<0.000000e+00> : vector<8xf32>
    %499 = vector.multi_reduction <add>, %498, %cst_262 [1] : vector<8x8xf32> to vector<8xf32>
    %500 = vector.shape_cast %499 : vector<8xf32> to vector<8x1xf32>
    %cst_263 = arith.constant dense<0.000000e+00> : vector<8x32xf32>
    %501 = tpu.matmul %498, %443, %cst_263 {dimension_numbers = #tpu.dot_dimension_numbers<[1], [0], [0], [1], [0, 0, 1, 1], [], []>} : vector<8x8xf32>, vector<8x32xf32>, vector<8x32xf32> -> vector<8x32xf32>
    %502 = vector.broadcast %500 : vector<8x1xf32> to vector<8x32xf32>
    %503 = arith.divf %501, %502 : vector<8x32xf32>
    %504 = arith.addf %488, %503 : vector<8x32xf32>
    %505 = vector.extract_strided_slice %431 {offsets = [0, 24], sizes = [8, 8], strides = [1, 1]} : vector<8x48xf32> to vector<8x8xf32>
    %506 = vector.extract_strided_slice %434 {offsets = [0, 24], sizes = [8, 8], strides = [1, 1]} : vector<8x48xf32> to vector<8x8xf32>
    %cst_264 = arith.constant dense<0.000000e+00> : vector<8x8xf32>
    %507 = tpu.matmul %505, %506, %cst_264 {dimension_numbers = #tpu.dot_dimension_numbers<[1], [1], [0], [0], [0, 0, 1, 0], [], []>} : vector<8x8xf32>, vector<8x8xf32>, vector<8x8xf32> -> vector<8x8xf32>
    %cst_265 = arith.constant -1.000000e+30 : f32
    %508 = vector.broadcast %cst_265 : f32 to vector<8x8xf32>
    %509 = arith.select %455, %507, %508 : vector<8x8xi1>, vector<8x8xf32>
    %cst_266 = arith.constant dense<0xFF800000> : vector<8xf32>
    %510 = vector.multi_reduction <maximumf>, %509, %cst_266 [1] : vector<8x8xf32> to vector<8xf32>
    %511 = vector.shape_cast %510 : vector<8xf32> to vector<8x1xf32>
    %512 = vector.broadcast %511 : vector<8x1xf32> to vector<8x8xf32>
    %513 = arith.subf %509, %512 : vector<8x8xf32>
    %514 = math.exp %513 : vector<8x8xf32>
    %cst_267 = arith.constant dense<0.000000e+00> : vector<8xf32>
    %515 = vector.multi_reduction <add>, %514, %cst_267 [1] : vector<8x8xf32> to vector<8xf32>
    %516 = vector.shape_cast %515 : vector<8xf32> to vector<8x1xf32>
    %cst_268 = arith.constant dense<0.000000e+00> : vector<8x32xf32>
    %517 = tpu.matmul %514, %446, %cst_268 {dimension_numbers = #tpu.dot_dimension_numbers<[1], [0], [0], [1], [0, 0, 1, 1], [], []>} : vector<8x8xf32>, vector<8x32xf32>, vector<8x32xf32> -> vector<8x32xf32>
    %518 = vector.broadcast %516 : vector<8x1xf32> to vector<8x32xf32>
    %519 = arith.divf %517, %518 : vector<8x32xf32>
    %520 = arith.addf %504, %519 : vector<8x32xf32>
    %521 = vector.extract_strided_slice %431 {offsets = [0, 32], sizes = [8, 8], strides = [1, 1]} : vector<8x48xf32> to vector<8x8xf32>
    %522 = vector.extract_strided_slice %434 {offsets = [0, 32], sizes = [8, 8], strides = [1, 1]} : vector<8x48xf32> to vector<8x8xf32>
    %cst_269 = arith.constant dense<0.000000e+00> : vector<8x8xf32>
    %523 = tpu.matmul %521, %522, %cst_269 {dimension_numbers = #tpu.dot_dimension_numbers<[1], [1], [0], [0], [0, 0, 1, 0], [], []>} : vector<8x8xf32>, vector<8x8xf32>, vector<8x8xf32> -> vector<8x8xf32>
    %cst_270 = arith.constant -1.000000e+30 : f32
    %524 = vector.broadcast %cst_270 : f32 to vector<8x8xf32>
    %525 = arith.select %455, %523, %524 : vector<8x8xi1>, vector<8x8xf32>
    %cst_271 = arith.constant dense<0xFF800000> : vector<8xf32>
    %526 = vector.multi_reduction <maximumf>, %525, %cst_271 [1] : vector<8x8xf32> to vector<8xf32>
    %527 = vector.shape_cast %526 : vector<8xf32> to vector<8x1xf32>
    %528 = vector.broadcast %527 : vector<8x1xf32> to vector<8x8xf32>
    %529 = arith.subf %525, %528 : vector<8x8xf32>
    %530 = math.exp %529 : vector<8x8xf32>
    %cst_272 = arith.constant dense<0.000000e+00> : vector<8xf32>
    %531 = vector.multi_reduction <add>, %530, %cst_272 [1] : vector<8x8xf32> to vector<8xf32>
    %532 = vector.shape_cast %531 : vector<8xf32> to vector<8x1xf32>
    %cst_273 = arith.constant dense<0.000000e+00> : vector<8x32xf32>
    %533 = tpu.matmul %530, %449, %cst_273 {dimension_numbers = #tpu.dot_dimension_numbers<[1], [0], [0], [1], [0, 0, 1, 1], [], []>} : vector<8x8xf32>, vector<8x32xf32>, vector<8x32xf32> -> vector<8x32xf32>
    %534 = vector.broadcast %532 : vector<8x1xf32> to vector<8x32xf32>
    %535 = arith.divf %533, %534 : vector<8x32xf32>
    %536 = arith.addf %520, %535 : vector<8x32xf32>
    %537 = vector.extract_strided_slice %431 {offsets = [0, 40], sizes = [8, 8], strides = [1, 1]} : vector<8x48xf32> to vector<8x8xf32>
    %538 = vector.extract_strided_slice %434 {offsets = [0, 40], sizes = [8, 8], strides = [1, 1]} : vector<8x48xf32> to vector<8x8xf32>
    %cst_274 = arith.constant dense<0.000000e+00> : vector<8x8xf32>
    %539 = tpu.matmul %537, %538, %cst_274 {dimension_numbers = #tpu.dot_dimension_numbers<[1], [1], [0], [0], [0, 0, 1, 0], [], []>} : vector<8x8xf32>, vector<8x8xf32>, vector<8x8xf32> -> vector<8x8xf32>
    %cst_275 = arith.constant -1.000000e+30 : f32
    %540 = vector.broadcast %cst_275 : f32 to vector<8x8xf32>
    %541 = arith.select %455, %539, %540 : vector<8x8xi1>, vector<8x8xf32>
    %cst_276 = arith.constant dense<0xFF800000> : vector<8xf32>
    %542 = vector.multi_reduction <maximumf>, %541, %cst_276 [1] : vector<8x8xf32> to vector<8xf32>
    %543 = vector.shape_cast %542 : vector<8xf32> to vector<8x1xf32>
    %544 = vector.broadcast %543 : vector<8x1xf32> to vector<8x8xf32>
    %545 = arith.subf %541, %544 : vector<8x8xf32>
    %546 = math.exp %545 : vector<8x8xf32>
    %cst_277 = arith.constant dense<0.000000e+00> : vector<8xf32>
    %547 = vector.multi_reduction <add>, %546, %cst_277 [1] : vector<8x8xf32> to vector<8xf32>
    %548 = vector.shape_cast %547 : vector<8xf32> to vector<8x1xf32>
    %cst_278 = arith.constant dense<0.000000e+00> : vector<8x32xf32>
    %549 = tpu.matmul %546, %452, %cst_278 {dimension_numbers = #tpu.dot_dimension_numbers<[1], [0], [0], [1], [0, 0, 1, 1], [], []>} : vector<8x8xf32>, vector<8x32xf32>, vector<8x32xf32> -> vector<8x32xf32>
    %550 = vector.broadcast %548 : vector<8x1xf32> to vector<8x32xf32>
    %551 = arith.divf %549, %550 : vector<8x32xf32>
    %552 = arith.addf %536, %551 : vector<8x32xf32>
    %c0_279 = arith.constant 0 : index
    %c0_280 = arith.constant 0 : index
    %553 = vector.load %arg21[%c0_279, %c0_280] : memref<8x32xf32, #tpu.memory_space<vmem>>, vector<8x32xf32>
    tpu.vector_store %arg21[%c0_279, %c0_280], %552 {strides = array<i32>} : memref<8x32xf32, #tpu.memory_space<vmem>>, vector<8x32xf32>,
    %c0_281 = arith.constant 0 : index
    %c0_282 = arith.constant 0 : index
    %554 = vector.load %arg21[%c0_281, %c0_282] : memref<8x32xf32, #tpu.memory_space<vmem>>, vector<8x32xf32>
    %555 = arith.addf %404, %554 : vector<8x32xf32>
    %c2_283 = arith.constant 2 : index
    %c0_284 = arith.constant 0 : index
    %c0_285 = arith.constant 0 : index
    %556 = vector.load %arg9[%c2_283, %c0_284, %c0_285] : memref<3x1x32xf32, #tpu.memory_space<vmem>>, vector<1x1x32xf32>
    %557 = vector.shape_cast %556 : vector<1x1x32xf32> to vector<1x32xf32>
    %558 = vector.broadcast %557 : vector<1x32xf32> to vector<8x32xf32>
    %559 = arith.addf %555, %558 : vector<8x32xf32>
    %c2_286 = arith.constant 2 : index
    %c0_287 = arith.constant 0 : index
    %c0_288 = arith.constant 0 : index
    %560 = vector.load %arg10[%c2_286, %c0_287, %c0_288] : memref<3x1x32xf32, #tpu.memory_space<vmem>>, vector<1x1x32xf32>
    %561 = vector.shape_cast %560 : vector<1x1x32xf32> to vector<1x32xf32>
    %c2_289 = arith.constant 2 : index
    %c0_290 = arith.constant 0 : index
    %c0_291 = arith.constant 0 : index
    %562 = vector.load %arg11[%c2_289, %c0_290, %c0_291] : memref<3x1x32xf32, #tpu.memory_space<vmem>>, vector<1x1x32xf32>
    %563 = vector.shape_cast %562 : vector<1x1x32xf32> to vector<1x32xf32>
    %cst_292 = arith.constant dense<0.000000e+00> : vector<8xf32>
    %564 = vector.multi_reduction <add>, %559, %cst_292 [1] : vector<8x32xf32> to vector<8xf32>
    %565 = vector.shape_cast %564 : vector<8xf32> to vector<8x1xf32>
    %cst_293 = arith.constant 3.200000e+01 : f32
    %566 = vector.broadcast %cst_293 : f32 to vector<8x1xf32>
    %567 = arith.divf %565, %566 : vector<8x1xf32>
    %568 = vector.broadcast %567 : vector<8x1xf32> to vector<8x32xf32>
    %569 = arith.subf %559, %568 : vector<8x32xf32>
    %570 = arith.mulf %569, %569 : vector<8x32xf32>
    %cst_294 = arith.constant dense<0.000000e+00> : vector<8xf32>
    %571 = vector.multi_reduction <add>, %570, %cst_294 [1] : vector<8x32xf32> to vector<8xf32>
    %572 = vector.shape_cast %571 : vector<8xf32> to vector<8x1xf32>
    %cst_295 = arith.constant 3.200000e+01 : f32
    %573 = vector.broadcast %cst_295 : f32 to vector<8x1xf32>
    %574 = arith.divf %572, %573 : vector<8x1xf32>
    %cst_296 = arith.constant 9.99999974E-6 : f32
    %575 = vector.broadcast %cst_296 : f32 to vector<8x1xf32>
    %576 = arith.addf %574, %575 : vector<8x1xf32>
    %577 = math.rsqrt %576 : vector<8x1xf32>
    %578 = vector.broadcast %577 : vector<8x1xf32> to vector<8x32xf32>
    %579 = arith.mulf %569, %578 : vector<8x32xf32>
    %580 = vector.broadcast %561 : vector<1x32xf32> to vector<8x32xf32>
    %581 = arith.mulf %579, %580 : vector<8x32xf32>
    %582 = vector.broadcast %563 : vector<1x32xf32> to vector<8x32xf32>
    %583 = arith.addf %581, %582 : vector<8x32xf32>
    %c2_297 = arith.constant 2 : index
    %c0_298 = arith.constant 0 : index
    %c0_299 = arith.constant 0 : index
    %584 = vector.load %arg12[%c2_297, %c0_298, %c0_299] : memref<3x32x128xf32, #tpu.memory_space<vmem>>, vector<1x32x128xf32>
    %585 = vector.shape_cast %584 : vector<1x32x128xf32> to vector<32x128xf32>
    %cst_300 = arith.constant dense<0.000000e+00> : vector<8x128xf32>
    %586 = tpu.matmul %583, %585, %cst_300 {dimension_numbers = #tpu.dot_dimension_numbers<[1], [0], [0], [1], [0, 0, 1, 1], [], []>} : vector<8x32xf32>, vector<32x128xf32>, vector<8x128xf32> -> vector<8x128xf32>
    %c2_301 = arith.constant 2 : index
    %c0_302 = arith.constant 0 : index
    %c0_303 = arith.constant 0 : index
    %587 = vector.load %arg13[%c2_301, %c0_302, %c0_303] : memref<3x1x128xf32, #tpu.memory_space<vmem>>, vector<1x1x128xf32>
    %588 = vector.shape_cast %587 : vector<1x1x128xf32> to vector<1x128xf32>
    %589 = vector.broadcast %588 : vector<1x128xf32> to vector<8x128xf32>
    %590 = arith.addf %586, %589 : vector<8x128xf32>
    %cst_304 = arith.constant 0.000000e+00 : f32
    %591 = vector.broadcast %cst_304 : f32 to vector<8x128xf32>
    %592 = arith.maximumf %590, %591 : vector<8x128xf32>
    %c2_305 = arith.constant 2 : index
    %c0_306 = arith.constant 0 : index
    %c0_307 = arith.constant 0 : index
    %593 = vector.load %arg14[%c2_305, %c0_306, %c0_307] : memref<3x128x32xf32, #tpu.memory_space<vmem>>, vector<1x128x32xf32>
    %594 = vector.shape_cast %593 : vector<1x128x32xf32> to vector<128x32xf32>
    %cst_308 = arith.constant dense<0.000000e+00> : vector<8x32xf32>
    %595 = tpu.matmul %592, %594, %cst_308 {dimension_numbers = #tpu.dot_dimension_numbers<[1], [0], [0], [1], [0, 0, 1, 1], [], []>} : vector<8x128xf32>, vector<128x32xf32>, vector<8x32xf32> -> vector<8x32xf32>
    %596 = arith.addf %559, %595 : vector<8x32xf32>
    %c2_309 = arith.constant 2 : index
    %c0_310 = arith.constant 0 : index
    %c0_311 = arith.constant 0 : index
    %597 = vector.load %arg15[%c2_309, %c0_310, %c0_311] : memref<3x1x32xf32, #tpu.memory_space<vmem>>, vector<1x1x32xf32>
    %598 = vector.shape_cast %597 : vector<1x1x32xf32> to vector<1x32xf32>
    %599 = vector.broadcast %598 : vector<1x32xf32> to vector<8x32xf32>
    %600 = arith.addf %596, %599 : vector<8x32xf32>
    %c0_312 = arith.constant 0 : index
    %c0_313 = arith.constant 0 : index
    %601 = vector.load %arg16[%c0_312, %c0_313] : memref<1x32xf32, #tpu.memory_space<vmem>>, vector<1x32xf32>
    %c0_314 = arith.constant 0 : index
    %c0_315 = arith.constant 0 : index
    %602 = vector.load %arg17[%c0_314, %c0_315] : memref<1x32xf32, #tpu.memory_space<vmem>>, vector<1x32xf32>
    %cst_316 = arith.constant dense<0.000000e+00> : vector<8xf32>
    %603 = vector.multi_reduction <add>, %600, %cst_316 [1] : vector<8x32xf32> to vector<8xf32>
    %604 = vector.shape_cast %603 : vector<8xf32> to vector<8x1xf32>
    %cst_317 = arith.constant 3.200000e+01 : f32
    %605 = vector.broadcast %cst_317 : f32 to vector<8x1xf32>
    %606 = arith.divf %604, %605 : vector<8x1xf32>
    %607 = vector.broadcast %606 : vector<8x1xf32> to vector<8x32xf32>
    %608 = arith.subf %600, %607 : vector<8x32xf32>
    %609 = arith.mulf %608, %608 : vector<8x32xf32>
    %cst_318 = arith.constant dense<0.000000e+00> : vector<8xf32>
    %610 = vector.multi_reduction <add>, %609, %cst_318 [1] : vector<8x32xf32> to vector<8xf32>
    %611 = vector.shape_cast %610 : vector<8xf32> to vector<8x1xf32>
    %cst_319 = arith.constant 3.200000e+01 : f32
    %612 = vector.broadcast %cst_319 : f32 to vector<8x1xf32>
    %613 = arith.divf %611, %612 : vector<8x1xf32>
    %cst_320 = arith.constant 9.99999974E-6 : f32
    %614 = vector.broadcast %cst_320 : f32 to vector<8x1xf32>
    %615 = arith.addf %613, %614 : vector<8x1xf32>
    %616 = math.rsqrt %615 : vector<8x1xf32>
    %617 = vector.broadcast %616 : vector<8x1xf32> to vector<8x32xf32>
    %618 = arith.mulf %608, %617 : vector<8x32xf32>
    %619 = vector.broadcast %601 : vector<1x32xf32> to vector<8x32xf32>
    %620 = arith.mulf %618, %619 : vector<8x32xf32>
    %621 = vector.broadcast %602 : vector<1x32xf32> to vector<8x32xf32>
    %622 = arith.addf %620, %621 : vector<8x32xf32>
    %c0_321 = arith.constant 0 : index
    %c0_322 = arith.constant 0 : index
    %623 = vector.load %arg18[%c0_321, %c0_322] : memref<32x128xf32, #tpu.memory_space<vmem>>, vector<32x128xf32>
    %cst_323 = arith.constant dense<0.000000e+00> : vector<8x128xf32>
    %624 = tpu.matmul %622, %623, %cst_323 {dimension_numbers = #tpu.dot_dimension_numbers<[1], [0], [0], [1], [0, 0, 1, 1], [], []>} : vector<8x32xf32>, vector<32x128xf32>, vector<8x128xf32> -> vector<8x128xf32>
    %c0_324 = arith.constant 0 : index
    %c0_325 = arith.constant 0 : index
    %625 = vector.load %arg19[%c0_324, %c0_325] : memref<1x128xf32, #tpu.memory_space<vmem>>, vector<1x128xf32>
    %626 = vector.broadcast %625 : vector<1x128xf32> to vector<8x128xf32>
    %627 = arith.addf %624, %626 : vector<8x128xf32>
    %c0_326 = arith.constant 0 : index
    %c0_327 = arith.constant 0 : index
    %c0_328 = arith.constant 0 : index
    %628 = vector.load %arg20[%c0_326, %c0_327, %c0_328] : memref<1x8x128xf32, #tpu.memory_space<vmem>>, vector<1x8x128xf32>
    %629 = vector.shape_cast %628 : vector<1x8x128xf32> to vector<8x128xf32>
    %630 = vector.shape_cast %627 : vector<8x128xf32> to vector<1x8x128xf32>
    tpu.vector_store %arg20[%c0_326, %c0_327, %c0_328], %630 {strides = array<i32>} : memref<1x8x128xf32, #tpu.memory_space<vmem>>, vector<1x8x128xf32>,
    return
  }
  func.func @transform_0(%arg0: i32) -> (i32, i32, i32) {
    %c0_i32 = arith.constant 0 : i32
    %c0_i32_0 = arith.constant 0 : i32
    %c0_i32_1 = arith.constant 0 : i32
    return %arg0, %c0_i32, %c0_i32_0 : i32, i32, i32
  }
  func.func @transform_1(%arg0: i32) -> (i32, i32) {
    %c0_i32 = arith.constant 0 : i32
    %c0_i32_0 = arith.constant 0 : i32
    %c0_i32_1 = arith.constant 0 : i32
    return %c0_i32, %c0_i32_0 : i32, i32
  }
  func.func @transform_2(%arg0: i32) -> (i32, i32) {
    %c0_i32 = arith.constant 0 : i32
    %c0_i32_0 = arith.constant 0 : i32
    %c0_i32_1 = arith.constant 0 : i32
    return %c0_i32, %c0_i32_0 : i32, i32
  }
  func.func @transform_3(%arg0: i32) -> (i32, i32, i32) {
    %c0_i32 = arith.constant 0 : i32
    %c0_i32_0 = arith.constant 0 : i32
    %c0_i32_1 = arith.constant 0 : i32
    %c0_i32_2 = arith.constant 0 : i32
    return %c0_i32, %c0_i32_0, %c0_i32_1 : i32, i32, i32
  }
  func.func @transform_4(%arg0: i32) -> (i32, i32, i32) {
    %c0_i32 = arith.constant 0 : i32
    %c0_i32_0 = arith.constant 0 : i32
    %c0_i32_1 = arith.constant 0 : i32
    %c0_i32_2 = arith.constant 0 : i32
    return %c0_i32, %c0_i32_0, %c0_i32_1 : i32, i32, i32
  }
  func.func @transform_5(%arg0: i32) -> (i32, i32, i32) {
    %c0_i32 = arith.constant 0 : i32
    %c0_i32_0 = arith.constant 0 : i32
    %c0_i32_1 = arith.constant 0 : i32
    %c0_i32_2 = arith.constant 0 : i32
    return %c0_i32, %c0_i32_0, %c0_i32_1 : i32, i32, i32
  }
  func.func @transform_6(%arg0: i32) -> (i32, i32, i32) {
    %c0_i32 = arith.constant 0 : i32
    %c0_i32_0 = arith.constant 0 : i32
    %c0_i32_1 = arith.constant 0 : i32
    %c0_i32_2 = arith.constant 0 : i32
    return %c0_i32, %c0_i32_0, %c0_i32_1 : i32, i32, i32
  }
  func.func @transform_7(%arg0: i32) -> (i32, i32, i32) {
    %c0_i32 = arith.constant 0 : i32
    %c0_i32_0 = arith.constant 0 : i32
    %c0_i32_1 = arith.constant 0 : i32
    %c0_i32_2 = arith.constant 0 : i32
    return %c0_i32, %c0_i32_0, %c0_i32_1 : i32, i32, i32
  }
  func.func @transform_8(%arg0: i32) -> (i32, i32, i32) {
    %c0_i32 = arith.constant 0 : i32
    %c0_i32_0 = arith.constant 0 : i32
    %c0_i32_1 = arith.constant 0 : i32
    %c0_i32_2 = arith.constant 0 : i32
    return %c0_i32, %c0_i32_0, %c0_i32_1 : i32, i32, i32
  }
  func.func @transform_9(%arg0: i32) -> (i32, i32, i32) {
    %c0_i32 = arith.constant 0 : i32
    %c0_i32_0 = arith.constant 0 : i32
    %c0_i32_1 = arith.constant 0 : i32
    %c0_i32_2 = arith.constant 0 : i32
    return %c0_i32, %c0_i32_0, %c0_i32_1 : i32, i32, i32
  }
  func.func @transform_10(%arg0: i32) -> (i32, i32, i32) {
    %c0_i32 = arith.constant 0 : i32
    %c0_i32_0 = arith.constant 0 : i32
    %c0_i32_1 = arith.constant 0 : i32
    %c0_i32_2 = arith.constant 0 : i32
    return %c0_i32, %c0_i32_0, %c0_i32_1 : i32, i32, i32
  }
  func.func @transform_11(%arg0: i32) -> (i32, i32, i32) {
    %c0_i32 = arith.constant 0 : i32
    %c0_i32_0 = arith.constant 0 : i32
    %c0_i32_1 = arith.constant 0 : i32
    %c0_i32_2 = arith.constant 0 : i32
    return %c0_i32, %c0_i32_0, %c0_i32_1 : i32, i32, i32
  }
  func.func @transform_12(%arg0: i32) -> (i32, i32, i32) {
    %c0_i32 = arith.constant 0 : i32
    %c0_i32_0 = arith.constant 0 : i32
    %c0_i32_1 = arith.constant 0 : i32
    %c0_i32_2 = arith.constant 0 : i32
    return %c0_i32, %c0_i32_0, %c0_i32_1 : i32, i32, i32
  }
  func.func @transform_13(%arg0: i32) -> (i32, i32, i32) {
    %c0_i32 = arith.constant 0 : i32
    %c0_i32_0 = arith.constant 0 : i32
    %c0_i32_1 = arith.constant 0 : i32
    %c0_i32_2 = arith.constant 0 : i32
    return %c0_i32, %c0_i32_0, %c0_i32_1 : i32, i32, i32
  }
  func.func @transform_14(%arg0: i32) -> (i32, i32, i32) {
    %c0_i32 = arith.constant 0 : i32
    %c0_i32_0 = arith.constant 0 : i32
    %c0_i32_1 = arith.constant 0 : i32
    %c0_i32_2 = arith.constant 0 : i32
    return %c0_i32, %c0_i32_0, %c0_i32_1 : i32, i32, i32
  }
  func.func @transform_15(%arg0: i32) -> (i32, i32) {
    %c0_i32 = arith.constant 0 : i32
    %c0_i32_0 = arith.constant 0 : i32
    %c0_i32_1 = arith.constant 0 : i32
    return %c0_i32, %c0_i32_0 : i32, i32
  }
  func.func @transform_16(%arg0: i32) -> (i32, i32) {
    %c0_i32 = arith.constant 0 : i32
    %c0_i32_0 = arith.constant 0 : i32
    %c0_i32_1 = arith.constant 0 : i32
    return %c0_i32, %c0_i32_0 : i32, i32
  }
  func.func @transform_17(%arg0: i32) -> (i32, i32) {
    %c0_i32 = arith.constant 0 : i32
    %c0_i32_0 = arith.constant 0 : i32
    %c0_i32_1 = arith.constant 0 : i32
    return %c0_i32, %c0_i32_0 : i32, i32
  }
  func.func @transform_18(%arg0: i32) -> (i32, i32) {
    %c0_i32 = arith.constant 0 : i32
    %c0_i32_0 = arith.constant 0 : i32
    %c0_i32_1 = arith.constant 0 : i32
    return %c0_i32, %c0_i32_0 : i32, i32
  }
  func.func @transform_19(%arg0: i32) -> (i32, i32, i32) {
    %c0_i32 = arith.constant 0 : i32
    %c0_i32_0 = arith.constant 0 : i32
    %c0_i32_1 = arith.constant 0 : i32
    return %arg0, %c0_i32, %c0_i32_0 : i32, i32, i32
  }
}

</mosaic_0001>

<bundles_post_ra>
// kernel: gpt_forward.1
= control target key start
LH: loop header
LB: loop body
LE: loop exit
PB: predicated region body
PF: predicated region fallthrough
CT: control target
= control target key end

     0   :  { %s5109_s0 = inlined_call_operand.vmem [shape: s32[2,8,1], index: 0, kind: input, shape index: {}]   ;;  %s5110_s1 = inlined_call_operand.vmem [shape: f32[128,32], index: 1, kind: input, shape index: {}]   ;;  %s5111_s2 = inlined_call_operand.vmem [shape: f32[8,32], index: 2, kind: input, shape index: {}]   ;;  %s5112_s3 = inlined_call_operand.vmem [shape: f32[3,1,32], index: 3, kind: input, shape index: {}]   ;;  %s5113_s4 = inlined_call_operand.vmem [shape: f32[3,1,32], index: 4, kind: input, shape index: {}]   ;;  %s5114_s5 = inlined_call_operand.hbm [shape: f32[3,32,48], index: 5, kind: input, shape index: {}]   ;;  %s5115_s6 = inlined_call_operand.hbm [shape: f32[3,32,48], index: 6, kind: input, shape index: {}]   ;;  %s5116_s7 = inlined_call_operand.vmem [shape: f32[18,32,32], index: 7, kind: input, shape index: {}]   ;;  %s5117_s8 = inlined_call_operand.vmem [shape: f32[3,1,32], index: 8, kind: input, shape index: {}]   ;;  %s5118_s9 = inlined_call_operand.vmem [shape: f32[3,1,32], index: 9, kind: input, shape index: {}]   ;;  %s5119_s10 = inlined_call_operand.vmem [shape: f32[3,1,32], index: 10, kind: input, shape index: {}]   ;;  %s5120_s11 = inlined_call_operand.hbm [shape: f32[3,32,128], index: 11, kind: input, shape index: {}]   ;;  %s5121_s12 = inlined_call_operand.vmem [shape: f32[3,1,128], index: 12, kind: input, shape index: {}]   ;;  %s5122_s13 = inlined_call_operand.vmem [shape: f32[3,128,32], index: 13, kind: input, shape index: {}]   ;;  %s5123_s14 = inlined_call_operand.vmem [shape: f32[3,1,32], index: 14, kind: input, shape index: {}]   ;;  %s5124_s15 = inlined_call_operand.vmem [shape: f32[1,32], index: 15, kind: input, shape index: {}]   ;;  %s5125_s16 = inlined_call_operand.vmem [shape: f32[1,32], index: 16, kind: input, shape index: {}]   ;;  %s5126_s17 = inlined_call_operand.hbm [shape: f32[32,128], index: 17, kind: input, shape index: {}]   ;;  %s5127_s18 = inlined_call_operand.vmem [shape: f32[1,128], index: 18, kind: input, shape index: {}]   ;;  %s5128_s19 = inlined_call_operand.hbm [shape: f32[2,8,128], index: 19, kind: output, shape index: {}]  }
   0x1   :  { %5140 = sst [smem:[#allocation23_spill]] %s5109_s0 }
   0x2   :  { %5141 = sst [smem:[#allocation24_spill]] %s5110_s1 }
   0x3   :  { %5142 = sst [smem:[#allocation25_spill]] %s5111_s2 }
   0x4   :  { %5143 = sst [smem:[#allocation26_spill]] %s5112_s3 }
   0x5   :  { %5144 = sst [smem:[#allocation27_spill]] %s5113_s4 }
   0x6   :  { %5145 = sst [smem:[#allocation28_spill]] %s5114_s5 }
   0x7   :  { %5146 = sst [smem:[#allocation29_spill]] %s5115_s6 }
   0x8   :  { %5147 = sst [smem:[#allocation30_spill]] %s5127_s18 }
   0x9   :  { %5148 = sst [smem:[#allocation31_spill]] %s5128_s19 }
   0xa   :  { %24 = vsyncpa [#allocation4], 0 }
   0xb   :  { %25 = vsyncpa [#allocation7], 0 }
   0xc   :  { %26 = vsyncpa [#allocation10], 0 }
   0xd   :  { %27 = vsyncpa [#allocation5], 0 }
   0xe   :  { %29 = vsyncpa [#allocation5 + $0x1], 0  ;;  %s4074_s0 = smov 0   ;;  %s4076_s30 = smov 0  }
   0xf   :  { %s4078_s20 = smov 0   ;;  %s4080_s21 = smov 0  }
  0x10 LB: > { %5149 = sst [smem:[#allocation16_spill]] %s3946_s0  ;;  %s4095_s1 = sadd.s32 4294967295, %s3958_s21   ;;  %s3958_s21 = sphi %s4080_s21, %s5197_s21   ;;  %s3954_s20 = sphi %s4078_s20, %s5199_s20   ;;  %s3950_s30 = sphi %s4076_s30, %s5201_s30   ;;  %s3946_s0 = sphi %s4074_s0, %s5200_s0  }
  0x11   : > { %5150 = sst [smem:[#allocation17_spill]] %s3954_s20  ;;  %s3345_s22 = sadd.s32 4294967294, %s3958_s21  }
  0x12   : > { %5151 = sst [smem:[#allocation18_spill]] %s3958_s21  ;;  %s4099_s2 = sadd.s32 1, %s3958_s21  }
  0x13   : > { %5152 = sst [smem:[#allocation19_spill]] %s4099_s2  ;;  %s446_s23 = sadd.s32 1, %s3954_s20 }
  0x14   : > { %s443_s24 = ssub.s32 %s3958_s21, %s4099_s2  ;;  %p456_p0 = scmp.ne.s32.totalorder %s3954_s20, %s3950_s30 }
  0x15   : > { %p444_p1 = scmp.eq.s32.totalorder %s443_s24, 0  ;;  %p457_p2 = scmp.eq.s32.totalorder %s4095_s1, 1 }
  0x16   : > { %p462_p3 = scmp.ne.s32.totalorder %s3950_s30, %s3946_s0  ;;  %p463_p4 = scmp.eq.s32.totalorder %s3345_s22, 1 }
  0x17   : > { %s4110_s25 = scalar_select %p444_p1, %s3954_s20, %s446_s23  }
  0x18   : > { %p4112_p5 = por %p457_p2, %p456_p0  ;;  %p4116_p6 = por %p463_p4, %p462_p3 }
  0x19   : > { %5153 = sst [smem:[#allocation20_spill]] %s4110_s25  ;;  %p3346_p7 = scmp.ge.s32.totalorder %s3958_s21, 1 }
  0x1a   : > { %s5154_s3 = scalar_select %p4112_p5, 1, 0 }
  0x1b   : > { %s5156_s26 = scalar_select %p4116_p6, 1, 0 }
  0x1c   : > { %5155 = sst [smem:[#allocation21_spill]] %s5154_s3  ;;  %p470_p8 = scmp.lt.s32.totalorder %s3958_s21, 3 }
  0x1d   : > { %5157 = sst [smem:[#allocation22_spill]] %s5156_s26  ;;  %p3596_p9 = scmp.eq.s32.totalorder %s4095_s1, 0 }
  0x1e   : > { %p4123_p10 = pnand %p3346_p7, %p470_p8  ;;  %s5159_s6 = sld [smem:[#allocation29_spill]] }
  0x1f   : > { %s5160_s5 = sld [smem:[#allocation28_spill]]  ;;  %s3960_s2 = smov [#allocation6]  }
  0x20   : > { %p3579_p11 = pneg %p4123_p10  ;;  %s509_s26 = sshll.u32 %s3960_s2, 4  ;;  %s510_s26 = int_to_ptr.vmem [resolvable:$true] %s509_s26 }
  0x21   : > { %s3961_s28 = smov 128   ;;  %s3962_s29 = smov 8  }
  0x22   : > { %p4137_p12 = pnand %p3596_p9, %p3579_p11  ;;  %s533_s0 = sshll.u32 %s5120_s11, 4  ;;  %s534_s0 = int_to_ptr.hbm [resolvable:$true] %s533_s0 }
  0x23   : > { %s562_s18 = sshll.u32 %s5126_s17, 4  ;;  %s3964_s3 = smov [#allocation8]   ;;  %s563_s18 = int_to_ptr.hbm [resolvable:$true] %s562_s18 }
  0x24   : > { %s507_s22 = sshll.u32 %s5159_s6, 4  ;;  %s3963_s6 = smov [#allocation3]   ;;  %s508_s22 = int_to_ptr.hbm [resolvable:$true] %s507_s22 }
  0x25   : > { %s493_s25 = sshll.u32 %s5160_s5, 4  ;;  %s495_s23 = sshll.u32 %s3963_s6, 4  ;;  %s494_s25 = int_to_ptr.hbm [resolvable:$true] %s493_s25  ;;  %s496_s23 = int_to_ptr.vmem [resolvable:$true] %s495_s23 }
  0x26   : > { %3585 = dma.hbm_to_vmem [thread:$0]  (!%p4137_p12), %s508_s22, 1536, %s510_s26, [#allocation7], %s3961_s28, %s3961_s28, %s3962_s29  }
  0x27   : > { %3582 = dma.hbm_to_vmem [thread:$0]  (!%p4137_p12), %s494_s25, 1536, %s496_s23, [#allocation4], %s3961_s28, %s3961_s28, %s3962_s29  }
  0x28   : > { %s535_s19 = sshll.u32 %s3964_s3, 4  ;;  %s3965_s26 = smov [#allocation9]   ;;  %s536_s19 = int_to_ptr.vmem [resolvable:$true] %s535_s19 }
  0x29   : > { %3588 = dma.hbm_to_vmem [thread:$0]  (!%p4137_p12), %s534_s0, 1536, %s536_s19, [#allocation7], %s3961_s28, %s3961_s28, %s3962_s29  }
  0x2a   : > { %s564_s6 = sshll.u32 %s3965_s26, 4  ;;  %590 = sbr.rel (%p4123_p10) target bundleno = 5152 (0x1420), region = 96  ;;  %s565_s6 = int_to_ptr.vmem [resolvable:$true] %s564_s6 }
  0x2b   : > { %3591 = dma.hbm_to_vmem [thread:$0]  (!%p4137_p12), %s563_s18, 512, %s565_s6, [#allocation10], %s3961_s28, %s3961_s28, %s3962_s29  }
  0x2f   : > { %3929 = dma.done.wait (%p3596_p9), [#allocation4], 1536  }
  0x30   : > { %3931 = vsyncadd (%p3596_p9), [#allocation4], 4294965760 }
  0x31   : > { %3933 = dma.done.wait (%p3596_p9), [#allocation7], 3072  }
  0x32   : > { %3935 = vsyncadd (%p3596_p9), [#allocation7], 4294964224 }
  0x33   : > { %3937 = dma.done.wait (%p3596_p9), [#allocation10], 512  }
  0x34   : > { %3939 = vsyncadd (%p3596_p9), [#allocation10], 4294966784  ;;  %p661_p13 = scmp.lt.s32.totalorder %s4095_s1, 1  ;;  %v3966_v0 = vmov 0   ;;  %s5162_s20 = sld [smem:[#allocation23_spill]]  ;;  %v666_v18 = vlaneseq  ;;  %v3967_v21 = vmov 1.0  }
  0x35   : > { %3651 = vset.pattern.permute.xlu0 %v3966_v0  ;;  %s5163_s27 = sld [smem:[#allocation24_spill]]  ;;  %vm715_vm1 = vcmask 261120   ;;  %v3968_v26 = vmov 32.0   ;;  %v756_v38 = vld [vmem:[#allocation3 + $0x18] sm:$0xff]  ;;  %v755_v40 = vld [vmem:[#allocation3 + $0x10] sm:$0xff]  ;;  %v754_v42 = vld [vmem:[#allocation3 + $0x8] sm:$0xff] }
  0x36   : > { %s662_s5 = scalar_select %p661_p13, %s4095_s1, 1  ;;  %v4223_v19 = vand.u32 127, %v666_v18  ;;  %3676 = vrcp.f32 %v3968_v26  ;;  %v783_v39 = vld [vmem:[#allocation6 + $0x18] sm:$0xff]  ;;  %772 = vmatpush.msra.mxu1 %v756_v38  ;;  %v782_v41 = vld [vmem:[#allocation6 + $0x10] sm:$0xff]  ;;  %v781_v43 = vld [vmem:[#allocation6 + $0x8] sm:$0xff]  ;;  %vm954_vm6 = vcmask 64512  }
  0x37   : > { %s5164_s22 = sld [smem:[#allocation25_spill]]  ;;  %796 = vmatpush.msra.mxu2 %v783_v39  ;;  %v753_v44 = vld [vmem:[#allocation3] sm:$0xff]  ;;  %v807_v46 = vld [vmem:[%s5116_s7 + $0x18] sm:$0xff]  ;;  %v806_v48 = vld [vmem:[%s5116_s7 + $0x10] sm:$0xff]  ;;  %s3971_s19 = smov 88   ;;  %v712_v39 = vshrl.u32 %v666_v18, 7 }
  0x38   : > { %s3358_s18 = sshll.u32 %s662_s5, 3  ;;  %773 = vmatpush.msra.mxu1 %v755_v40  ;;  %v780_v45 = vld [vmem:[#allocation6] sm:$0xff]  ;;  %v3372_v47 = vld [vmem:[%s5116_s7 + $0x58] sm:$0xff]  ;;  %v3371_v49 = vld [vmem:[%s5116_s7 + $0x50] sm:$0xff]  ;;  %s5165_s23 = sld [smem:[#allocation26_spill]] }
  0x39   : > { %797 = vmatpush.msra.mxu2 %v782_v41  ;;  %v805_v50 = vld [vmem:[%s5116_s7 + $0x8] sm:$0xff]  ;;  %v804_v54 = vld [vmem:[%s5116_s7] sm:$0xff]  ;;  %s5166_s4 = sld [smem:[#allocation27_spill]]  ;;  %s3969_s5 = smov 120   ;;  %vm4347_vm7 = vcmp.le.s32.totalorder %v4223_v19, %v712_v39 }
  0x3a   : > { %s664_s21 = scalar_lea.vmem %s5162_s20, %s3358_s18  ;;  %774 = vmatpush.msra.mxu1 %v754_v42  ;;  %v3370_v51 = vld [vmem:[%s5116_s7 + $0x48] sm:$0xff]  ;;  %v3369_v55 = vld [vmem:[%s5116_s7 + $0x40] sm:$0xff]  ;;  %s3970_s18 = smov 104  }
  0x3b   : > { %v665_v1 = vld [vmem:[%s664_s21] sm:$0xff]  ;;  %v689_v2 = vld [vmem:[%s5163_s27 + $0x78] sm:$0xff]  ;;  %v688_v3 = vld [vmem:[%s5163_s27 + $0x70] sm:$0xff]  ;;  %798 = vmatpush.msra.mxu2 %v781_v43  ;;  %s3972_s0 = smov 96   ;;  %s3973_s20 = smov 112  }
  0x3c   : > { %669 = vperm.xlu0 %3651, %v665_v1   ;;  %691 = vmatpush.msra.mxu0 %v689_v2  ;;  %v687_v4 = vld [vmem:[%s5163_s27 + $0x68] sm:$0xff]  ;;  %v686_v5 = vld [vmem:[%s5163_s27 + $0x60] sm:$0xff]  ;;  %v685_v6 = vld [vmem:[%s5163_s27 + $0x58] sm:$0xff]  ;;  %v3677_v27 = vpop.eup %3676  ;;  %s5191_s6 = sld [smem:[#allocation31_spill]] }
  0x3d   : > { %v684_v7 = vld [vmem:[%s5163_s27 + $0x50] sm:$0xff]  ;;  %v683_v8 = vld [vmem:[%s5163_s27 + $0x48] sm:$0xff]  ;;  %v682_v9 = vld [vmem:[%s5163_s27 + $0x40] sm:$0xff]  ;;  %v720_v28 = vmul.f32 32.0, %v3677_v27  ;;  %vm724_vm2 = vweird.f32 %v3677_v27  ;;  %775 = vmatpush.msra.mxu1 %v753_v44  ;;  %799 = vmatpush.msra.mxu2 %v780_v45  ;;  %s5193_s28 = sld [smem:[#allocation30_spill]] }
  0x3e   : > { %692 = vmatpush.msra.mxu0 %v688_v3  ;;  %v681_v10 = vld [vmem:[%s5163_s27 + $0x38] sm:$0xff]  ;;  %v680_v11 = vld [vmem:[%s5163_s27 + $0x30] sm:$0xff]  ;;  %v679_v12 = vld [vmem:[%s5163_s27 + $0x28] sm:$0xff] }
  0x3f   : > { %v678_v13 = vld [vmem:[%s5163_s27 + $0x20] sm:$0xff]  ;;  %v677_v14 = vld [vmem:[%s5163_s27 + $0x18] sm:$0xff]  ;;  %v676_v15 = vld [vmem:[%s5163_s27 + $0x10] sm:$0xff]  ;;  %v721_v29 = vsub.f32 1.0, %v720_v28  ;;  %820 = vmatpush.msrb.mxu1 %v807_v46  ;;  %870 = vmatpush.msrb.mxu2 %v3372_v47 }
  0x40   : > { %693 = vmatpush.msra.mxu0 %v687_v4  ;;  %v675_v16 = vld [vmem:[%s5163_s27 + $0x8] sm:$0xff]  ;;  %v674_v17 = vld [vmem:[%s5163_s27] sm:$0xff] }
  0x41   : > { %v690_v22 = vld [vmem:[%s5164_s22] sm:$0xff]  ;;  %v722_v30 = vmul.f32 %v3677_v27, %v721_v29  ;;  %821 = vmatpush.msrb.mxu1 %v806_v48  ;;  %871 = vmatpush.msrb.mxu2 %v3371_v49 }
  0x42   : > { %694 = vmatpush.msra.mxu0 %v686_v5  ;;  %v3652_v63 = vld [vmem:[%s5165_s23] ss:$0 sm:$0xff]  ;;  %v3367_v5 = vld [vmem:[%s5116_s7 + $0x38] sm:$0xff]  ;;  %s3904_s26 = scalar_lea.hbm %s5191_s6, 16 }
  0x43   : > { %v723_v31 = vadd.f32 %v3677_v27, %v722_v30  ;;  %822 = vmatpush.msrb.mxu1 %v805_v50  ;;  %872 = vmatpush.msrb.mxu2 %v3370_v51  ;;  %v3653_v1 = vld [vmem:[%s5166_s4] ss:$0 sm:$0xff] }
  0x44   : > { %695 = vmatpush.msra.mxu0 %v685_v6  ;;  %v3377_v6 = vld [vmem:[%s5116_s7 + $0x78] sm:$0xff] }
  0x45   : > { %v4233_v32 = vsel %vm724_vm2, %v3677_v27, %v723_v31  ;;  %823 = vmatpush.msrb.mxu1 %v804_v54  ;;  %873 = vmatpush.msrb.mxu2 %v3369_v55 }
  0x46   : > { %696 = vmatpush.msra.mxu0 %v684_v7  ;;  %v3366_v7 = vld [vmem:[%s5116_s7 + $0x30] sm:$0xff] }
  0x48   : > { %697 = vmatpush.msra.mxu0 %v683_v8  ;;  %v3376_v8 = vld [vmem:[%s5116_s7 + $0x70] sm:$0xff] }
  0x4a   : > { %698 = vmatpush.msra.mxu0 %v682_v9  ;;  %v3365_v9 = vld [vmem:[%s5116_s7 + $0x28] sm:$0xff] }
  0x4c   : > { %699 = vmatpush.msra.mxu0 %v681_v10  ;;  %v3375_v10 = vld [vmem:[%s5116_s7 + $0x68] sm:$0xff] }
  0x4e   : > { %700 = vmatpush.msra.mxu0 %v680_v11  ;;  %v3364_v11 = vld [vmem:[%s5116_s7 + $0x20] sm:$0xff] }
  0x50   : > { %701 = vmatpush.msra.mxu0 %v679_v12  ;;  %v3374_v12 = vld [vmem:[%s5116_s7 + $0x60] sm:$0xff] }
  0x52   : > { %702 = vmatpush.msra.mxu0 %v678_v13  ;;  %v3382_v13 = vld [vmem:[%s5116_s7 + $0x98] sm:$0xff] }
  0x54   : > { %703 = vmatpush.msra.mxu0 %v677_v14  ;;  %v3387_v14 = vld [vmem:[%s5116_s7 + $0xb8] sm:$0xff] }
  0x56   : > { %704 = vmatpush.msra.mxu0 %v676_v15  ;;  %v3381_v15 = vld [vmem:[%s5116_s7 + $0x90] sm:$0xff] }
  0x58   : > { %705 = vmatpush.msra.mxu0 %v675_v16  ;;  %v3386_v16 = vld [vmem:[%s5116_s7 + $0xb0] sm:$0xff] }
  0x5a   : > { %706 = vmatpush.msra.mxu0 %v674_v17  ;;  %v3380_v17 = vld [vmem:[%s5116_s7 + $0x88] sm:$0xff] }
  0xae   : > { %v670_v20 = vpop.permute.xlu0 %669 }
  0xaf   : > { %vm671_vm0 = vcmp.eq.s32.totalorder %v670_v20, %v4223_v19  ;;  %v3385_v20 = vld [vmem:[%s5116_s7 + $0xa8] sm:$0xff] }
  0xb0   : > { %3360 = vmatmul.msk.f32.vlgmr.msra.gmra.mxu0 %vm671_vm0, %v3967_v21  ;;  %v3379_v21 = vld [vmem:[%s5116_s7 + $0x80] sm:$0xff] }
 0x12d   : > { %v708_v23 = vpop.f32.mrf.mxu0 }
 0x12e   : > { %v4229_v24 = vadd.f32 %v708_v23, %v690_v22  ;;  %v3384_v22 = vld [vmem:[%s5116_s7 + $0xa0] sm:$0xff] }
 0x130   : > { %v716_v25 = vsel %vm715_vm1, %v4229_v24, 0.0 }
 0x131   : > { %717 = vadd.xlane.f32.xlu0 %v716_v25 }
 0x1a4   : > { %v718_v33 = vpop.xlane.xlu0 %717 }
 0x1a5   : > { %v726_v34 = vmul.f32 %v4233_v32, %v718_v33 }
 0x1a7   : > { %v727_v35 = vsub.f32 %v4229_v24, %v726_v34 }
 0x1a9   : > { %v728_v36 = vmul.f32 %v727_v35, %v727_v35 }
 0x1ab   : > { %v729_v37 = vsel %vm715_vm1, %v728_v36, 0.0 }
 0x1ac   : > { %730 = vadd.xlane.f32.xlu1 %v729_v37 }
 0x21f   : > { %v731_v52 = vpop.xlane.xlu1 %730 }
 0x220   : > { %v732_v53 = vmul.f32 %v731_v52, %v4233_v32 }
 0x222   : > { %v733_v56 = vadd.f32 1e-05, %v732_v53 }
 0x224   : > { %3678 = vrsqrt.f32 %v733_v56  ;;  %vm740_vm4 = vweird.f32 %v733_v56 }
 0x22a   : > { %v3679_v57 = vpop.eup %3678 }
 0x22b   : > { %v735_v58 = vmul.f32 %v3679_v57, %v733_v56  ;;  %vm741_vm3 = vweird.f32 %v3679_v57 }
 0x22c   : > { %vm742_vm5 = vmor %vm740_vm4, %vm741_vm3 }
 0x22d   : > { %v736_v59 = vmul.f32 %v3679_v57, %v735_v58 }
 0x22f   : > { %v737_v60 = vmul.f32 0.5, %v736_v59 }
 0x231   : > { %v738_v61 = vsub.f32 1.5, %v737_v60 }
 0x233   : > { %v739_v62 = vmul.f32 %v3679_v57, %v738_v61 }
 0x235   : > { %v743_v0 = vsel %vm742_vm5, %v3679_v57, %v739_v62 }
 0x236   : > { %v744_v2 = vmul.f32 %v743_v0, %v727_v35 }
 0x238   : > { %v748_v3 = vmul.f32 %v3652_v63, %v744_v2 }
 0x23a   : > { %v752_v4 = vadd.f32 %v3653_v1, %v748_v3 }
 0x23c   : > { %3361 = vmatmul.msk.f32.vlgmr.msra.gmra.mxu1 %vm715_vm1, %v752_v4  ;;  %3362 = vmatmul.msk.f32.vlgmr.msra.gmra.mxu2 %vm715_vm1, %v752_v4 }
 0x23d   : > { %845 = vmatpush.msra.mxu1 %v3367_v5  ;;  %895 = vmatpush.msra.mxu2 %v3377_v6 }
 0x23f   : > { %846 = vmatpush.msra.mxu1 %v3366_v7  ;;  %896 = vmatpush.msra.mxu2 %v3376_v8 }
 0x241   : > { %847 = vmatpush.msra.mxu1 %v3365_v9  ;;  %897 = vmatpush.msra.mxu2 %v3375_v10 }
 0x243   : > { %848 = vmatpush.msra.mxu1 %v3364_v11  ;;  %898 = vmatpush.msra.mxu2 %v3374_v12 }
 0x244   : > { %3363 = vmatmul.msk.f32.vlgmr.msrb.gmra.mxu1 %vm715_vm1, %v752_v4  ;;  %3373 = vmatmul.msk.f32.vlgmr.msrb.gmra.mxu2 %vm715_vm1, %v752_v4 }
 0x245   : > { %920 = vmatpush.msrb.mxu1 %v3382_v13  ;;  %945 = vmatpush.msrb.mxu2 %v3387_v14 }
 0x247   : > { %921 = vmatpush.msrb.mxu1 %v3381_v15  ;;  %946 = vmatpush.msrb.mxu2 %v3386_v16 }
 0x249   : > { %922 = vmatpush.msrb.mxu1 %v3380_v17  ;;  %947 = vmatpush.msrb.mxu2 %v3385_v20 }
 0x24b   : > { %923 = vmatpush.msrb.mxu1 %v3379_v21  ;;  %948 = vmatpush.msrb.mxu2 %v3384_v22 }
 0x24c   : > { %3368 = vmatmul.msk.f32.vlgmr.msra.gmra.mxu1 %vm715_vm1, %v752_v4  ;;  %3378 = vmatmul.msk.f32.vlgmr.msra.gmra.mxu2 %vm715_vm1, %v752_v4 }
 0x254   : > { %3383 = vmatmul.msk.f32.vlgmr.msrb.gmra.mxu1 %vm715_vm1, %v752_v4  ;;  %3388 = vmatmul.msk.f32.vlgmr.msrb.gmra.mxu2 %vm715_vm1, %v752_v4 }
 0x2b9   : > { %v777_v23 = vpop.f32.mrf.mxu1 }
 0x2ba   : > { %1030 = vrot.lane.b32.xlu2 %v777_v23, %s3969_s5 }
 0x2bf   : > { %v801_v25 = vpop.f32.mrf.mxu2 }
 0x2c0   : > { %1032 = vrot.lane.b32.xlu1 %v801_v25, %s3969_s5  ;;  %3389 = vmatpush.xpose.msk.msra.mxu3 %vm954_vm6, %v801_v25 }
 0x2c1   : > { %v825_v26 = vpop.f32.mrf.mxu1 }
 0x2c2   : > { %1184 = vrot.lane.b32.xlu2 %v777_v23, %s3970_s18  ;;  %1009 = vmatpush.msra.mxu1 %v825_v26 }
 0x2c3   : > { %3390 = vmatmul.msk.f32.vlgmr.msra.gmra.mxu3 %vm954_vm6, %v777_v23 }
 0x2c7   : > { %v875_v27 = vpop.f32.mrf.mxu2 }
 0x2c8   : > { %1338 = vrot.lane.b32.xlu1 %v777_v23, %s3971_s19  ;;  %1163 = vmatpush.msrb.mxu1 %v875_v27 }
 0x2c9   : > { %v850_v28 = vpop.f32.mrf.mxu1 }
 0x2ca   : > { %1186 = vrot.lane.b32.xlu2 %v801_v25, %s3970_s18  ;;  %1086 = vmatpush.msrb.mxu3 %v850_v28 }
 0x2cf   : > { %v900_v29 = vpop.f32.mrf.mxu2 }
 0x2d0   : > { %1263 = vrot.lane.b32.xlu1 %v801_v25, %s3972_s0  ;;  %1240 = vmatpush.msra.mxu3 %v900_v29 }
 0x2d1   : > { %v925_v58 = vpop.f32.mrf.mxu1 }
 0x2d2   : > { %1340 = vrot.lane.b32.xlu2 %v801_v25, %s3971_s19 }
 0x2d7   : > { %v950_v18 = vpop.f32.mrf.mxu2 }
 0x2da   : > { %1109 = vrot.lane.b32.xlu2 %v801_v25, %s3973_s20 }
 0x2e2   : > { %1107 = vrot.lane.b32.xlu2 %v777_v23, %s3973_s20 }
 0x2ea   : > { %1261 = vrot.lane.b32.xlu2 %v777_v23, %s3972_s0 }
 0x314   : > { %v1031_v30 = vpop.permute.xlu2 %1030 }
 0x31c   : > { %v1185_v31 = vpop.permute.xlu2 %1184 }
 0x324   : > { %v1187_v33 = vpop.permute.xlu2 %1186 }
 0x32c   : > { %v1341_v34 = vpop.permute.xlu2 %1340 }
 0x332   : > { %v1033_v35 = vpop.permute.xlu1 %1032 }
 0x333   : > { %3392 = vmatpush.xpose.msk.msra.mxu2 %vm954_vm6, %v1033_v35 }
 0x334   : > { %v1110_v36 = vpop.permute.xlu2 %1109 }
 0x335   : > { %3395 = vmatpush.xpose.msk.msrb.mxu0 %vm954_vm6, %v1110_v36 }
 0x336   : > { %3393 = vmatmul.msk.f32.vlgmr.msra.gmra.mxu2 %vm954_vm6, %v1031_v30 }
 0x337   : > { %3398 = vmatpush.xpose.msk.msrb.mxu2 %vm954_vm6, %v1187_v33 }
 0x33a   : > { %v1339_v37 = vpop.permute.xlu1 %1338 }
 0x33b   : > { %3404 = vmatpush.xpose.msk.msra.mxu2 %vm954_vm6, %v1341_v34 }
 0x33c   : > { %v1108_v38 = vpop.permute.xlu2 %1107 }
 0x33d   : > { %3396 = vmatmul.msk.f32.vlgmr.msrb.gmra.mxu0 %vm954_vm6, %v1108_v38 }
 0x33e   : > { %3399 = vmatmul.msk.f32.vlgmr.msrb.gmra.mxu2 %vm954_vm6, %v1185_v31 }
 0x342   : > { %v1264_v40 = vpop.permute.xlu1 %1263 }
 0x343   : > { %3401 = vmatpush.xpose.msk.msra.mxu0 %vm954_vm6, %v1264_v40 }
 0x344   : > { %v1262_v42 = vpop.permute.xlu2 %1261 }
 0x346   : > { %v978_v43 = vpop.f32.mrf.mxu3  ;;  %3402 = vmatmul.msk.f32.vlgmr.msra.gmra.mxu0 %vm954_vm6, %v1262_v42  ;;  %3405 = vmatmul.msk.f32.vlgmr.msra.gmra.mxu2 %vm954_vm6, %v1339_v37 }
 0x347   : > { %v981_v44 = vsel %vm4347_vm7, %v978_v43, -1e+30 }
 0x348   : > { %v982_v45 = vsel %vm954_vm6, %v981_v44, -inf }
 0x349   : > { %983 = vmax.xlane.f32.xlu0 %v982_v45 }
 0x3b9   : > { %v1055_v46 = vpop.f32.mrf.mxu2 }
 0x3ba   : > { %v1058_v19 = vsel %vm4347_vm7, %v1055_v46, -1e+30  ;;  %v1132_v47 = vpop.f32.mrf.mxu0 }
 0x3bb   : > { %v1135_v48 = vsel %vm4347_vm7, %v1132_v47, -1e+30  ;;  %v1059_v49 = vsel %vm954_vm6, %v1058_v19, -inf }
 0x3bc   : > { %1060 = vmax.xlane.f32.xlu1 %v1059_v49  ;;  %v984_v50 = vpop.xlane.xlu0 %983  ;;  %v1136_v51 = vsel %vm954_vm6, %v1135_v48, -inf }
 0x3bd   : > { %v985_v52 = vsub.f32 %v981_v44, %v984_v50  ;;  %1137 = vmax.xlane.f32.xlu0 %v1136_v51 }
 0x3bf   : > { %v986_v53 = vmul.f32 1.442695, %v985_v52 }
 0x3c1   : > { %3680 = vpow2.f32 %v986_v53  ;;  %v1209_v54 = vpop.f32.mrf.mxu2 }
 0x3c2   : > { %v1212_v55 = vsel %vm4347_vm7, %v1209_v54, -1e+30 }
 0x3c3   : > { %v1213_v56 = vsel %vm954_vm6, %v1212_v55, -inf  ;;  %v1286_v62 = vpop.f32.mrf.mxu0 }
 0x3c4   : > { %1214 = vmax.xlane.f32.xlu2 %v1213_v56  ;;  %v1289_v63 = vsel %vm4347_vm7, %v1286_v62, -1e+30 }
 0x3c5   : > { %v1290_v0 = vsel %vm954_vm6, %v1289_v63, -inf }
 0x3c7   : > { %v3681_v57 = vpop.eup %3680 }
 0x3c8   : > { %3391 = vmatmul.msk.f32.vlgmr.msra.gmra.mxu1 %vm954_vm6, %v3681_v57  ;;  %v988_v1 = vsel %vm954_vm6, %v3681_v57, 0.0 }
 0x3c9   : > { %1317 = vmatpush.msra.mxu1 %v925_v58  ;;  %v1363_v59 = vpop.f32.mrf.mxu2 }
 0x3ca   : > { %v1366_v60 = vsel %vm4347_vm7, %v1363_v59, -1e+30 }
 0x3cb   : > { %v1367_v61 = vsel %vm954_vm6, %v1366_v60, -inf }
 0x3cc   : > { %1368 = vmax.xlane.f32.xlu0 %v1367_v61 }
 0x3d4   : > { %1291 = vmax.xlane.f32.xlu0 %v1290_v0 }
 0x3dc   : > { %989 = vadd.xlane.f32.xlu0 %v988_v1 }
 0x42f   : > { %v1061_v2 = vpop.xlane.xlu1 %1060 }
 0x430   : > { %v1062_v3 = vsub.f32 %v1058_v19, %v1061_v2  ;;  %v1138_v4 = vpop.xlane.xlu0 %1137 }
 0x431   : > { %v1139_v5 = vsub.f32 %v1135_v48, %v1138_v4 }
 0x432   : > { %v1063_v6 = vmul.f32 1.442695, %v1062_v3 }
 0x433   : > { %v1140_v7 = vmul.f32 1.442695, %v1139_v5 }
 0x434   : > { %3682 = vpow2.f32 %v1063_v6 }
 0x435   : > { %3684 = vpow2.f32 %v1140_v7 }
 0x437   : > { %v1215_v8 = vpop.xlane.xlu2 %1214 }
 0x438   : > { %v1216_v9 = vsub.f32 %v1212_v55, %v1215_v8 }
 0x43a   : > { %v3683_v10 = vpop.eup %3682  ;;  %v1217_v11 = vmul.f32 1.442695, %v1216_v9 }
 0x43b   : > { %v3685_v12 = vpop.eup %3684  ;;  %3394 = vmatmul.msk.f32.vlgmr.msrb.gmra.mxu3 %vm954_vm6, %v3683_v10  ;;  %v1065_v13 = vsel %vm954_vm6, %v3683_v10, 0.0 }
 0x43c   : > { %3686 = vpow2.f32 %v1217_v11  ;;  %1394 = vmatpush.msrb.mxu3 %v950_v18  ;;  %1066 = vadd.xlane.f32.xlu0 %v1065_v13  ;;  %v1142_v14 = vsel %vm954_vm6, %v3685_v12, 0.0 }
 0x43d   : > { %3397 = vmatmul.msk.f32.vlgmr.msrb.gmra.mxu1 %vm954_vm6, %v3685_v12  ;;  %1143 = vadd.xlane.f32.xlu1 %v1142_v14 }
 0x43f   : > { %v1369_v15 = vpop.xlane.xlu0 %1368 }
 0x440   : > { %v1370_v16 = vsub.f32 %v1366_v60, %v1369_v15 }
 0x442   : > { %v3687_v17 = vpop.eup %3686  ;;  %v1371_v20 = vmul.f32 1.442695, %v1370_v16 }
 0x443   : > { %3400 = vmatmul.msk.f32.vlgmr.msra.gmra.mxu3 %vm954_vm6, %v3687_v17  ;;  %v1219_v21 = vsel %vm954_vm6, %v3687_v17, 0.0 }
 0x444   : > { %3688 = vpow2.f32 %v1371_v20  ;;  %1220 = vadd.xlane.f32.xlu2 %v1219_v21 }
 0x445   : > { %v1011_v61 = vpop.f32.mrf.mxu1 }
 0x447   : > { %v1292_v22 = vpop.xlane.xlu0 %1291 }
 0x448   : > { %v1293_v23 = vsub.f32 %v1289_v63, %v1292_v22 }
 0x44a   : > { %v3689_v25 = vpop.eup %3688  ;;  %v1294_v26 = vmul.f32 1.442695, %v1293_v23 }
 0x44b   : > { %3406 = vmatmul.msk.f32.vlgmr.msrb.gmra.mxu3 %vm954_vm6, %v3689_v25  ;;  %v1373_v27 = vsel %vm954_vm6, %v3689_v25, 0.0 }
 0x44c   : > { %3690 = vpow2.f32 %v1294_v26  ;;  %1374 = vadd.xlane.f32.xlu1 %v1373_v27 }
 0x44f   : > { %v990_v30 = vpop.xlane.xlu0 %989 }
 0x450   : > { %v1025_v50 = vand.u32 2147483648, %v990_v30  ;;  %v1023_v54 = vand.u32 2147483647, %v990_v30  ;;  %vm1019_vm11 = vweird.f32 %v990_v30 }
 0x452   : > { %v3691_v28 = vpop.eup %3690  ;;  %v1026_v1 = vor.u32 1.1754944e-38, %v1025_v50  ;;  %vm1024_vm2 = vcmp.eq.f32.partialorder %v1023_v54, 8.507059e+37 }
 0x453   : > { %3403 = vmatmul.msk.f32.vlgmr.msra.gmra.mxu1 %vm954_vm6, %v3691_v28  ;;  %v1296_v29 = vsel %vm954_vm6, %v3691_v28, 0.0 }
 0x454   : > { %1297 = vadd.xlane.f32.xlu0 %v1296_v29 }
 0x4af   : > { %v1067_v31 = vpop.xlane.xlu0 %1066 }
 0x4b0   : > { %3692 = vrcp.f32 %v1067_v31  ;;  %v4383_v33 = vpop.xlane.xlu1 %1143  ;;  %v1102_v56 = vand.u32 2147483648, %v1067_v31  ;;  %vm1096_vm10 = vweird.f32 %v1067_v31  ;;  %v1100_v57 = vand.u32 2147483647, %v1067_v31 }
 0x4b1   : > { %3694 = vrcp.f32 %v990_v30  ;;  %v1179_v2 = vand.u32 2147483648, %v4383_v33  ;;  %vm1173_vm15 = vweird.f32 %v4383_v33  ;;  %v1177_v5 = vand.u32 2147483647, %v4383_v33 }
 0x4b2   : > { %3696 = vrcp.f32 %v4383_v33  ;;  %v1103_v7 = vor.u32 1.1754944e-38, %v1102_v56  ;;  %vm1101_vm3 = vcmp.eq.f32.partialorder %v1100_v57, 8.507059e+37 }
 0x4b3   : > { %v1180_v14 = vor.u32 1.1754944e-38, %v1179_v2  ;;  %v1458_v2 = vld [vmem:[#allocation8 + $0x18] sm:$0xff] }
 0x4b4   : > { %1478 = vmatpush.msrb.mxu0 %v1458_v2  ;;  %v3425_v2 = vld [vmem:[%s5116_s7 + $0x118] sm:$0xff] }
 0x4b6   : > { %v3693_v34 = vpop.eup %3692 }
 0x4b7   : > { %v3695_v35 = vpop.eup %3694  ;;  %v4386_v36 = vpop.xlane.xlu2 %1220  ;;  %v1092_v38 = vmul.f32 %v3693_v34, %v1067_v31  ;;  %vm1097_vm8 = vweird.f32 %v3693_v34 }
 0x4b8   : > { %3698 = vrcp.f32 %v4386_v36  ;;  %v3697_v37 = vpop.eup %3696  ;;  %v1015_v39 = vmul.f32 %v3695_v35, %v990_v30  ;;  %vm1020_vm9 = vweird.f32 %v3695_v35  ;;  %vm4405_vm13 = vmor %vm1096_vm10, %vm1097_vm8  ;;  %v1254_v12 = vand.u32 2147483647, %v4386_v36 }
 0x4b9   : > { %v1169_v40 = vmul.f32 %v3697_v37, %v4383_v33  ;;  %v1093_v42 = vsub.f32 1.0, %v1092_v38  ;;  %vm1174_vm12 = vweird.f32 %v3697_v37  ;;  %vm4411_vm14 = vmor %vm1019_vm11, %vm1020_vm9  ;;  %v1256_v13 = vand.u32 2147483648, %v4386_v36 }
 0x4ba   : > { %v1016_v44 = vsub.f32 1.0, %v1015_v39  ;;  %vm4422_vm0 = vmor %vm1173_vm15, %vm1174_vm12  ;;  %vm1250_vm5 = vweird.f32 %v4386_v36  ;;  %vm1178_vm8 = vcmp.eq.f32.partialorder %v1177_v5, 8.507059e+37  ;;  %v1165_v26 = vpop.f32.mrf.mxu1  ;;  %vm1255_vm10 = vcmp.eq.f32.partialorder %v1254_v12, 8.507059e+37  ;;  %v1502_v5 = vld [vmem:[%s5122_s13 + $0x78] sm:$0xff] }
 0x4bb   : > { %v1170_v46 = vsub.f32 1.0, %v1169_v40  ;;  %v1094_v19 = vmul.f32 %v3693_v34, %v1093_v42  ;;  %v1257_v29 = vor.u32 1.1754944e-38, %v1256_v13  ;;  %1503 = vmatpush.msrb.mxu1 %v1502_v5  ;;  %v1498_v12 = vld [vmem:[%s5122_s13 + $0x58] sm:$0xff]  ;;  %v1497_v13 = vld [vmem:[%s5122_s13 + $0x50] sm:$0xff] }
 0x4bc   : > { %v1017_v47 = vmul.f32 %v3695_v35, %v1016_v44  ;;  %v3429_v5 = vld [vmem:[%s5116_s7 + $0x130] sm:$0xff] }
 0x4bd   : > { %v1171_v49 = vmul.f32 %v3697_v37, %v1170_v46  ;;  %v1095_v51 = vadd.f32 %v3693_v34, %v1094_v19 }
 0x4be   : > { %v4390_v43 = vpop.eup %3698  ;;  %v1018_v53 = vadd.f32 %v3695_v35, %v1017_v47  ;;  %v1088_v55 = vpop.f32.mrf.mxu3 }
 0x4bf   : > { %v1246_v45 = vmul.f32 %v4390_v43, %v4386_v36  ;;  %v4394_v18 = vpop.xlane.xlu1 %1374  ;;  %v1172_v62 = vadd.f32 %v3697_v37, %v1171_v49  ;;  %v1099_v3 = vsel %vm4405_vm13, %v3693_v34, %v1095_v51  ;;  %vm1251_vm4 = vweird.f32 %v4390_v43 }
 0x4c0   : > { %3700 = vrcp.f32 %v4394_v18  ;;  %v1022_v6 = vsel %vm4411_vm14, %v3695_v35, %v1018_v53  ;;  %v1104_v11 = vsel %vm1101_vm3, %v1103_v7, %v1099_v3  ;;  %vm4434_vm9 = vmor %vm1250_vm5, %vm1251_vm4  ;;  %vm1404_vm11 = vweird.f32 %v4394_v18  ;;  %v1457_v3 = vld [vmem:[#allocation8 + $0x10] sm:$0xff]  ;;  %v1500_v7 = vld [vmem:[%s5122_s13 + $0x68] sm:$0xff] }
 0x4c1   : > { %v1247_v48 = vsub.f32 1.0, %v1246_v45  ;;  %v1176_v10 = vsel %vm4422_vm0, %v3697_v37, %v1172_v62  ;;  %v1027_v15 = vsel %vm1024_vm2, %v1026_v1, %v1022_v6  ;;  %v1105_v22 = vmul.f32 %v1104_v11, %v1088_v55  ;;  %1479 = vmatpush.msrb.mxu0 %v1457_v3  ;;  %v1501_v6 = vld [vmem:[%s5122_s13 + $0x70] sm:$0xff]  ;;  %v3430_v3 = vld [vmem:[%s5116_s7 + $0x138] sm:$0xff] }
 0x4c2   : > { %v1181_v21 = vsel %vm1178_vm8, %v1180_v14, %v1176_v10  ;;  %v1028_v27 = vmul.f32 %v1027_v15, %v1011_v61  ;;  %v1408_v33 = vand.u32 2147483647, %v4394_v18  ;;  %v1410_v36 = vand.u32 2147483648, %v4394_v18  ;;  %1504 = vmatpush.msrb.mxu1 %v1501_v6  ;;  %v1499_v10 = vld [vmem:[%s5122_s13 + $0x60] sm:$0xff]  ;;  %v1496_v14 = vld [vmem:[%s5122_s13 + $0x48] sm:$0xff] }
 0x4c3   : > { %v1248_v59 = vmul.f32 %v4390_v43, %v1247_v48  ;;  %v1182_v34 = vmul.f32 %v1181_v21, %v1165_v26  ;;  %v1495_v15 = vld [vmem:[%s5122_s13 + $0x40] sm:$0xff]  ;;  %v1493_v21 = vld [vmem:[%s5122_s13 + $0x30] sm:$0xff] }
 0x4c4   : > { %v1106_v38 = vadd.f32 %v1105_v22, %v1028_v27  ;;  %v1411_v45 = vor.u32 1.1754944e-38, %v1410_v36  ;;  %vm1409_vm2 = vcmp.eq.f32.partialorder %v1408_v33, 8.507059e+37  ;;  %1505 = vmatpush.msrb.mxu1 %v1500_v7  ;;  %v1491_v26 = vld [vmem:[%s5122_s13 + $0x20] sm:$0xff]  ;;  %v3418_v7 = vld [vmem:[%s5116_s7 + $0xe8] sm:$0xff] }
 0x4c5   : > { %v1249_v9 = vadd.f32 %v4390_v43, %v1248_v59 }
 0x4c6   : > { %v4397_v52 = vpop.eup %3700  ;;  %v1242_v28 = vpop.f32.mrf.mxu3  ;;  %v1183_v19 = vadd.f32 %v1182_v34, %v1106_v38  ;;  %1506 = vmatpush.msrb.mxu1 %v1499_v10  ;;  %v3656_v34 = vld [vmem:[%s5119_s10] ss:$0 sm:$0xff]  ;;  %v1488_v38 = vld [vmem:[%s5122_s13 + $0x8] sm:$0xff] }
 0x4c7   : > { %v1400_v58 = vmul.f32 %v4397_v52, %v4394_v18  ;;  %v4402_v60 = vpop.xlane.xlu0 %1297  ;;  %v1253_v23 = vsel %vm4434_vm9, %v4390_v43, %v1249_v9  ;;  %vm1405_vm12 = vweird.f32 %v4397_v52  ;;  %v3428_v10 = vld [vmem:[%s5116_s7 + $0x128] sm:$0xff] }
 0x4c8   : > { %3702 = vrcp.f32 %v4402_v60  ;;  %v1258_v35 = vsel %vm1255_vm10, %v1257_v29, %v1253_v23  ;;  %v1333_v37 = vand.u32 2147483648, %v4402_v60  ;;  %v1331_v40 = vand.u32 2147483647, %v4402_v60  ;;  %vm1406_vm14 = vmor %vm1404_vm11, %vm1405_vm12  ;;  %1507 = vmatpush.msrb.mxu1 %v1498_v12  ;;  %v1492_v23 = vld [vmem:[%s5122_s13 + $0x28] sm:$0xff] }
 0x4c9   : > { %v1401_v4 = vsub.f32 1.0, %v1400_v58  ;;  %v1259_v42 = vmul.f32 %v1258_v35, %v1242_v28  ;;  %vm1327_vm15 = vweird.f32 %v4402_v60  ;;  %v1490_v28 = vld [vmem:[%s5122_s13 + $0x18] sm:$0xff] }
 0x4ca   : > { %v1334_v46 = vor.u32 1.1754944e-38, %v1333_v37  ;;  %vm1332_vm3 = vcmp.eq.f32.partialorder %v1331_v40, 8.507059e+37  ;;  %1508 = vmatpush.msrb.mxu1 %v1497_v13  ;;  %v1489_v37 = vld [vmem:[%s5122_s13 + $0x10] sm:$0xff]  ;;  %v3657_v40 = vld [vmem:[%s5121_s12] ss:$0 sm:$0xff] }
 0x4cb   : > { %v1402_v16 = vmul.f32 %v4397_v52, %v1401_v4  ;;  %v1260_v50 = vadd.f32 %v1259_v42, %v1183_v19  ;;  %v1456_v4 = vld [vmem:[#allocation8 + $0x8] sm:$0xff]  ;;  %v3422_v13 = vld [vmem:[%s5116_s7 + $0x100] sm:$0xff] }
 0x4cc   : > { %1480 = vmatpush.msrb.mxu0 %v1456_v4  ;;  %1509 = vmatpush.msrb.mxu1 %v1496_v14  ;;  %v3419_v4 = vld [vmem:[%s5116_s7 + $0xf0] sm:$0xff]  ;;  %v3427_v14 = vld [vmem:[%s5116_s7 + $0x120] sm:$0xff] }
 0x4cd   : > { %v1403_v31 = vadd.f32 %v4397_v52, %v1402_v16 }
 0x4ce   : > { %v3703_v17 = vpop.eup %3702  ;;  %v1396_v53 = vpop.f32.mrf.mxu3  ;;  %1510 = vmatpush.msrb.mxu1 %v1495_v15 }
 0x4cf   : > { %v1323_v25 = vmul.f32 %v3703_v17, %v4402_v60  ;;  %vm1328_vm13 = vweird.f32 %v3703_v17  ;;  %v1407_v43 = vsel %vm1406_vm14, %v4397_v52, %v1403_v31  ;;  %v3654_v52 = vld [vmem:[%s5117_s8] ss:$0 sm:$0xff] }
 0x4d0   : > { %vm1329_vm0 = vmor %vm1327_vm15, %vm1328_vm13  ;;  %v1412_v47 = vsel %vm1409_vm2, %v1411_v45, %v1407_v43  ;;  %v1319_v48 = vpop.f32.mrf.mxu1  ;;  %v3658_v45 = vld [vmem:[%s5123_s14] ss:$0 sm:$0xff] }
 0x4d1   : > { %v1324_v30 = vsub.f32 1.0, %v1323_v25  ;;  %v1413_v54 = vmul.f32 %v1412_v47, %v1396_v53 }
 0x4d3   : > { %v1325_v39 = vmul.f32 %v3703_v17, %v1324_v30  ;;  %v3655_v30 = vld [vmem:[%s5118_s9] ss:$0 sm:$0xff] }
 0x4d5   : > { %v1326_v44 = vadd.f32 %v3703_v17, %v1325_v39  ;;  %v1487_v39 = vld [vmem:[%s5122_s13] sm:$0xff] }
 0x4d7   : > { %v1330_v18 = vsel %vm1329_vm0, %v3703_v17, %v1326_v44  ;;  %v1494_v17 = vld [vmem:[%s5122_s13 + $0x38] sm:$0xff] }
 0x4d8   : > { %v1335_v49 = vsel %vm1332_vm3, %v1334_v46, %v1330_v18  ;;  %1511 = vmatpush.msrb.mxu1 %v1494_v17 }
 0x4d9   : > { %v1336_v51 = vmul.f32 %v1335_v49, %v1319_v48 }
 0x4da   : > { %1512 = vmatpush.msrb.mxu1 %v1493_v21 }
 0x4db   : > { %v1337_v55 = vadd.f32 %v1336_v51, %v1260_v50 }
 0x4dc   : > { %1513 = vmatpush.msrb.mxu1 %v1492_v23  ;;  %v3659_v23 = vld [vmem:[%s5165_s23 + $0x1] ss:$0 sm:$0xff] }
 0x4dd   : > { %v1414_v56 = vadd.f32 %v1413_v54, %v1337_v55  ;;  %v1567_v54 = vld [vmem:[#allocation3 + $0x38] sm:$0xff] }
 0x4de   : > { %1514 = vmatpush.msrb.mxu1 %v1491_v26  ;;  %v1595_v55 = vld [vmem:[#allocation6 + $0x38] sm:$0xff]  ;;  %1583 = vmatpush.msrb.mxu2 %v1567_v54 }
 0x4df   : > { %1415 = vst.msk [vmem:[#allocation2] sm:$0xff] %vm715_vm1, %v1414_v56  ;;  %v3415_v56 = vld [vmem:[%s5116_s7 + $0xd8] sm:$0xff]  ;;  %1608 = vmatpush.msra.mxu3 %v1595_v55  ;;  %v3660_v26 = vld [vmem:[%s5166_s4 + $0x1] ss:$0 sm:$0xff] }
 0x4e0   : > { %1515 = vmatpush.msrb.mxu1 %v1490_v28 }
 0x4e2   : > { %1516 = vmatpush.msrb.mxu1 %v1489_v37  ;;  %v3432_v37 = vld [vmem:[%s5116_s7 + $0x140] sm:$0xff] }
 0x4e4   : > { %1517 = vmatpush.msrb.mxu1 %v1488_v38  ;;  %v3437_v38 = vld [vmem:[%s5116_s7 + $0x160] sm:$0xff] }
 0x4e6   : > { %v1416_v57 = vld [vmem:[#allocation2] sm:$0xff]  ;;  %1518 = vmatpush.msrb.mxu1 %v1487_v39 }
 0x4e7   : > { %v1417_v58 = vadd.f32 %v1416_v57, %v4229_v24  ;;  %v1455_v24 = vld [vmem:[#allocation8] sm:$0xff]  ;;  %v1594_v57 = vld [vmem:[#allocation6 + $0x30] sm:$0xff] }
 0x4e8   : > { %1481 = vmatpush.msrb.mxu0 %v1455_v24  ;;  %1609 = vmatpush.msra.mxu3 %v1594_v57  ;;  %v3424_v24 = vld [vmem:[%s5116_s7 + $0x110] sm:$0xff] }
 0x4e9   : > { %v4456_v59 = vadd.f32 %v3654_v52, %v1417_v58  ;;  %v1566_v52 = vld [vmem:[#allocation3 + $0x30] sm:$0xff]  ;;  %v3414_v58 = vld [vmem:[%s5116_s7 + $0xd0] sm:$0xff] }
 0x4ea   : > { %1633 = vmatpush.msra.mxu0 %v3415_v56  ;;  %1584 = vmatpush.msrb.mxu2 %v1566_v52 }
 0x4eb   : > { %v1425_v60 = vsel %vm715_vm1, %v4456_v59, 0.0 }
 0x4ec   : > { %1426 = vadd.xlane.f32.xlu2 %v1425_v60  ;;  %1634 = vmatpush.msra.mxu0 %v3414_v58  ;;  %v1593_v60 = vld [vmem:[#allocation6 + $0x28] sm:$0xff] }
 0x4ed   : > { %1610 = vmatpush.msra.mxu3 %v1593_v60 }
 0x55f   : > { %v1427_v61 = vpop.xlane.xlu2 %1426 }
 0x560   : > { %v1428_v62 = vmul.f32 %v1427_v61, %v4233_v32  ;;  %v3413_v61 = vld [vmem:[%s5116_s7 + $0xc8] sm:$0xff] }
 0x561   : > { %1635 = vmatpush.msra.mxu0 %v3413_v61 }
 0x562   : > { %v1429_v63 = vsub.f32 %v4456_v59, %v1428_v62  ;;  %v1564_v62 = vld [vmem:[#allocation3 + $0x20] sm:$0xff] }
 0x564   : > { %v1430_v0 = vmul.f32 %v1429_v63, %v1429_v63 }
 0x566   : > { %v1431_v1 = vsel %vm715_vm1, %v1430_v0, 0.0  ;;  %v3412_v0 = vld [vmem:[%s5116_s7 + $0xc0] sm:$0xff] }
 0x567   : > { %1432 = vadd.xlane.f32.xlu0 %v1431_v1  ;;  %v3420_v1 = vld [vmem:[%s5116_s7 + $0xf8] sm:$0xff]  ;;  %1636 = vmatpush.msra.mxu0 %v3412_v0 }
 0x5da   : > { %v1433_v8 = vpop.xlane.xlu0 %1432 }
 0x5db   : > { %v1434_v9 = vmul.f32 %v1433_v8, %v4233_v32 }
 0x5dd   : > { %v1435_v11 = vadd.f32 1e-05, %v1434_v9  ;;  %v3423_v9 = vld [vmem:[%s5116_s7 + $0x108] sm:$0xff] }
 0x5df   : > { %3704 = vrsqrt.f32 %v1435_v11  ;;  %vm1442_vm5 = vweird.f32 %v1435_v11 }
 0x5e5   : > { %v3705_v16 = vpop.eup %3704 }
 0x5e6   : > { %v1437_v20 = vmul.f32 %v3705_v16, %v1435_v11  ;;  %vm1443_vm4 = vweird.f32 %v3705_v16  ;;  %v3417_v11 = vld [vmem:[%s5116_s7 + $0xe0] sm:$0xff] }
 0x5e7   : > { %vm1444_vm8 = vmor %vm1442_vm5, %vm1443_vm4 }
 0x5e8   : > { %v1438_v22 = vmul.f32 %v3705_v16, %v1437_v20 }
 0x5ea   : > { %v1439_v25 = vmul.f32 0.5, %v1438_v22 }
 0x5ec   : > { %v1440_v27 = vsub.f32 1.5, %v1439_v25 }
 0x5ee   : > { %v1441_v29 = vmul.f32 %v3705_v16, %v1440_v27 }
 0x5f0   : > { %v1445_v31 = vsel %vm1444_vm8, %v3705_v16, %v1441_v29 }
 0x5f1   : > { %v1446_v33 = vmul.f32 %v1445_v31, %v1429_v63  ;;  %v1592_v63 = vld [vmem:[#allocation6 + $0x20] sm:$0xff]  ;;  %v3440_v31 = vld [vmem:[%s5116_s7 + $0x178] sm:$0xff] }
 0x5f2   : > { %1611 = vmatpush.msra.mxu3 %v1592_v63 }
 0x5f3   : > { %v1450_v35 = vmul.f32 %v3655_v30, %v1446_v33  ;;  %v3435_v30 = vld [vmem:[%s5116_s7 + $0x158] sm:$0xff]  ;;  %v3434_v33 = vld [vmem:[%s5116_s7 + $0x150] sm:$0xff] }
 0x5f4   : > { %1683 = vmatpush.msrb.mxu3 %v3425_v2 }
 0x5f5   : > { %v1454_v36 = vadd.f32 %v3656_v34, %v1450_v35  ;;  %v3439_v34 = vld [vmem:[%s5116_s7 + $0x170] sm:$0xff]  ;;  %v3433_v35 = vld [vmem:[%s5116_s7 + $0x148] sm:$0xff] }
 0x5f6   : > { %1684 = vmatpush.msrb.mxu3 %v3424_v24 }
 0x5f7   : > { %3407 = vmatmul.msk.f32.vlgmr.msrb.gmra.mxu0 %vm715_vm1, %v1454_v36  ;;  %v3438_v36 = vld [vmem:[%s5116_s7 + $0x168] sm:$0xff] }
 0x5f8   : > { %1708 = vmatpush.msrb.mxu0 %v3430_v3  ;;  %1685 = vmatpush.msrb.mxu3 %v3423_v9 }
 0x5fa   : > { %1709 = vmatpush.msrb.mxu0 %v3429_v5  ;;  %1686 = vmatpush.msrb.mxu3 %v3422_v13 }
 0x5fc   : > { %1710 = vmatpush.msrb.mxu0 %v3428_v10 }
 0x5fe   : > { %1711 = vmatpush.msrb.mxu0 %v3427_v14 }
 0x674   : > { %v1483_v42 = vpop.f32.mrf.mxu0 }
 0x675   : > { %v1484_v43 = vadd.f32 %v3657_v40, %v1483_v42 }
 0x677   : > { %v1486_v44 = vmax.f32 %v1484_v43, 0.0 }
 0x679   : > { %1519 = vmatmul.f32.vlgmr.msrb.gmra.mxu1 %v1486_v44 }
 0x6f6   : > { %v1520_v46 = vpop.f32.mrf.mxu1 }
 0x6f7   : > { %v1523_v19 = vadd.f32 %v1520_v46, %v4456_v59  ;;  %v1565_v59 = vld [vmem:[#allocation3 + $0x28] sm:$0xff] }
 0x6f8   : > { %1585 = vmatpush.msrb.mxu2 %v1565_v59 }
 0x6f9   : > { %v4526_v18 = vadd.f32 %v3658_v45, %v1523_v19 }
 0x6fa   : > { %1586 = vmatpush.msrb.mxu2 %v1564_v62 }
 0x6fb   : > { %v1533_v47 = vsel %vm715_vm1, %v4526_v18, 0.0 }
 0x6fc   : > { %1534 = vadd.xlane.f32.xlu1 %v1533_v47  ;;  %1658 = vmatpush.msra.mxu2 %v3420_v1 }
 0x6fe   : > { %1659 = vmatpush.msra.mxu2 %v3419_v4 }
 0x700   : > { %1660 = vmatpush.msra.mxu2 %v3418_v7 }
 0x702   : > { %1661 = vmatpush.msra.mxu2 %v3417_v11 }
 0x76f   : > { %v1535_v48 = vpop.xlane.xlu1 %1534 }
 0x770   : > { %v1536_v49 = vmul.f32 %v1535_v48, %v4233_v32 }
 0x772   : > { %v4532_v50 = vsub.f32 %v4526_v18, %v1536_v49 }
 0x774   : > { %v1538_v51 = vmul.f32 %v4532_v50, %v4532_v50 }
 0x776   : > { %v1539_v53 = vsel %vm715_vm1, %v1538_v51, 0.0 }
 0x777   : > { %1540 = vadd.xlane.f32.xlu2 %v1539_v53 }
 0x7ea   : > { %v1541_v6 = vpop.xlane.xlu2 %1540 }
 0x7eb   : > { %v1542_v8 = vmul.f32 %v1541_v6, %v4233_v32 }
 0x7ed   : > { %v1543_v12 = vadd.f32 1e-05, %v1542_v8 }
 0x7ef   : > { %3706 = vrsqrt.f32 %v1543_v12  ;;  %vm1550_vm10 = vweird.f32 %v1543_v12 }
 0x7f5   : > { %v3707_v15 = vpop.eup %3706 }
 0x7f6   : > { %v1545_v16 = vmul.f32 %v3707_v15, %v1543_v12  ;;  %vm1551_vm9 = vweird.f32 %v3707_v15 }
 0x7f7   : > { %vm1552_vm11 = vmor %vm1550_vm10, %vm1551_vm9 }
 0x7f8   : > { %v1546_v17 = vmul.f32 %v3707_v15, %v1545_v16 }
 0x7fa   : > { %v1547_v20 = vmul.f32 0.5, %v1546_v17 }
 0x7fc   : > { %v1548_v21 = vsub.f32 1.5, %v1547_v20 }
 0x7fe   : > { %v1549_v22 = vmul.f32 %v3707_v15, %v1548_v21 }
 0x800   : > { %v1553_v25 = vsel %vm1552_vm11, %v3707_v15, %v1549_v22 }
 0x801   : > { %v1554_v27 = vmul.f32 %v1553_v25, %v4532_v50 }
 0x803   : > { %v1558_v28 = vmul.f32 %v3659_v23, %v1554_v27 }
 0x805   : > { %v1562_v29 = vadd.f32 %v3660_v26, %v1558_v28 }
 0x807   : > { %3410 = vmatmul.msk.f32.vlgmr.msrb.gmra.mxu2 %vm715_vm1, %v1562_v29  ;;  %3411 = vmatmul.msk.f32.vlgmr.msra.gmra.mxu3 %vm715_vm1, %v1562_v29 }
 0x808   : > { %3416 = vmatmul.msk.f32.vlgmr.msra.gmra.mxu0 %vm715_vm1, %v1562_v29  ;;  %1733 = vmatpush.msrb.mxu2 %v3435_v30 }
 0x809   : > { %1758 = vmatpush.msra.mxu3 %v3440_v31 }
 0x80a   : > { %1734 = vmatpush.msrb.mxu2 %v3434_v33 }
 0x80b   : > { %1759 = vmatpush.msra.mxu3 %v3439_v34 }
 0x80c   : > { %1735 = vmatpush.msrb.mxu2 %v3433_v35 }
 0x80d   : > { %1760 = vmatpush.msra.mxu3 %v3438_v36 }
 0x80e   : > { %1736 = vmatpush.msrb.mxu2 %v3432_v37 }
 0x80f   : > { %3421 = vmatmul.msk.f32.vlgmr.msra.gmra.mxu2 %vm715_vm1, %v1562_v29  ;;  %3426 = vmatmul.msk.f32.vlgmr.msrb.gmra.mxu3 %vm715_vm1, %v1562_v29 }
 0x810   : > { %3431 = vmatmul.msk.f32.vlgmr.msrb.gmra.mxu0 %vm715_vm1, %v1562_v29  ;;  %1761 = vmatpush.msra.mxu3 %v3437_v38 }
 0x817   : > { %3436 = vmatmul.msk.f32.vlgmr.msrb.gmra.mxu2 %vm715_vm1, %v1562_v29  ;;  %3441 = vmatmul.msk.f32.vlgmr.msra.gmra.mxu3 %vm715_vm1, %v1562_v29 }
 0x885   : > { %v1638_v39 = vpop.f32.mrf.mxu0 }
 0x886   : > { %1820 = vmatpush.msra.mxu2 %v1638_v39 }
 0x88a   : > { %v1588_v40 = vpop.f32.mrf.mxu2  ;;  %v1613_v42 = vpop.f32.mrf.mxu3 }
 0x88b   : > { %1920 = vrot.lane.b32.xlu2 %v1613_v42, %s3973_s20  ;;  %1843 = vrot.lane.b32.xlu0 %v1613_v42, %s3969_s5 }
 0x88c   : > { %3442 = vmatpush.xpose.msk.msra.mxu0 %vm954_vm6, %v1613_v42  ;;  %1841 = vrot.lane.b32.xlu1 %v1588_v40, %s3969_s5 }
 0x88d   : > { %v1713_v45 = vpop.f32.mrf.mxu0 }
 0x88f   : > { %3443 = vmatmul.msk.f32.vlgmr.msra.gmra.mxu0 %vm954_vm6, %v1588_v40 }
 0x892   : > { %v1663_v43 = vpop.f32.mrf.mxu2  ;;  %v1688_v44 = vpop.f32.mrf.mxu3 }
 0x893   : > { %2074 = vrot.lane.b32.xlu2 %v1613_v42, %s3972_s0  ;;  %1997 = vrot.lane.b32.xlu0 %v1613_v42, %s3970_s18 }
 0x894   : > { %1974 = vmatpush.msrb.mxu2 %v1688_v44  ;;  %1918 = vrot.lane.b32.xlu1 %v1588_v40, %s3973_s20 }
 0x895   : > { %1897 = vmatpush.msrb.mxu0 %v1663_v43 }
 0x897   : > { %2051 = vmatpush.msra.mxu0 %v1713_v45 }
 0x89a   : > { %v1763_v58 = vpop.f32.mrf.mxu3  ;;  %v1738_v24 = vpop.f32.mrf.mxu2 }
 0x89b   : > { %2149 = vrot.lane.b32.xlu2 %v1588_v40, %s3971_s19  ;;  %1995 = vrot.lane.b32.xlu0 %v1588_v40, %s3970_s18 }
 0x89c   : > { %2151 = vrot.lane.b32.xlu1 %v1613_v42, %s3971_s19 }
 0x8a3   : > { %2072 = vrot.lane.b32.xlu0 %v1588_v40, %s3972_s0 }
 0x8e5   : > { %v1921_v46 = vpop.permute.xlu2 %1920 }
 0x8e6   : > { %3448 = vmatpush.xpose.msk.msra.mxu1 %vm954_vm6, %v1921_v46 }
 0x8ed   : > { %v2075_v19 = vpop.permute.xlu2 %2074 }
 0x8ee   : > { %3454 = vmatpush.xpose.msk.msrb.mxu1 %vm954_vm6, %v2075_v19 }
 0x8f5   : > { %v2150_v52 = vpop.permute.xlu2 %2149 }
 0x8fd   : > { %v1844_v47 = vpop.permute.xlu0 %1843 }
 0x8fe   : > { %v1842_v48 = vpop.permute.xlu1 %1841  ;;  %3445 = vmatpush.xpose.msk.msrb.mxu3 %vm954_vm6, %v1844_v47 }
 0x901   : > { %3446 = vmatmul.msk.f32.vlgmr.msrb.gmra.mxu3 %vm954_vm6, %v1842_v48 }
 0x905   : > { %v1998_v49 = vpop.permute.xlu0 %1997 }
 0x906   : > { %v1919_v50 = vpop.permute.xlu1 %1918  ;;  %3451 = vmatpush.xpose.msk.msra.mxu3 %vm954_vm6, %v1998_v49 }
 0x907   : > { %3449 = vmatmul.msk.f32.vlgmr.msra.gmra.mxu1 %vm954_vm6, %v1919_v50 }
 0x90c   : > { %v1789_v51 = vpop.f32.mrf.mxu0 }
 0x90d   : > { %v1792_v53 = vsel %vm4347_vm7, %v1789_v51, -1e+30  ;;  %v1996_v54 = vpop.permute.xlu0 %1995 }
 0x90e   : > { %v2152_v55 = vpop.permute.xlu1 %2151  ;;  %3452 = vmatmul.msk.f32.vlgmr.msra.gmra.mxu3 %vm954_vm6, %v1996_v54  ;;  %v1793_v56 = vsel %vm954_vm6, %v1792_v53, -inf }
 0x90f   : > { %3457 = vmatpush.xpose.msk.msrb.mxu3 %vm954_vm6, %v2152_v55  ;;  %1794 = vmax.xlane.f32.xlu1 %v1793_v56 }
 0x915   : > { %v2073_v57 = vpop.permute.xlu0 %2072 }
 0x916   : > { %3455 = vmatmul.msk.f32.vlgmr.msrb.gmra.mxu1 %vm954_vm6, %v2073_v57  ;;  %3458 = vmatmul.msk.f32.vlgmr.msrb.gmra.mxu3 %vm954_vm6, %v2150_v52 }
 0x982   : > { %v1795_v59 = vpop.xlane.xlu1 %1794 }
 0x983   : > { %v1796_v60 = vsub.f32 %v1792_v53, %v1795_v59 }
 0x984   : > { %v1943_v61 = vpop.f32.mrf.mxu1  ;;  %v1866_v62 = vpop.f32.mrf.mxu3 }
 0x985   : > { %v1797_v63 = vmul.f32 1.442695, %v1796_v60  ;;  %v1946_v0 = vsel %vm4347_vm7, %v1943_v61, -1e+30  ;;  %v1869_v1 = vsel %vm4347_vm7, %v1866_v62, -1e+30 }
 0x986   : > { %v1947_v2 = vsel %vm954_vm6, %v1946_v0, -inf  ;;  %v1870_v3 = vsel %vm954_vm6, %v1869_v1, -inf }
 0x987   : > { %3708 = vpow2.f32 %v1797_v63  ;;  %1948 = vmax.xlane.f32.xlu2 %v1947_v2  ;;  %1871 = vmax.xlane.f32.xlu0 %v1870_v3 }
 0x98d   : > { %v3709_v4 = vpop.eup %3708 }
 0x98e   : > { %3444 = vmatmul.msk.f32.vlgmr.msra.gmra.mxu2 %vm954_vm6, %v3709_v4  ;;  %v1799_v14 = vsel %vm954_vm6, %v3709_v4, 0.0 }
 0x98f   : > { %2128 = vmatpush.msra.mxu2 %v1738_v24  ;;  %v3661_v24 = vld [vmem:[%s5117_s8 + $0x1] ss:$0 sm:$0xff] }
 0x991   : > { %v2020_v5 = vpop.f32.mrf.mxu3 }
 0x992   : > { %v2023_v6 = vsel %vm4347_vm7, %v2020_v5, -1e+30 }
 0x993   : > { %v2097_v7 = vpop.f32.mrf.mxu1  ;;  %v2024_v8 = vsel %vm954_vm6, %v2023_v6, -inf }
 0x994   : > { %v2100_v9 = vsel %vm4347_vm7, %v2097_v7, -1e+30  ;;  %2025 = vmax.xlane.f32.xlu1 %v2024_v8 }
 0x995   : > { %v2101_v10 = vsel %vm954_vm6, %v2100_v9, -inf }
 0x996   : > { %2102 = vmax.xlane.f32.xlu0 %v2101_v10 }
 0x999   : > { %v2174_v11 = vpop.f32.mrf.mxu3 }
 0x99a   : > { %v2177_v12 = vsel %vm4347_vm7, %v2174_v11, -1e+30 }
 0x99b   : > { %v2178_v13 = vsel %vm954_vm6, %v2177_v12, -inf }
 0x99c   : > { %2179 = vmax.xlane.f32.xlu2 %v2178_v13  ;;  %1800 = vadd.xlane.f32.xlu1 %v1799_v14 }
 0x9fa   : > { %v1949_v15 = vpop.xlane.xlu2 %1948  ;;  %v1872_v16 = vpop.xlane.xlu0 %1871 }
 0x9fb   : > { %v1950_v17 = vsub.f32 %v1946_v0, %v1949_v15  ;;  %v1873_v20 = vsub.f32 %v1869_v1, %v1872_v16 }
 0x9fd   : > { %v1951_v21 = vmul.f32 1.442695, %v1950_v17  ;;  %v1874_v22 = vmul.f32 1.442695, %v1873_v20  ;;  %v3479_v20 = vld [vmem:[%s5122_s13 + $0xf0] sm:$0xff] }
 0x9ff   : > { %3710 = vpow2.f32 %v1951_v21 }
 0xa00   : > { %3712 = vpow2.f32 %v1874_v22 }
 0xa05   : > { %v3711_v23 = vpop.eup %3710 }
 0xa06   : > { %v3713_v25 = vpop.eup %3712  ;;  %3450 = vmatmul.msk.f32.vlgmr.msrb.gmra.mxu2 %vm954_vm6, %v3711_v23  ;;  %v1953_v26 = vsel %vm954_vm6, %v3711_v23, 0.0 }
 0xa07   : > { %1954 = vadd.xlane.f32.xlu2 %v1953_v26  ;;  %3447 = vmatmul.msk.f32.vlgmr.msrb.gmra.mxu0 %vm954_vm6, %v3713_v25  ;;  %v1876_v27 = vsel %vm954_vm6, %v3713_v25, 0.0  ;;  %v2026_v28 = vpop.xlane.xlu1 %2025 }
 0xa08   : > { %2205 = vmatpush.msrb.mxu0 %v1763_v58  ;;  %1877 = vadd.xlane.f32.xlu0 %v1876_v27  ;;  %v2027_v29 = vsub.f32 %v2023_v6, %v2026_v28 }
 0xa09   : > { %v2103_v30 = vpop.xlane.xlu0 %2102 }
 0xa0a   : > { %v2028_v31 = vmul.f32 1.442695, %v2027_v29  ;;  %v2104_v33 = vsub.f32 %v2100_v9, %v2103_v30 }
 0xa0c   : > { %3714 = vpow2.f32 %v2028_v31  ;;  %v2105_v34 = vmul.f32 1.442695, %v2104_v33 }
 0xa0e   : > { %3716 = vpow2.f32 %v2105_v34 }
 0xa0f   : > { %v2180_v35 = vpop.xlane.xlu2 %2179  ;;  %v1801_v45 = vpop.xlane.xlu1 %1800 }
 0xa10   : > { %v2181_v36 = vsub.f32 %v2177_v12, %v2180_v35  ;;  %v1836_v0 = vand.u32 2147483648, %v1801_v45  ;;  %vm1830_vm15 = vweird.f32 %v1801_v45  ;;  %v1834_v3 = vand.u32 2147483647, %v1801_v45 }
 0xa11   : > { %v1822_v2 = vpop.f32.mrf.mxu2 }
 0xa12   : > { %v3715_v37 = vpop.eup %3714  ;;  %v2182_v38 = vmul.f32 1.442695, %v2181_v36  ;;  %v1837_v13 = vor.u32 1.1754944e-38, %v1836_v0  ;;  %vm1835_vm8 = vcmp.eq.f32.partialorder %v1834_v3, 8.507059e+37 }
 0xa13   : > { %3453 = vmatmul.msk.f32.vlgmr.msra.gmra.mxu0 %vm954_vm6, %v3715_v37  ;;  %v2030_v39 = vsel %vm954_vm6, %v3715_v37, 0.0 }
 0xa14   : > { %v3717_v40 = vpop.eup %3716  ;;  %3718 = vpow2.f32 %v2182_v38  ;;  %2031 = vadd.xlane.f32.xlu1 %v2030_v39 }
 0xa15   : > { %3456 = vmatmul.msk.f32.vlgmr.msra.gmra.mxu2 %vm954_vm6, %v3717_v40  ;;  %v2107_v42 = vsel %vm954_vm6, %v3717_v40, 0.0  ;;  %3720 = vrcp.f32 %v1801_v45 }
 0xa16   : > { %2108 = vadd.xlane.f32.xlu0 %v2107_v42 }
 0xa1a   : > { %v3719_v43 = vpop.eup %3718 }
 0xa1b   : > { %3459 = vmatmul.msk.f32.vlgmr.msrb.gmra.mxu0 %vm954_vm6, %v3719_v43  ;;  %v2184_v44 = vsel %vm954_vm6, %v3719_v43, 0.0  ;;  %v3721_v19 = vpop.eup %3720 }
 0xa1c   : > { %2185 = vadd.xlane.f32.xlu2 %v2184_v44  ;;  %v1826_v48 = vmul.f32 %v3721_v19, %v1801_v45  ;;  %vm1831_vm13 = vweird.f32 %v3721_v19 }
 0xa1d   : > { %vm4684_vm2 = vmor %vm1830_vm15, %vm1831_vm13 }
 0xa1e   : > { %v1827_v51 = vsub.f32 1.0, %v1826_v48 }
 0xa20   : > { %v1828_v52 = vmul.f32 %v3721_v19, %v1827_v51 }
 0xa22   : > { %v1829_v62 = vadd.f32 %v3721_v19, %v1828_v52 }
 0xa24   : > { %v1833_v8 = vsel %vm4684_vm2, %v3721_v19, %v1829_v62 }
 0xa25   : > { %v1838_v21 = vsel %vm1835_vm8, %v1837_v13, %v1833_v8 }
 0xa26   : > { %v1839_v33 = vmul.f32 %v1838_v21, %v1822_v2  ;;  %v3478_v21 = vld [vmem:[%s5122_s13 + $0xe8] sm:$0xff] }
 0xa7a   : > { %v1955_v46 = vpop.xlane.xlu2 %1954 }
 0xa7b   : > { %3722 = vrcp.f32 %v1955_v46  ;;  %v1878_v47 = vpop.xlane.xlu0 %1877  ;;  %v1988_v11 = vand.u32 2147483647, %v1955_v46  ;;  %v1990_v12 = vand.u32 2147483648, %v1955_v46  ;;  %vm1984_vm5 = vweird.f32 %v1955_v46 }
 0xa7c   : > { %3724 = vrcp.f32 %v1878_v47  ;;  %v1913_v63 = vand.u32 2147483648, %v1878_v47  ;;  %vm1907_vm14 = vweird.f32 %v1878_v47  ;;  %v1911_v1 = vand.u32 2147483647, %v1878_v47 }
 0xa7d   : > { %vm1989_vm10 = vcmp.eq.f32.partialorder %v1988_v11, 8.507059e+37  ;;  %v1991_v26 = vor.u32 1.1754944e-38, %v1990_v12 }
 0xa7e   : > { %v1914_v10 = vor.u32 1.1754944e-38, %v1913_v63  ;;  %vm1912_vm4 = vcmp.eq.f32.partialorder %v1911_v1, 8.507059e+37 }
 0xa81   : > { %v3723_v49 = vpop.eup %3722 }
 0xa82   : > { %v3725_v50 = vpop.eup %3724  ;;  %v1980_v53 = vmul.f32 %v3723_v49, %v1955_v46  ;;  %vm1985_vm3 = vweird.f32 %v3723_v49 }
 0xa83   : > { %v1903_v54 = vmul.f32 %v3725_v50, %v1878_v47  ;;  %vm1908_vm12 = vweird.f32 %v3725_v50  ;;  %vm4693_vm9 = vmor %vm1984_vm5, %vm1985_vm3 }
 0xa84   : > { %v1981_v55 = vsub.f32 1.0, %v1980_v53  ;;  %vm4680_vm0 = vmor %vm1907_vm14, %vm1908_vm12  ;;  %v1899_v9 = vpop.f32.mrf.mxu0 }
 0xa85   : > { %v1904_v56 = vsub.f32 1.0, %v1903_v54 }
 0xa86   : > { %v1982_v60 = vmul.f32 %v3723_v49, %v1981_v55 }
 0xa87   : > { %v1905_v57 = vmul.f32 %v3725_v50, %v1904_v56  ;;  %v2032_v58 = vpop.xlane.xlu1 %2031 }
 0xa88   : > { %3726 = vrcp.f32 %v2032_v58  ;;  %v1983_v6 = vadd.f32 %v3723_v49, %v1982_v60  ;;  %v2065_v27 = vand.u32 2147483647, %v2032_v58  ;;  %v2067_v28 = vand.u32 2147483648, %v2032_v58 }
 0xa89   : > { %v1906_v59 = vadd.f32 %v3725_v50, %v1905_v57  ;;  %v4677_v61 = vpop.xlane.xlu0 %2108  ;;  %v1976_v34 = vpop.f32.mrf.mxu2  ;;  %vm2061_vm12 = vweird.f32 %v2032_v58 }
 0xa8a   : > { %3728 = vrcp.f32 %v4677_v61  ;;  %v1987_v23 = vsel %vm4693_vm9, %v3723_v49, %v1983_v6  ;;  %v2144_v36 = vand.u32 2147483648, %v4677_v61  ;;  %v2142_v39 = vand.u32 2147483647, %v4677_v61 }
 0xa8b   : > { %v1910_v5 = vsel %vm4680_vm0, %v3725_v50, %v1906_v59  ;;  %v1992_v35 = vsel %vm1989_vm10, %v1991_v26, %v1987_v23  ;;  %vm2066_vm15 = vcmp.eq.f32.partialorder %v2065_v27, 8.507059e+37  ;;  %v2068_v43 = vor.u32 1.1754944e-38, %v2067_v28  ;;  %v3476_v27 = vld [vmem:[%s5122_s13 + $0xd8] sm:$0xff]  ;;  %v3475_v28 = vld [vmem:[%s5122_s13 + $0xd0] sm:$0xff] }
 0xa8c   : > { %v1915_v17 = vsel %vm1912_vm4, %v1914_v10, %v1910_v5  ;;  %vm2138_vm0 = vweird.f32 %v4677_v61  ;;  %v1993_v47 = vmul.f32 %v1992_v35, %v1976_v34  ;;  %v2145_v49 = vor.u32 1.1754944e-38, %v2144_v36  ;;  %v3471_v35 = vld [vmem:[%s5122_s13 + $0xb0] sm:$0xff] }
 0xa8d   : > { %v1916_v29 = vmul.f32 %v1915_v17, %v1899_v9  ;;  %vm2143_vm3 = vcmp.eq.f32.partialorder %v2142_v39, 8.507059e+37  ;;  %v3480_v17 = vld [vmem:[%s5122_s13 + $0xf8] sm:$0xff]  ;;  %v3469_v39 = vld [vmem:[%s5122_s13 + $0xa0] sm:$0xff] }
 0xa8e   : > { %v3727_v7 = vpop.eup %3726  ;;  %2320 = vmatpush.msrb.mxu2 %v3480_v17  ;;  %v3503_v17 = vld [vmem:[%s5116_s7 + $0x1f0] sm:$0xff] }
 0xa8f   : > { %v2057_v14 = vmul.f32 %v3727_v7, %v2032_v58  ;;  %v2186_v15 = vpop.xlane.xlu2 %2185  ;;  %vm2062_vm11 = vweird.f32 %v3727_v7  ;;  %v1917_v44 = vadd.f32 %v1916_v29, %v1839_v33  ;;  %v3474_v29 = vld [vmem:[%s5122_s13 + $0xc8] sm:$0xff]  ;;  %v3472_v33 = vld [vmem:[%s5122_s13 + $0xb8] sm:$0xff] }
 0xa90   : > { %v3729_v16 = vpop.eup %3728  ;;  %3730 = vrcp.f32 %v2186_v15  ;;  %v2053_v42 = vpop.f32.mrf.mxu0  ;;  %vm2063_vm14 = vmor %vm2061_vm12, %vm2062_vm11  ;;  %v2221_v55 = vand.u32 2147483648, %v2186_v15  ;;  %v2219_v57 = vand.u32 2147483647, %v2186_v15  ;;  %vm2215_vm5 = vweird.f32 %v2186_v15  ;;  %2321 = vmatpush.msrb.mxu2 %v3479_v20 }
 0xa91   : > { %v2058_v22 = vsub.f32 1.0, %v2057_v14  ;;  %v2134_v25 = vmul.f32 %v3729_v16, %v4677_v61  ;;  %vm2139_vm13 = vweird.f32 %v3729_v16  ;;  %v1994_v56 = vadd.f32 %v1993_v47, %v1917_v44  ;;  %v2273_v14 = vld [vmem:[#allocation8 + $0x38] sm:$0xff] }
 0xa92   : > { %vm2140_vm2 = vmor %vm2138_vm0, %vm2139_vm13  ;;  %v2222_v62 = vor.u32 1.1754944e-38, %v2221_v55  ;;  %vm2220_vm9 = vcmp.eq.f32.partialorder %v2219_v57, 8.507059e+37  ;;  %2294 = vmatpush.msra.mxu1 %v2273_v14  ;;  %2322 = vmatpush.msrb.mxu2 %v3478_v21  ;;  %v3662_v44 = vld [vmem:[%s5118_s9 + $0x1] ss:$0 sm:$0xff]  ;;  %v3499_v14 = vld [vmem:[%s5116_s7 + $0x1d8] sm:$0xff] }
 0xa93   : > { %v2135_v30 = vsub.f32 1.0, %v2134_v25  ;;  %v2059_v31 = vmul.f32 %v3727_v7, %v2058_v22  ;;  %v3477_v25 = vld [vmem:[%s5122_s13 + $0xe0] sm:$0xff]  ;;  %v3492_v21 = vld [vmem:[%s5116_s7 + $0x1a8] sm:$0xff] }
 0xa94   : > { %2323 = vmatpush.msrb.mxu2 %v3477_v25  ;;  %v3502_v25 = vld [vmem:[%s5116_s7 + $0x1e8] sm:$0xff] }
 0xa95   : > { %v2060_v37 = vadd.f32 %v3727_v7, %v2059_v31  ;;  %v2136_v38 = vmul.f32 %v3729_v16, %v2135_v30  ;;  %v3473_v30 = vld [vmem:[%s5122_s13 + $0xc0] sm:$0xff] }
 0xa96   : > { %v3731_v40 = vpop.eup %3730  ;;  %2324 = vmatpush.msrb.mxu2 %v3476_v27 }
 0xa97   : > { %v2211_v45 = vmul.f32 %v3731_v40, %v2186_v15  ;;  %v2064_v46 = vsel %vm2063_vm14, %v3727_v7, %v2060_v37  ;;  %v2137_v19 = vadd.f32 %v3729_v16, %v2136_v38  ;;  %vm2216_vm4 = vweird.f32 %v3731_v40  ;;  %v2272_v15 = vld [vmem:[#allocation8 + $0x30] sm:$0xff]  ;;  %v3470_v37 = vld [vmem:[%s5122_s13 + $0xa8] sm:$0xff] }
 0xa98   : > { %v2069_v48 = vsel %vm2066_vm15, %v2068_v43, %v2064_v46  ;;  %v2130_v58 = vpop.f32.mrf.mxu2  ;;  %vm2217_vm8 = vmor %vm2215_vm5, %vm2216_vm4  ;;  %v2207_v0 = vpop.f32.mrf.mxu0  ;;  %2295 = vmatpush.msra.mxu1 %v2272_v15  ;;  %2325 = vmatpush.msrb.mxu2 %v3475_v28  ;;  %v3504_v15 = vld [vmem:[%s5116_s7 + $0x1f8] sm:$0xff]  ;;  %v3496_v28 = vld [vmem:[%s5116_s7 + $0x1c0] sm:$0xff] }
 0xa99   : > { %v2212_v50 = vsub.f32 1.0, %v2211_v45  ;;  %v2070_v51 = vmul.f32 %v2069_v48, %v2053_v42  ;;  %v2141_v53 = vsel %vm2140_vm2, %v3729_v16, %v2137_v19  ;;  %v2271_v16 = vld [vmem:[#allocation8 + $0x28] sm:$0xff]  ;;  %v3468_v42 = vld [vmem:[%s5122_s13 + $0x98] sm:$0xff]  ;;  %v3663_v19 = vld [vmem:[%s5119_s10 + $0x1] ss:$0 sm:$0xff] }
 0xa9a   : > { %v2146_v54 = vsel %vm2143_vm3, %v2145_v49, %v2141_v53  ;;  %2296 = vmatpush.msra.mxu1 %v2271_v16  ;;  %2326 = vmatpush.msrb.mxu2 %v3474_v29  ;;  %v3467_v49 = vld [vmem:[%s5122_s13 + $0x90] sm:$0xff]  ;;  %v3664_v53 = vld [vmem:[%s5121_s12 + $0x1] ss:$0 sm:$0xff] }
 0xa9b   : > { %v2213_v52 = vmul.f32 %v3731_v40, %v2212_v50  ;;  %v2071_v59 = vadd.f32 %v2070_v51, %v1994_v56  ;;  %v2147_v60 = vmul.f32 %v2146_v54, %v2130_v58  ;;  %v3466_v50 = vld [vmem:[%s5122_s13 + $0x88] sm:$0xff]  ;;  %v3465_v51 = vld [vmem:[%s5122_s13 + $0x80] sm:$0xff]  ;;  %v3493_v16 = vld [vmem:[%s5116_s7 + $0x1b0] sm:$0xff] }
 0xa9c   : > { %2327 = vmatpush.msrb.mxu2 %v3473_v30  ;;  %v3501_v29 = vld [vmem:[%s5116_s7 + $0x1e0] sm:$0xff] }
 0xa9d   : > { %v2214_v61 = vadd.f32 %v3731_v40, %v2213_v52  ;;  %v2148_v2 = vadd.f32 %v2147_v60, %v2071_v59  ;;  %v3665_v52 = vld [vmem:[%s5123_s14 + $0x1] ss:$0 sm:$0xff] }
 0xa9e   : > { %2328 = vmatpush.msrb.mxu2 %v3472_v33 }
 0xa9f   : > { %v2218_v63 = vsel %vm2217_vm8, %v3731_v40, %v2214_v61 }
 0xaa0   : > { %v2223_v1 = vsel %vm2220_vm9, %v2222_v62, %v2218_v63  ;;  %2329 = vmatpush.msrb.mxu2 %v3471_v35 }
 0xaa1   : > { %v2224_v3 = vmul.f32 %v2223_v1, %v2207_v0 }
 0xaa2   : > { %2330 = vmatpush.msrb.mxu2 %v3470_v37  ;;  %v3666_v37 = vld [vmem:[%s5165_s23 + $0x2] ss:$0 sm:$0xff] }
 0xaa3   : > { %v2225_v4 = vadd.f32 %v2224_v3, %v2148_v2  ;;  %v2385_v2 = vld [vmem:[#allocation3 + $0x58] sm:$0xff] }
 0xaa4   : > { %2331 = vmatpush.msrb.mxu2 %v3469_v39  ;;  %v2413_v3 = vld [vmem:[#allocation6 + $0x58] sm:$0xff]  ;;  %2401 = vmatpush.msra.mxu3 %v2385_v2 }
 0xaa5   : > { %2226 = vst.msk [vmem:[#allocation2] sm:$0xff] %vm715_vm1, %v2225_v4  ;;  %v3489_v4 = vld [vmem:[%s5116_s7 + $0x198] sm:$0xff]  ;;  %2426 = vmatpush.msra.mxu0 %v2413_v3  ;;  %v3667_v39 = vld [vmem:[%s5166_s4 + $0x2] ss:$0 sm:$0xff] }
 0xaa6   : > { %2332 = vmatpush.msrb.mxu2 %v3468_v42 }
 0xaa8   : > { %2333 = vmatpush.msrb.mxu2 %v3467_v49  ;;  %v3506_v49 = vld [vmem:[%s5116_s7 + $0x200] sm:$0xff] }
 0xaaa   : > { %2334 = vmatpush.msrb.mxu2 %v3466_v50  ;;  %v3511_v50 = vld [vmem:[%s5116_s7 + $0x220] sm:$0xff] }
 0xaac   : > { %v2227_v5 = vld [vmem:[#allocation2] sm:$0xff]  ;;  %2335 = vmatpush.msrb.mxu2 %v3465_v51 }
 0xaad   : > { %v2228_v6 = vadd.f32 %v2227_v5, %v4526_v18  ;;  %v2270_v18 = vld [vmem:[#allocation8 + $0x20] sm:$0xff]  ;;  %v2412_v5 = vld [vmem:[#allocation6 + $0x50] sm:$0xff] }
 0xaae   : > { %2297 = vmatpush.msra.mxu1 %v2270_v18  ;;  %2427 = vmatpush.msra.mxu0 %v2412_v5  ;;  %v3498_v18 = vld [vmem:[%s5116_s7 + $0x1d0] sm:$0xff] }
 0xaaf   : > { %v4708_v7 = vadd.f32 %v3661_v24, %v2228_v6  ;;  %v2384_v24 = vld [vmem:[#allocation3 + $0x50] sm:$0xff]  ;;  %v3488_v6 = vld [vmem:[%s5116_s7 + $0x190] sm:$0xff] }
 0xab0   : > { %2451 = vmatpush.msrb.mxu1 %v3489_v4  ;;  %2402 = vmatpush.msra.mxu3 %v2384_v24 }
 0xab1   : > { %v2239_v8 = vsel %vm715_vm1, %v4708_v7, 0.0 }
 0xab2   : > { %2240 = vadd.xlane.f32.xlu1 %v2239_v8  ;;  %2452 = vmatpush.msrb.mxu1 %v3488_v6  ;;  %v2411_v8 = vld [vmem:[#allocation6 + $0x48] sm:$0xff] }
 0xab3   : > { %2428 = vmatpush.msra.mxu0 %v2411_v8 }
 0xb25   : > { %v2241_v9 = vpop.xlane.xlu1 %2240 }
 0xb26   : > { %v2242_v10 = vmul.f32 %v2241_v9, %v4233_v32  ;;  %v3487_v9 = vld [vmem:[%s5116_s7 + $0x188] sm:$0xff] }
 0xb27   : > { %2453 = vmatpush.msrb.mxu1 %v3487_v9 }
 0xb28   : > { %v2243_v11 = vsub.f32 %v4708_v7, %v2242_v10  ;;  %v2382_v10 = vld [vmem:[#allocation3 + $0x40] sm:$0xff] }
 0xb2a   : > { %v2244_v12 = vmul.f32 %v2243_v11, %v2243_v11 }
 0xb2c   : > { %v2245_v13 = vsel %vm715_vm1, %v2244_v12, 0.0  ;;  %v3486_v12 = vld [vmem:[%s5116_s7 + $0x180] sm:$0xff] }
 0xb2d   : > { %2246 = vadd.xlane.f32.xlu0 %v2245_v13  ;;  %v3494_v13 = vld [vmem:[%s5116_s7 + $0x1b8] sm:$0xff]  ;;  %2454 = vmatpush.msrb.mxu1 %v3486_v12 }
 0xba0   : > { %v2247_v22 = vpop.xlane.xlu0 %2246 }
 0xba1   : > { %v2248_v23 = vmul.f32 %v2247_v22, %v4233_v32 }
 0xba3   : > { %v2249_v26 = vadd.f32 1e-05, %v2248_v23  ;;  %v3497_v23 = vld [vmem:[%s5116_s7 + $0x1c8] sm:$0xff] }
 0xba5   : > { %3732 = vrsqrt.f32 %v2249_v26  ;;  %vm2256_vm11 = vweird.f32 %v2249_v26 }
 0xbab   : > { %v3733_v31 = vpop.eup %3732 }
 0xbac   : > { %v2251_v34 = vmul.f32 %v3733_v31, %v2249_v26  ;;  %vm2257_vm10 = vweird.f32 %v3733_v31  ;;  %v3491_v26 = vld [vmem:[%s5116_s7 + $0x1a0] sm:$0xff] }
 0xbad   : > { %vm2258_vm12 = vmor %vm2256_vm11, %vm2257_vm10 }
 0xbae   : > { %v2252_v36 = vmul.f32 %v3733_v31, %v2251_v34 }
 0xbb0   : > { %v2253_v38 = vmul.f32 0.5, %v2252_v36 }
 0xbb2   : > { %v2254_v40 = vsub.f32 1.5, %v2253_v38 }
 0xbb4   : > { %v2255_v43 = vmul.f32 %v3733_v31, %v2254_v40 }
 0xbb6   : > { %v2259_v45 = vsel %vm2258_vm12, %v3733_v31, %v2255_v43 }
 0xbb7   : > { %v2260_v46 = vmul.f32 %v2259_v45, %v2243_v11  ;;  %v2410_v11 = vld [vmem:[#allocation6 + $0x40] sm:$0xff]  ;;  %v3514_v45 = vld [vmem:[%s5116_s7 + $0x238] sm:$0xff] }
 0xbb8   : > { %2429 = vmatpush.msra.mxu0 %v2410_v11 }
 0xbb9   : > { %v2264_v47 = vmul.f32 %v3662_v44, %v2260_v46  ;;  %v3509_v44 = vld [vmem:[%s5116_s7 + $0x218] sm:$0xff]  ;;  %v3508_v46 = vld [vmem:[%s5116_s7 + $0x210] sm:$0xff] }
 0xbba   : > { %2501 = vmatpush.msrb.mxu0 %v3499_v14 }
 0xbbb   : > { %v2268_v48 = vadd.f32 %v3663_v19, %v2264_v47  ;;  %v3513_v19 = vld [vmem:[%s5116_s7 + $0x230] sm:$0xff]  ;;  %v3507_v47 = vld [vmem:[%s5116_s7 + $0x208] sm:$0xff] }
 0xbbc   : > { %2502 = vmatpush.msrb.mxu0 %v3498_v18 }
 0xbbd   : > { %3464 = vmatmul.msk.f32.vlgmr.msra.gmra.mxu1 %vm715_vm1, %v2268_v48  ;;  %v3512_v48 = vld [vmem:[%s5116_s7 + $0x228] sm:$0xff] }
 0xbbe   : > { %2526 = vmatpush.msra.mxu1 %v3504_v15  ;;  %2503 = vmatpush.msrb.mxu0 %v3497_v23 }
 0xbc0   : > { %2527 = vmatpush.msra.mxu1 %v3503_v17  ;;  %2504 = vmatpush.msrb.mxu0 %v3496_v28 }
 0xbc2   : > { %2528 = vmatpush.msra.mxu1 %v3502_v25 }
 0xbc4   : > { %2529 = vmatpush.msra.mxu1 %v3501_v29 }
 0xc3a   : > { %v2299_v54 = vpop.f32.mrf.mxu1 }
 0xc3b   : > { %v2300_v55 = vadd.f32 %v3664_v53, %v2299_v54 }
 0xc3d   : > { %v2302_v56 = vmax.f32 %v2300_v55, 0.0 }
 0xc3f   : > { %2336 = vmatmul.f32.vlgmr.msrb.gmra.mxu2 %v2302_v56 }
 0xcc2   : > { %v2337_v57 = vpop.f32.mrf.mxu2 }
 0xcc3   : > { %v2340_v58 = vadd.f32 %v2337_v57, %v4708_v7  ;;  %v2383_v7 = vld [vmem:[#allocation3 + $0x48] sm:$0xff] }
 0xcc4   : > { %2403 = vmatpush.msra.mxu3 %v2383_v7 }
 0xcc5   : > { %v4778_v59 = vadd.f32 %v3665_v52, %v2340_v58 }
 0xcc6   : > { %2404 = vmatpush.msra.mxu3 %v2382_v10 }
 0xcc7   : > { %v2351_v60 = vsel %vm715_vm1, %v4778_v59, 0.0 }
 0xcc8   : > { %2352 = vadd.xlane.f32.xlu2 %v2351_v60  ;;  %2476 = vmatpush.msrb.mxu3 %v3494_v13 }
 0xcca   : > { %2477 = vmatpush.msrb.mxu3 %v3493_v16 }
 0xccc   : > { %2478 = vmatpush.msrb.mxu3 %v3492_v21 }
 0xcce   : > { %2479 = vmatpush.msrb.mxu3 %v3491_v26 }
 0xd3b   : > { %v2353_v61 = vpop.xlane.xlu2 %2352 }
 0xd3c   : > { %v2354_v62 = vmul.f32 %v2353_v61, %v4233_v32 }
 0xd3e   : > { %v4784_v63 = vsub.f32 %v4778_v59, %v2354_v62 }
 0xd40   : > { %v2356_v0 = vmul.f32 %v4784_v63, %v4784_v63 }
 0xd42   : > { %v2357_v1 = vsel %vm715_vm1, %v2356_v0, 0.0 }
 0xd43   : > { %2358 = vadd.xlane.f32.xlu1 %v2357_v1 }
 0xdb6   : > { %v2359_v20 = vpop.xlane.xlu1 %2358 }
 0xdb7   : > { %v2360_v22 = vmul.f32 %v2359_v20, %v4233_v32 }
 0xdb9   : > { %v2361_v27 = vadd.f32 1e-05, %v2360_v22 }
 0xdbb   : > { %3734 = vrsqrt.f32 %v2361_v27  ;;  %vm2368_vm14 = vweird.f32 %v2361_v27 }
 0xdc1   : > { %v3735_v30 = vpop.eup %3734 }
 0xdc2   : > { %v2363_v31 = vmul.f32 %v3735_v30, %v2361_v27  ;;  %vm2369_vm13 = vweird.f32 %v3735_v30 }
 0xdc3   : > { %vm2370_vm15 = vmor %vm2368_vm14, %vm2369_vm13 }
 0xdc4   : > { %v2364_v33 = vmul.f32 %v3735_v30, %v2363_v31 }
 0xdc6   : > { %v2365_v34 = vmul.f32 0.5, %v2364_v33 }
 0xdc8   : > { %v2366_v35 = vsub.f32 1.5, %v2365_v34 }
 0xdca   : > { %v2367_v36 = vmul.f32 %v3735_v30, %v2366_v35 }
 0xdcc   : > { %v2371_v38 = vsel %vm2370_vm15, %v3735_v30, %v2367_v36 }
 0xdcd   : > { %v2372_v40 = vmul.f32 %v2371_v38, %v4784_v63 }
 0xdcf   : > { %v2376_v42 = vmul.f32 %v3666_v37, %v2372_v40 }
 0xdd1   : > { %v2380_v43 = vadd.f32 %v3667_v39, %v2376_v42 }
 0xdd3   : > { %3484 = vmatmul.msk.f32.vlgmr.msra.gmra.mxu3 %vm715_vm1, %v2380_v43  ;;  %3485 = vmatmul.msk.f32.vlgmr.msra.gmra.mxu0 %vm715_vm1, %v2380_v43 }
 0xdd4   : > { %3490 = vmatmul.msk.f32.vlgmr.msrb.gmra.mxu1 %vm715_vm1, %v2380_v43  ;;  %2551 = vmatpush.msra.mxu3 %v3509_v44 }
 0xdd5   : > { %2576 = vmatpush.msra.mxu0 %v3514_v45 }
 0xdd6   : > { %2552 = vmatpush.msra.mxu3 %v3508_v46 }
 0xdd7   : > { %2577 = vmatpush.msra.mxu0 %v3513_v19 }
 0xdd8   : > { %2553 = vmatpush.msra.mxu3 %v3507_v47 }
 0xdd9   : > { %2578 = vmatpush.msra.mxu0 %v3512_v48 }
 0xdda   : > { %2554 = vmatpush.msra.mxu3 %v3506_v49 }
 0xddb   : > { %3495 = vmatmul.msk.f32.vlgmr.msrb.gmra.mxu3 %vm715_vm1, %v2380_v43  ;;  %3500 = vmatmul.msk.f32.vlgmr.msrb.gmra.mxu0 %vm715_vm1, %v2380_v43 }
 0xddc   : > { %3505 = vmatmul.msk.f32.vlgmr.msra.gmra.mxu1 %vm715_vm1, %v2380_v43  ;;  %2579 = vmatpush.msra.mxu0 %v3511_v50 }
 0xde3   : > { %3510 = vmatmul.msk.f32.vlgmr.msra.gmra.mxu3 %vm715_vm1, %v2380_v43  ;;  %3515 = vmatmul.msk.f32.vlgmr.msra.gmra.mxu0 %vm715_vm1, %v2380_v43 }
 0xe50   : > { %v2431_v51 = vpop.f32.mrf.mxu0 }
 0xe51   : > { %v2456_v53 = vpop.f32.mrf.mxu1  ;;  %2661 = vrot.lane.b32.xlu1 %v2431_v51, %s3969_s5  ;;  %2738 = vrot.lane.b32.xlu0 %v2431_v51, %s3973_s20 }
 0xe52   : > { %3516 = vmatpush.xpose.msk.msrb.mxu1 %vm954_vm6, %v2431_v51  ;;  %2638 = vmatpush.msrb.mxu3 %v2456_v53 }
 0xe56   : > { %v2406_v54 = vpop.f32.mrf.mxu3 }
 0xe57   : > { %2736 = vrot.lane.b32.xlu2 %v2406_v54, %s3973_s20  ;;  %3517 = vmatmul.msk.f32.vlgmr.msrb.gmra.mxu1 %vm954_vm6, %v2406_v54 }
 0xe58   : > { %v2506_v55 = vpop.f32.mrf.mxu0 }
 0xe59   : > { %2815 = vrot.lane.b32.xlu1 %v2431_v51, %s3970_s18  ;;  %2892 = vrot.lane.b32.xlu0 %v2431_v51, %s3972_s0  ;;  %v2531_v52 = vpop.f32.mrf.mxu1 }
 0xe5a   : > { %2792 = vmatpush.msra.mxu3 %v2506_v55 }
 0xe5e   : > { %v2481_v56 = vpop.f32.mrf.mxu3 }
 0xe5f   : > { %2659 = vrot.lane.b32.xlu2 %v2406_v54, %s3969_s5  ;;  %2715 = vmatpush.msra.mxu1 %v2481_v56 }
 0xe60   : > { %v2581_v6 = vpop.f32.mrf.mxu0 }
 0xe61   : > { %2869 = vmatpush.msrb.mxu1 %v2531_v52  ;;  %2967 = vrot.lane.b32.xlu1 %v2406_v54, %s3971_s19 }
 0xe62   : > { %2890 = vrot.lane.b32.xlu0 %v2406_v54, %s3972_s0  ;;  %s3558_s0 = sshll.u32 %s4095_s1, 3 }
 0xe63   : > { %s3240_s25 = scalar_lea.hbm %s5191_s6, %s3558_s0 }
 0xe64   : > { %s3244_s2 = sshll.u32 %s3240_s25, 4  ;;  %s3245_s2 = int_to_ptr.hbm [resolvable:$true] %s3244_s2 }
 0xe65   : > { %s3898_s4 = sshra.s32 %s3245_s2, 4  ;;  %s3899_s4 = int_to_ptr.hbm [resolvable:$true] %s3898_s4 }
 0xe66   : > { %v2556_v21 = vpop.f32.mrf.mxu3  ;;  %s3900_s1 = scalar_lea.hbm %s3899_s4, 8  ;;  %p3905_p3 = scmp.lt.s32.totalorder %s3899_s4, %s5191_s6 }
 0xe67   : > { %2813 = vrot.lane.b32.xlu2 %v2406_v54, %s3970_s18  ;;  %s658_s18 = sand.u32 1, %s3950_s30   ;;  %p3901_p0 = scmp.ne.s32.totalorder %s3899_s4, %s3900_s1 }
 0xe68   : > { %s3230_s5 = scalar_lea.sflag [#allocation5], %s658_s18  ;;  %p3906_p4 = scmp.lt.s32.totalorder %s3904_s26, %s3900_s1 }
 0xe69   : > { %p3902_p1 = pnand %p3901_p0, %p4112_p5 }
 0xe6a   : > { %2969 = vrot.lane.b32.xlu0 %v2431_v51, %s3971_s19  ;;  %s3357_s19 = sshll.u32 %s658_s18, 3  ;;  %p3907_p7 = por %p3906_p4, %p3905_p3 }
 0xe6b   : > { %s660_s29 = scalar_lea.vmem [#allocation11], %s3357_s19  ;;  %p3903_p2 = pneg %p3902_p1 }
 0xe6c   : > { %s3242_s24 = sshll.u32 %s660_s29, 4  ;;  %s3243_s24 = int_to_ptr.vmem [resolvable:$true] %s3242_s24 }
 0xe6d   : > { %p3908_p8 = pnand %p3907_p7, %p3903_p2 }
 0xeb1   : > { %v2737_v57 = vpop.permute.xlu2 %2736 }
 0xeb9   : > { %v2660_v61 = vpop.permute.xlu2 %2659 }
 0xec1   : > { %v2814_v0 = vpop.permute.xlu2 %2813 }
 0xec3   : > { %v2662_v58 = vpop.permute.xlu1 %2661  ;;  %v2739_v60 = vpop.permute.xlu0 %2738 }
 0xec4   : > { %3519 = vmatpush.xpose.msk.msrb.mxu0 %vm954_vm6, %v2662_v58  ;;  %3522 = vmatpush.xpose.msk.msra.mxu2 %vm954_vm6, %v2739_v60 }
 0xec7   : > { %3520 = vmatmul.msk.f32.vlgmr.msrb.gmra.mxu0 %vm954_vm6, %v2660_v61  ;;  %3523 = vmatmul.msk.f32.vlgmr.msra.gmra.mxu2 %vm954_vm6, %v2737_v57 }
 0xecb   : > { %v2816_v62 = vpop.permute.xlu1 %2815  ;;  %v2893_v63 = vpop.permute.xlu0 %2892 }
 0xecc   : > { %3525 = vmatpush.xpose.msk.msra.mxu0 %vm954_vm6, %v2816_v62  ;;  %3528 = vmatpush.xpose.msk.msrb.mxu2 %vm954_vm6, %v2893_v63 }
 0xecf   : > { %3526 = vmatmul.msk.f32.vlgmr.msra.gmra.mxu0 %vm954_vm6, %v2814_v0 }
 0xed3   : > { %v2968_v5 = vpop.permute.xlu1 %2967 }
 0xed4   : > { %v2891_v1 = vpop.permute.xlu0 %2890  ;;  %v2607_v2 = vpop.f32.mrf.mxu1 }
 0xed5   : > { %3529 = vmatmul.msk.f32.vlgmr.msrb.gmra.mxu2 %vm954_vm6, %v2891_v1  ;;  %v2610_v3 = vsel %vm4347_vm7, %v2607_v2, -1e+30 }
 0xed6   : > { %v2611_v4 = vsel %vm954_vm6, %v2610_v3, -inf }
 0xed7   : > { %2612 = vmax.xlane.f32.xlu2 %v2611_v4 }
 0xedc   : > { %v2970_v24 = vpop.permute.xlu0 %2969 }
 0xedd   : > { %3531 = vmatpush.xpose.msk.msrb.mxu0 %vm954_vm6, %v2970_v24 }
 0xee0   : > { %3532 = vmatmul.msk.f32.vlgmr.msrb.gmra.mxu0 %vm954_vm6, %v2968_v5 }
 0xf44   : > { %v2684_v7 = vpop.f32.mrf.mxu0 }
 0xf45   : > { %v2687_v8 = vsel %vm4347_vm7, %v2684_v7, -1e+30 }
 0xf46   : > { %v2688_v9 = vsel %vm954_vm6, %v2687_v8, -inf }
 0xf47   : > { %2689 = vmax.xlane.f32.xlu0 %v2688_v9 }
 0xf4a   : > { %v2761_v10 = vpop.f32.mrf.mxu2  ;;  %v2613_v11 = vpop.xlane.xlu2 %2612 }
 0xf4b   : > { %v2764_v12 = vsel %vm4347_vm7, %v2761_v10, -1e+30  ;;  %v2614_v13 = vsub.f32 %v2610_v3, %v2613_v11 }
 0xf4c   : > { %v2838_v14 = vpop.f32.mrf.mxu0  ;;  %v2765_v15 = vsel %vm954_vm6, %v2764_v12, -inf }
 0xf4d   : > { %v2615_v16 = vmul.f32 1.442695, %v2614_v13  ;;  %v2841_v18 = vsel %vm4347_vm7, %v2838_v14, -1e+30  ;;  %2766 = vmax.xlane.f32.xlu1 %v2765_v15 }
 0xf4e   : > { %v2842_v17 = vsel %vm954_vm6, %v2841_v18, -inf }
 0xf4f   : > { %3736 = vpow2.f32 %v2615_v16  ;;  %2843 = vmax.xlane.f32.xlu2 %v2842_v17 }
 0xf55   : > { %v3737_v20 = vpop.eup %3736 }
 0xf56   : > { %3518 = vmatmul.msk.f32.vlgmr.msrb.gmra.mxu3 %vm954_vm6, %v3737_v20  ;;  %v2617_v22 = vsel %vm954_vm6, %v3737_v20, 0.0 }
 0xf57   : > { %2946 = vmatpush.msrb.mxu3 %v2556_v21  ;;  %2618 = vadd.xlane.f32.xlu2 %v2617_v22 }
 0xf58   : > { %v2915_v23 = vpop.f32.mrf.mxu2 }
 0xf59   : > { %v2918_v25 = vsel %vm4347_vm7, %v2915_v23, -1e+30 }
 0xf5a   : > { %v2919_v26 = vsel %vm954_vm6, %v2918_v25, -inf }
 0xf5b   : > { %2920 = vmax.xlane.f32.xlu0 %v2919_v26 }
 0xf5d   : > { %v2992_v27 = vpop.f32.mrf.mxu0 }
 0xf5e   : > { %v2995_v28 = vsel %vm4347_vm7, %v2992_v27, -1e+30 }
 0xf5f   : > { %v2996_v29 = vsel %vm954_vm6, %v2995_v28, -inf }
 0xf60   : > { %2997 = vmax.xlane.f32.xlu1 %v2996_v29 }
 0xfba   : > { %v2690_v30 = vpop.xlane.xlu0 %2689 }
 0xfbb   : > { %v2691_v31 = vsub.f32 %v2687_v8, %v2690_v30 }
 0xfbd   : > { %v2692_v33 = vmul.f32 1.442695, %v2691_v31 }
 0xfbf   : > { %3738 = vpow2.f32 %v2692_v33 }
 0xfc0   : > { %v2767_v34 = vpop.xlane.xlu1 %2766 }
 0xfc1   : > { %v2768_v35 = vsub.f32 %v2764_v12, %v2767_v34  ;;  %v3552_v34 = vld [vmem:[%s5122_s13 + $0x168] sm:$0xff] }
 0xfc2   : > { %v2844_v36 = vpop.xlane.xlu2 %2843 }
 0xfc3   : > { %v2769_v37 = vmul.f32 1.442695, %v2768_v35  ;;  %v2845_v38 = vsub.f32 %v2841_v18, %v2844_v36 }
 0xfc5   : > { %v3739_v39 = vpop.eup %3738  ;;  %3740 = vpow2.f32 %v2769_v37  ;;  %v2846_v40 = vmul.f32 1.442695, %v2845_v38 }
 0xfc6   : > { %3521 = vmatmul.msk.f32.vlgmr.msra.gmra.mxu1 %vm954_vm6, %v3739_v39  ;;  %v2694_v41 = vsel %vm954_vm6, %v3739_v39, 0.0 }
 0xfc7   : > { %3742 = vpow2.f32 %v2846_v40  ;;  %3023 = vmatpush.msra.mxu1 %v2581_v6  ;;  %2695 = vadd.xlane.f32.xlu0 %v2694_v41 }
 0xfca   : > { %v4929_v56 = vpop.xlane.xlu2 %2618 }
 0xfcb   : > { %v3741_v42 = vpop.eup %3740  ;;  %v2654_v10 = vand.u32 2147483648, %v4929_v56  ;;  %vm2648_vm0 = vweird.f32 %v4929_v56  ;;  %v2652_v21 = vand.u32 2147483647, %v4929_v56 }
 0xfcc   : > { %3524 = vmatmul.msk.f32.vlgmr.msra.gmra.mxu3 %vm954_vm6, %v3741_v42  ;;  %v2771_v43 = vsel %vm954_vm6, %v3741_v42, 0.0  ;;  %v3547_v42 = vld [vmem:[%s5122_s13 + $0x140] sm:$0xff] }
 0xfcd   : > { %v3743_v44 = vpop.eup %3742  ;;  %2772 = vadd.xlane.f32.xlu1 %v2771_v43  ;;  %v2655_v22 = vor.u32 1.1754944e-38, %v2654_v10  ;;  %vm2653_vm13 = vcmp.eq.f32.partialorder %v2652_v21, 8.507059e+37 }
 0xfce   : > { %v2921_v45 = vpop.xlane.xlu0 %2920  ;;  %3527 = vmatmul.msk.f32.vlgmr.msrb.gmra.mxu1 %vm954_vm6, %v3743_v44  ;;  %v2848_v19 = vsel %vm954_vm6, %v3743_v44, 0.0 }
 0xfcf   : > { %v2922_v46 = vsub.f32 %v2918_v25, %v2921_v45  ;;  %2849 = vadd.xlane.f32.xlu2 %v2848_v19 }
 0xfd1   : > { %v2923_v47 = vmul.f32 1.442695, %v2922_v46 }
 0xfd3   : > { %3744 = vpow2.f32 %v2923_v47  ;;  %v2998_v48 = vpop.xlane.xlu1 %2997 }
 0xfd4   : > { %v2999_v49 = vsub.f32 %v2995_v28, %v2998_v48 }
 0xfd6   : > { %v3000_v50 = vmul.f32 1.442695, %v2999_v49 }
 0xfd8   : > { %3746 = vpow2.f32 %v3000_v50 }
 0xfd9   : > { %v3745_v51 = vpop.eup %3744  ;;  %3748 = vrcp.f32 %v4929_v56  ;;  %v2640_v14 = vpop.f32.mrf.mxu3 }
 0xfda   : > { %3530 = vmatmul.msk.f32.vlgmr.msrb.gmra.mxu3 %vm954_vm6, %v3745_v51  ;;  %v2925_v53 = vsel %vm954_vm6, %v3745_v51, 0.0 }
 0xfdb   : > { %2926 = vadd.xlane.f32.xlu0 %v2925_v53 }
 0xfde   : > { %v3747_v54 = vpop.eup %3746 }
 0xfdf   : > { %3533 = vmatmul.msk.f32.vlgmr.msra.gmra.mxu1 %vm954_vm6, %v3747_v54  ;;  %v3002_v55 = vsel %vm954_vm6, %v3747_v54, 0.0  ;;  %v4932_v57 = vpop.eup %3748 }
 0xfe0   : > { %3003 = vadd.xlane.f32.xlu1 %v3002_v55  ;;  %v2644_v61 = vmul.f32 %v4932_v57, %v4929_v56  ;;  %vm2649_vm6 = vweird.f32 %v4932_v57 }
 0xfe1   : > { %vm4952_vm2 = vmor %vm2648_vm0, %vm2649_vm6 }
 0xfe2   : > { %v2645_v0 = vsub.f32 1.0, %v2644_v61 }
 0xfe4   : > { %v2646_v24 = vmul.f32 %v4932_v57, %v2645_v0 }
 0xfe6   : > { %v2647_v12 = vadd.f32 %v4932_v57, %v2646_v24 }
 0xfe8   : > { %v2651_v27 = vsel %vm4952_vm2, %v4932_v57, %v2647_v12 }
 0xfe9   : > { %v2656_v43 = vsel %vm2653_vm13, %v2655_v22, %v2651_v27 }
 0xfea   : > { %v2657_v54 = vmul.f32 %v2656_v43, %v2640_v14 }
0x103a   : > { %v2696_v52 = vpop.xlane.xlu0 %2695 }
0x103b   : > { %3750 = vrcp.f32 %v2696_v52  ;;  %v2731_v15 = vand.u32 2147483648, %v2696_v52  ;;  %vm2725_vm3 = vweird.f32 %v2696_v52  ;;  %v2729_v17 = vand.u32 2147483647, %v2696_v52 }
0x103d   : > { %v2732_v31 = vor.u32 1.1754944e-38, %v2731_v15  ;;  %vm2730_vm11 = vcmp.eq.f32.partialorder %v2729_v17, 8.507059e+37 }
0x1040   : > { %v2773_v58 = vpop.xlane.xlu1 %2772 }
0x1041   : > { %v3751_v60 = vpop.eup %3750  ;;  %3752 = vrcp.f32 %v2773_v58  ;;  %v2808_v26 = vand.u32 2147483648, %v2773_v58  ;;  %vm2802_vm8 = vweird.f32 %v2773_v58  ;;  %v2806_v29 = vand.u32 2147483647, %v2773_v58 }
0x1042   : > { %v2721_v62 = vmul.f32 %v3751_v60, %v2696_v52  ;;  %v4936_v63 = vpop.xlane.xlu2 %2849  ;;  %vm2726_vm7 = vweird.f32 %v3751_v60 }
0x1043   : > { %3754 = vrcp.f32 %v4936_v63  ;;  %v2717_v23 = vpop.f32.mrf.mxu1  ;;  %vm4957_vm5 = vmor %vm2725_vm3, %vm2726_vm7  ;;  %vm2879_vm12 = vweird.f32 %v4936_v63  ;;  %v2885_v36 = vand.u32 2147483648, %v4936_v63  ;;  %v2883_v39 = vand.u32 2147483647, %v4936_v63 }
0x1044   : > { %v2722_v1 = vsub.f32 1.0, %v2721_v62  ;;  %v2809_v41 = vor.u32 1.1754944e-38, %v2808_v26  ;;  %vm2807_vm15 = vcmp.eq.f32.partialorder %v2806_v29, 8.507059e+37  ;;  %v3090_v29 = vld [vmem:[#allocation8 + $0x50] sm:$0xff] }
0x1045   : > { %v2886_v48 = vor.u32 1.1754944e-38, %v2885_v36  ;;  %vm2884_vm6 = vcmp.eq.f32.partialorder %v2883_v39, 8.507059e+37  ;;  %v3550_v39 = vld [vmem:[%s5122_s13 + $0x158] sm:$0xff] }
0x1046   : > { %v2723_v7 = vmul.f32 %v3751_v60, %v2722_v1 }
0x1047   : > { %v3753_v2 = vpop.eup %3752 }
0x1048   : > { %v2798_v3 = vmul.f32 %v3753_v2, %v2773_v58  ;;  %v2724_v13 = vadd.f32 %v3751_v60, %v2723_v7  ;;  %vm2803_vm4 = vweird.f32 %v3753_v2 }
0x1049   : > { %v4939_v4 = vpop.eup %3754  ;;  %vm4968_vm10 = vmor %vm2802_vm8, %vm2803_vm4 }
0x104a   : > { %v2799_v5 = vsub.f32 1.0, %v2798_v3  ;;  %v2875_v6 = vmul.f32 %v4939_v4, %v4936_v63  ;;  %v2728_v28 = vsel %vm4957_vm5, %v3751_v60, %v2724_v13  ;;  %vm2880_vm9 = vweird.f32 %v4939_v4 }
0x104b   : > { %v2733_v38 = vsel %vm2730_vm11, %v2732_v31, %v2728_v28  ;;  %vm4978_vm14 = vmor %vm2879_vm12, %vm2880_vm9  ;;  %v2871_v57 = vpop.f32.mrf.mxu1  ;;  %v3091_v28 = vld [vmem:[#allocation8 + $0x58] sm:$0xff]  ;;  %v3554_v31 = vld [vmem:[%s5122_s13 + $0x178] sm:$0xff] }
0x104c   : > { %v2876_v8 = vsub.f32 1.0, %v2875_v6  ;;  %v2800_v9 = vmul.f32 %v3753_v2, %v2799_v5  ;;  %v2734_v47 = vmul.f32 %v2733_v38, %v2717_v23  ;;  %3112 = vmatpush.msra.mxu2 %v3091_v28  ;;  %3138 = vmatpush.msra.mxu3 %v3554_v31  ;;  %v3675_v31 = vld [vmem:[%s5193_s28] ss:$0 sm:$0xff] }
0x104e   : > { %v4946_v11 = vpop.xlane.xlu0 %2926  ;;  %v2877_v16 = vmul.f32 %v4939_v4, %v2876_v8  ;;  %v2801_v20 = vadd.f32 %v3753_v2, %v2800_v9  ;;  %v2735_v60 = vadd.f32 %v2734_v47, %v2657_v54  ;;  %3113 = vmatpush.msra.mxu2 %v3090_v29  ;;  %v3544_v47 = vld [vmem:[%s5122_s13 + $0x128] sm:$0xff]  ;;  %v3669_v54 = vld [vmem:[%s5118_s9 + $0x2] ss:$0 sm:$0xff] }
0x104f   : > { %3756 = vrcp.f32 %v4946_v11  ;;  %v2794_v46 = vpop.f32.mrf.mxu3  ;;  %v2960_v49 = vand.u32 2147483647, %v4946_v11  ;;  %v2962_v50 = vand.u32 2147483648, %v4946_v11  ;;  %vm2956_vm0 = vweird.f32 %v4946_v11 }
0x1050   : > { %v2878_v33 = vadd.f32 %v4939_v4, %v2877_v16  ;;  %v2805_v37 = vsel %vm4968_vm10, %v3753_v2, %v2801_v20  ;;  %v3668_v16 = vld [vmem:[%s5117_s8 + $0x2] ss:$0 sm:$0xff] }
0x1051   : > { %v2810_v19 = vsel %vm2807_vm15, %v2809_v41, %v2805_v37  ;;  %vm2961_vm3 = vcmp.eq.f32.partialorder %v2960_v49, 8.507059e+37  ;;  %v2963_v62 = vor.u32 1.1754944e-38, %v2962_v50  ;;  %v3551_v37 = vld [vmem:[%s5122_s13 + $0x160] sm:$0xff]  ;;  %v3548_v41 = vld [vmem:[%s5122_s13 + $0x148] sm:$0xff] }
0x1052   : > { %v2882_v44 = vsel %vm4978_vm14, %v4939_v4, %v2878_v33  ;;  %v2811_v56 = vmul.f32 %v2810_v19, %v2794_v46  ;;  %v3553_v33 = vld [vmem:[%s5122_s13 + $0x170] sm:$0xff]  ;;  %v3543_v49 = vld [vmem:[%s5122_s13 + $0x120] sm:$0xff] }
0x1053   : > { %v3004_v30 = vpop.xlane.xlu1 %3003  ;;  %v2887_v55 = vsel %vm2884_vm6, %v2886_v48, %v2882_v44  ;;  %3139 = vmatpush.msra.mxu3 %v3553_v33  ;;  %v3546_v44 = vld [vmem:[%s5122_s13 + $0x138] sm:$0xff]  ;;  %v3545_v46 = vld [vmem:[%s5122_s13 + $0x130] sm:$0xff] }
0x1054   : > { %3758 = vrcp.f32 %v3004_v30  ;;  %v2888_v63 = vmul.f32 %v2887_v55, %v2871_v57  ;;  %v3037_v0 = vand.u32 2147483647, %v3004_v30  ;;  %v3039_v1 = vand.u32 2147483648, %v3004_v30 }
0x1055   : > { %v3757_v35 = vpop.eup %3756  ;;  %v2812_v3 = vadd.f32 %v2811_v56, %v2735_v60  ;;  %vm3033_vm5 = vweird.f32 %v3004_v30  ;;  %3140 = vmatpush.msra.mxu3 %v3552_v34  ;;  %v3541_v60 = vld [vmem:[%s5122_s13 + $0x110] sm:$0xff] }
0x1056   : > { %v2952_v40 = vmul.f32 %v3757_v35, %v4946_v11  ;;  %vm2957_vm7 = vweird.f32 %v3757_v35  ;;  %v3040_v8 = vor.u32 1.1754944e-38, %v3039_v1  ;;  %vm3038_vm9 = vcmp.eq.f32.partialorder %v3037_v0, 8.507059e+37 }
0x1057   : > { %vm2958_vm2 = vmor %vm2956_vm0, %vm2957_vm7  ;;  %v2889_v10 = vadd.f32 %v2888_v63, %v2812_v3  ;;  %3141 = vmatpush.msra.mxu3 %v3551_v37  ;;  %v3671_v63 = vld [vmem:[%s5121_s12 + $0x2] ss:$0 sm:$0xff] }
0x1058   : > { %v2953_v45 = vsub.f32 1.0, %v2952_v40  ;;  %v3549_v40 = vld [vmem:[%s5122_s13 + $0x150] sm:$0xff]  ;;  %v3672_v3 = vld [vmem:[%s5123_s14 + $0x2] ss:$0 sm:$0xff] }
0x1059   : > { %3142 = vmatpush.msra.mxu3 %v3550_v39 }
0x105a   : > { %v3759_v51 = vpop.eup %3758  ;;  %v2954_v53 = vmul.f32 %v3757_v35, %v2953_v45 }
0x105b   : > { %v3029_v52 = vmul.f32 %v3759_v51, %v3004_v30  ;;  %vm3034_vm4 = vweird.f32 %v3759_v51  ;;  %v3089_v30 = vld [vmem:[#allocation8 + $0x48] sm:$0xff]  ;;  %3143 = vmatpush.msra.mxu3 %v3549_v40 }
0x105c   : > { %v2955_v58 = vadd.f32 %v3757_v35, %v2954_v53  ;;  %vm3035_vm8 = vmor %vm3033_vm5, %vm3034_vm4  ;;  %v3025_v11 = vpop.f32.mrf.mxu1  ;;  %3114 = vmatpush.msra.mxu2 %v3089_v30 }
0x105d   : > { %v3030_v61 = vsub.f32 1.0, %v3029_v52  ;;  %v2948_v5 = vpop.f32.mrf.mxu3  ;;  %3144 = vmatpush.msra.mxu3 %v3548_v41  ;;  %v3670_v52 = vld [vmem:[%s5119_s10 + $0x2] ss:$0 sm:$0xff] }
0x105e   : > { %v2959_v2 = vsel %vm2958_vm2, %v3757_v35, %v2955_v58 }
0x105f   : > { %v3031_v4 = vmul.f32 %v3759_v51, %v3030_v61  ;;  %v2964_v24 = vsel %vm2961_vm3, %v2963_v62, %v2959_v2  ;;  %3145 = vmatpush.msra.mxu3 %v3547_v42  ;;  %v3540_v61 = vld [vmem:[%s5122_s13 + $0x108] sm:$0xff]  ;;  %v3539_v62 = vld [vmem:[%s5122_s13 + $0x100] sm:$0xff] }
0x1060   : > { %v2965_v7 = vmul.f32 %v2964_v24, %v2948_v5 }
0x1061   : > { %v3032_v6 = vadd.f32 %v3759_v51, %v3031_v4  ;;  %3146 = vmatpush.msra.mxu3 %v3546_v44 }
0x1062   : > { %v2966_v14 = vadd.f32 %v2965_v7, %v2889_v10 }
0x1063   : > { %v3036_v9 = vsel %vm3035_vm8, %v3759_v51, %v3032_v6  ;;  %3147 = vmatpush.msra.mxu3 %v3545_v46  ;;  %v3542_v51 = vld [vmem:[%s5122_s13 + $0x118] sm:$0xff] }
0x1064   : > { %v3041_v12 = vsel %vm3038_vm9, %v3040_v8, %v3036_v9 }
0x1065   : > { %v3042_v13 = vmul.f32 %v3041_v12, %v3025_v11  ;;  %3148 = vmatpush.msra.mxu3 %v3544_v47  ;;  %v3200_v12 = vld [vmem:[#allocation9 + $0x18] sm:$0xff] }
0x1066   : > { %3220 = vmatpush.msra.mxu0 %v3200_v12 }
0x1067   : > { %v3043_v15 = vadd.f32 %v3042_v13, %v2966_v14  ;;  %3149 = vmatpush.msra.mxu3 %v3543_v49  ;;  %v3199_v13 = vld [vmem:[#allocation9 + $0x10] sm:$0xff]  ;;  %v3198_v14 = vld [vmem:[#allocation9 + $0x8] sm:$0xff] }
0x1068   : > { %3221 = vmatpush.msra.mxu0 %v3199_v13 }
0x1069   : > { %3044 = vst.msk [vmem:[#allocation2] sm:$0xff] %vm715_vm1, %v3043_v15  ;;  %3150 = vmatpush.msra.mxu3 %v3542_v51  ;;  %v3197_v15 = vld [vmem:[#allocation9] sm:$0xff] }
0x106a   : > { %3222 = vmatpush.msra.mxu0 %v3198_v14 }
0x106b   : > { %3151 = vmatpush.msra.mxu3 %v3541_v60 }
0x106c   : > { %3223 = vmatpush.msra.mxu0 %v3197_v15 }
0x106d   : > { %3152 = vmatpush.msra.mxu3 %v3540_v61 }
0x106f   : > { %3153 = vmatpush.msra.mxu3 %v3539_v62 }
0x1070   : > { %v3045_v18 = vld [vmem:[#allocation2] sm:$0xff] }
0x1071   : > { %v3046_v17 = vadd.f32 %v3045_v18, %v4778_v59  ;;  %v3088_v59 = vld [vmem:[#allocation8 + $0x40] sm:$0xff] }
0x1072   : > { %3115 = vmatpush.msra.mxu2 %v3088_v59 }
0x1073   : > { %v4993_v20 = vadd.f32 %v3668_v16, %v3046_v17 }
0x1075   : > { %v3057_v21 = vsel %vm715_vm1, %v4993_v20, 0.0 }
0x1076   : > { %3058 = vadd.xlane.f32.xlu2 %v3057_v21 }
0x10e9   : > { %v3059_v22 = vpop.xlane.xlu2 %3058 }
0x10ea   : > { %v3060_v23 = vmul.f32 %v3059_v22, %v4233_v32 }
0x10ec   : > { %v3061_v25 = vsub.f32 %v4993_v20, %v3060_v23 }
0x10ee   : > { %v3062_v26 = vmul.f32 %v3061_v25, %v3061_v25 }
0x10f0   : > { %v3063_v27 = vsel %vm715_vm1, %v3062_v26, 0.0 }
0x10f1   : > { %3064 = vadd.xlane.f32.xlu0 %v3063_v27  ;;  %v3673_v27 = vld [vmem:[%s5124_s15] ss:$0 sm:$0xff] }
0x1164   : > { %v3065_v35 = vpop.xlane.xlu0 %3064 }
0x1165   : > { %v3066_v36 = vmul.f32 %v3065_v35, %v4233_v32 }
0x1167   : > { %v3067_v38 = vadd.f32 1e-05, %v3066_v36 }
0x1169   : > { %3760 = vrsqrt.f32 %v3067_v38  ;;  %vm3074_vm11 = vweird.f32 %v3067_v38 }
0x116f   : > { %v3761_v43 = vpop.eup %3760 }
0x1170   : > { %v3069_v45 = vmul.f32 %v3761_v43, %v3067_v38  ;;  %vm3075_vm10 = vweird.f32 %v3761_v43 }
0x1171   : > { %vm3076_vm12 = vmor %vm3074_vm11, %vm3075_vm10 }
0x1172   : > { %v3070_v19 = vmul.f32 %v3761_v43, %v3069_v45 }
0x1174   : > { %v3071_v48 = vmul.f32 0.5, %v3070_v19 }
0x1176   : > { %v3072_v50 = vsub.f32 1.5, %v3071_v48 }
0x1178   : > { %v3073_v53 = vmul.f32 %v3761_v43, %v3072_v50 }
0x117a   : > { %v3077_v55 = vsel %vm3076_vm12, %v3761_v43, %v3073_v53 }
0x117b   : > { %v3078_v56 = vmul.f32 %v3077_v55, %v3061_v25 }
0x117d   : > { %v3082_v57 = vmul.f32 %v3669_v54, %v3078_v56 }
0x117f   : > { %v3086_v58 = vadd.f32 %v3670_v52, %v3082_v57 }
0x1181   : > { %3538 = vmatmul.msk.f32.vlgmr.msra.gmra.mxu2 %vm715_vm1, %v3086_v58 }
0x1204   : > { %v3117_v0 = vpop.f32.mrf.mxu2 }
0x1205   : > { %v3118_v1 = vadd.f32 %v3671_v63, %v3117_v0 }
0x1207   : > { %v3120_v2 = vmax.f32 %v3118_v1, 0.0 }
0x1209   : > { %3154 = vmatmul.f32.vlgmr.msra.gmra.mxu3 %v3120_v2 }
0x128c   : > { %v3155_v4 = vpop.f32.mrf.mxu3 }
0x128d   : > { %v3158_v24 = vadd.f32 %v3155_v4, %v4993_v20 }
0x128f   : > { %v3164_v5 = vadd.f32 %v3672_v3, %v3158_v24 }
0x1291   : > { %v3167_v6 = vsel %vm715_vm1, %v3164_v5, 0.0 }
0x1292   : > { %3168 = vadd.xlane.f32.xlu1 %v3167_v6 }
0x1305   : > { %v3169_v7 = vpop.xlane.xlu1 %3168 }
0x1306   : > { %v3170_v8 = vmul.f32 %v3169_v7, %v4233_v32 }
0x1308   : > { %v3171_v9 = vsub.f32 %v3164_v5, %v3170_v8 }
0x130a   : > { %v3172_v10 = vmul.f32 %v3171_v9, %v3171_v9 }
0x130c   : > { %v3173_v11 = vsel %vm715_vm1, %v3172_v10, 0.0 }
0x130d   : > { %3174 = vadd.xlane.f32.xlu2 %v3173_v11 }
0x1380   : > { %v3175_v16 = vpop.xlane.xlu2 %3174 }
0x1381   : > { %v3176_v18 = vmul.f32 %v3175_v16, %v4233_v32  ;;  %v3674_v32 = vld [vmem:[%s5125_s16] ss:$0 sm:$0xff] }
0x1383   : > { %v3177_v17 = vadd.f32 1e-05, %v3176_v18 }
0x1385   : > { %3762 = vrsqrt.f32 %v3177_v17  ;;  %vm3184_vm14 = vweird.f32 %v3177_v17 }
0x138b   : > { %v3763_v20 = vpop.eup %3762 }
0x138c   : > { %v3179_v21 = vmul.f32 %v3763_v20, %v3177_v17  ;;  %vm3185_vm13 = vweird.f32 %v3763_v20 }
0x138d   : > { %vm3186_vm15 = vmor %vm3184_vm14, %vm3185_vm13 }
0x138e   : > { %v3180_v22 = vmul.f32 %v3763_v20, %v3179_v21 }
0x1390   : > { %v3181_v23 = vmul.f32 0.5, %v3180_v22 }
0x1392   : > { %v3182_v25 = vsub.f32 1.5, %v3181_v23 }
0x1394   : > { %v3183_v26 = vmul.f32 %v3763_v20, %v3182_v25 }
0x1396   : > { %v3187_v28 = vsel %vm3186_vm15, %v3763_v20, %v3183_v26 }
0x1397   : > { %v3188_v29 = vmul.f32 %v3187_v28, %v3171_v9 }
0x1399   : > { %v3192_v30 = vmul.f32 %v3673_v27, %v3188_v29 }
0x139b   : > { %v3196_v59 = vadd.f32 %v3674_v32, %v3192_v30 }
0x139d   : > { %3556 = vmatmul.msk.f32.vlgmr.msra.gmra.mxu0 %vm715_vm1, %v3196_v59 }
0x141a   : > { %v3225_v33 = vpop.f32.mrf.mxu0 }
0x141b   : > { %v3226_v34 = vadd.f32 %v3675_v31, %v3225_v33 }
0x141d   : > { %3228 = vst [vmem:[%s660_s29] sm:$0xff] %v3226_v34 }
0x141e   : > { %3911 = shalt.err (!%p3908_p8)
}
0x141f   : > { %3577 = dma.vmem_to_hbm [thread:$0]  (%p4112_p5), %s3243_s24, 128, %s3245_s2, %s3230_s5  }
0x1420 PF: > { %s5194_s18 = sld [smem:[#allocation18_spill]] }
0x1421   : > { %s5195_s25 = sld [smem:[#allocation16_spill]] }
0x1426   : > { %p3604_p9 = scmp.ge.s32.totalorder %s5194_s18, 2 }
0x1427   : > { %s3256_s28 = sand.u32 1, %s5195_s25  }
0x1428   : > { %p3593_p10 = pnand %p3604_p9, %p4116_p6  ;;  %s3257_s29 = scalar_lea.sflag [#allocation5], %s3256_s28 }
0x142a   : > { %p3594_p11 = pneg %p3593_p10 }
0x142c   : > { %3941 = dma.done.wait (%p3594_p11), %s3257_s29, 128  }
0x142d   : > { %3943 = vsyncadd (%p3594_p11), %s3257_s29, 4294967168  ;;  %s5197_s21 = sld [smem:[#allocation19_spill]]  ;;  %s5200_s0 = smov %s3950_s30 }
0x142e   : > { %s5198_s4 = sld [smem:[#allocation17_spill]] }
0x142f   : > { %s5199_s20 = sld [smem:[#allocation20_spill]] }
0x1433   : > { %p32_p12 = scmp.ge.s32.totalorder %s5197_s21, 4  }
0x1434   : > { %s5201_s30 = smov %s5198_s4 }
0x1435   :  { %34 = sbr.rel (!%p32_p12) target bundleno = 16 (0x10), region = 187 }
0x143a   :  { %3263 = vsyncpa [#allocation4], 1 }
0x143b   :  { %3265 = vsyncpa [#allocation4 + $0x1], 1 }
0x143c   :  { %3266 = vsyncpa [#allocation7], 1 }
0x143d   :  { %3267 = vsyncpa [#allocation10], 1 }
0x143e   :  { %3268 = vsyncpa [#allocation5], 1 }
0x143f   :  { %3270 = vsyncpa [#allocation5 + $0x1], 1 }

</bundles_post_ra>
